<compile_context>
chip_gen: v7x
topology: tpu7x:2x2x1
jax: 0.10.0
libtpu: 0.0.40
codegen_flags: <defaults>
</compile_context>

<pallas_src>
import numpy as np

import jax
import jax.numpy as jnp
from jax.experimental import pallas as pl
from jax.experimental.pallas import tpu as pltpu


_STAGE_PLAN = [("stem", 2, 1), ("layer1", 2, 1), ("layer2", 2, 1), ("layer3", 1, 2)]


# ---------------------------------------------------------------------------
# Pallas kernel factory: the whole 4-stage encoder, fused, per-batch grid step.
# All stage structure (taps, strides, shapes) is static Python metadata.
# ---------------------------------------------------------------------------
def _make_encoder_kernel(stage_plans):
    n_stages = len(stage_plans)

    def kernel(*refs):
        # refs = [a0] + [wk, bias] * n_stages + [out] + [scratch] * (n_stages-1)
        a0_ref = refs[0]
        w_refs = refs[1:1 + 2 * n_stages]
        out_ref = refs[1 + 2 * n_stages]
        scratch_refs = refs[2 + 2 * n_stages:]

        src = a0_ref                                     # (h_in, w_in*cin) f32
        for st, plan in enumerate(stage_plans):          # statically unrolled
            wk_ref, b_ref = w_refs[2 * st], w_refs[2 * st + 1]
            h_out = plan["h_out"]
            cols_in = plan["cols_in"]
            stride = plan["stride"]

            # Build B = (h_out, ntaps*cols_in): one strided sublane load per
            # valid H-tap, zero-filled at the H-padding boundaries.
            slabs = []
            for (lo, cnt, start) in plan["taps"]:
                if stride == 1:
                    rows = src[pl.ds(start, cnt), :]
                else:
                    rows = src[pl.ds(start, cnt, stride=stride), :]
                pieces = []
                if lo > 0:
                    pieces.append(jnp.zeros((lo, cols_in), rows.dtype))
                pieces.append(rows)
                if lo + cnt < h_out:
                    pieces.append(jnp.zeros((h_out - lo - cnt, cols_in), rows.dtype))
                slabs.append(jnp.concatenate(pieces, axis=0) if len(pieces) > 1 else rows)
            b_mat = jnp.concatenate(slabs, axis=1) if len(slabs) > 1 else slabs[0]

            # Single MXU call per stage: (h_out, ntaps*cols_in) @ Wk_cat.
            acc = jnp.dot(b_mat.astype(jnp.bfloat16), wk_ref[...],
                          preferred_element_type=jnp.float32)
            y = jnp.maximum(acc + b_ref[...], 0.0)       # bias + ReLU in f32 (VPU)

            if st < n_stages - 1:
                scratch_refs[st][...] = y                # stays on-chip (VMEM, f32)
                src = scratch_refs[st]
            else:
                out_ref[...] = y.astype(out_ref.dtype)   # bf16 writeback, lane-dense

    return kernel


# ---------------------------------------------------------------------------
# Wrapper-side (trace-time) folding of 3x3 conv structure into GEMM operands.
# ---------------------------------------------------------------------------
def _build_stage_operands(w, b, h_in, w_in, stride, dilation, cin_pad):
    """Fold one 3x3 conv (padding = dilation) into strided-load + GEMM operands.

    w: (Cout, Cin, 3, 3) (PyTorch layout), b: (Cout,)
    Returns:
      wk_cat:   (ntaps * w_in*cin_pad, w_out*Cout)  bf16  K-concatenated folded weight
      bias_row: (1, w_out*Cout)                     f32
      plan:     static metadata for the kernel (valid H-taps, shapes, stride)
    """
    cout, cin, kh, kw = w.shape
    pad = dilation
    h_out = (h_in + 2 * pad - dilation * (kh - 1) - 1) // stride + 1
    w_out = (w_in + 2 * pad - dilation * (kw - 1) - 1) // stride + 1

    # Valid H-taps: contiguous ho range per ki; fully-OOB taps are dropped.
    taps = []
    for ki in range(kh):
        valid = [ho for ho in range(h_out)
                 if 0 <= stride * ho + dilation * ki - pad < h_in]
        if not valid:
            continue
        lo, hi = valid[0], valid[-1]
        cnt = hi - lo + 1
        start = stride * lo + dilation * ki - pad
        taps.append((ki, lo, cnt, start))

    # W-tap placement (pure structure) contracted with the conv weight.
    pw = np.zeros((kw, w_in, w_out), np.float32)
    for kj in range(kw):
        for wo in range(w_out):
            wi = stride * wo + dilation * kj - pad
            if 0 <= wi < w_in:
                pw[kj, wi, wo] = 1.0

    w_padded = jnp.zeros((cout, cin_pad, kh, kw), jnp.float32).at[:, :cin].set(w)
    w_t = jnp.transpose(w_padded, (2, 3, 1, 0))                     # (ki,kj,ci,co)
    wk_full = jnp.einsum('jvw,ijco->ivcwo', jnp.asarray(pw), w_t)   # (ki,wi,ci,wo,co)
    wk_full = wk_full.reshape(kh, w_in * cin_pad, w_out * cout)
    wk_cat = jnp.concatenate([wk_full[ki] for (ki, _, _, _) in taps],
                             axis=0).astype(jnp.bfloat16)

    bias_row = jnp.tile(b, (w_out,)).reshape(1, w_out * cout).astype(jnp.float32)

    plan = {
        "h_out": h_out, "w_out": w_out, "cout": cout,
        "cols_in": w_in * cin_pad, "cols_out": w_out * cout,
        "stride": stride,
        "taps": [(lo, cnt, start) for (_, lo, cnt, start) in taps],
    }
    return wk_cat, bias_row, plan


def _pad_channels(cin, w_in):
    """Smallest cin' >= cin with lane-dense w_in*cin' (multiple of 128)."""
    for cp in range(cin, cin + 129):
        if (w_in * cp) % 128 == 0:
            return cp
    return cin


# ---------------------------------------------------------------------------
# Params (deterministic synthetic encoder) and model forward
# ---------------------------------------------------------------------------
def init_params(cin=4):
    key = jax.random.PRNGKey(0)
    plan = [("stem", cin, 16), ("layer1", 16, 32),
            ("layer2", 32, 64), ("layer3", 64, 96)]
    params = {}
    for i, (name, ci, co) in enumerate(plan):
        kw_, kb_ = jax.random.split(jax.random.fold_in(key, i))
        params[name] = {
            "w": 0.1 * jax.random.normal(kw_, (co, ci, 3, 3), jnp.float32),
            "b": 0.01 * jax.random.normal(kb_, (co,), jnp.float32),
        }
        # BN folded as identity (gamma=1, beta=0, mean=0, var=1)
    return params


def _forward_impl(params, x_nchw):
    """Mirrors ModelDeepLabV3PlusMultiTask.forward.

    Returns (out, features_lowest): `out` is {} exactly like the PyTorch
    module; `features_lowest` is the only encoder output forward() touches
    (features[max scale]) and is exposed here for validation.
    """
    input_resolution = (x_nchw.shape[2], x_nchw.shape[3])  # noqa: F841 (parity)
    n, c, h, w = x_nchw.shape
    x = jnp.transpose(x_nchw, (0, 2, 3, 1)).astype(jnp.float32)    # NCHW -> NHWC

    # Lane-density padding of the stem input channels (4 -> 8 => W*C = 128).
    cin_pad = _pad_channels(c, w)
    if cin_pad != c:
        x = jnp.pad(x, ((0, 0), (0, 0), (0, 0), (0, cin_pad - c)))
    a0 = x.reshape(n, h, w * cin_pad)                              # (N, H, 128) f32

    # Fold each stage's conv into GEMM operands + static kernel plans.
    stage_args, plans = [], []
    hi_, wi_, ci_ = h, w, cin_pad
    for name, stride, dil in _STAGE_PLAN:
        if plans:  # intermediate activations are stored unpadded in VMEM scratch
            assert (wi_ * ci_) % 128 == 0, "stage input must stay lane-dense"
        wk, brow, plan = _build_stage_operands(params[name]["w"], params[name]["b"],
                                               hi_, wi_, stride, dil, ci_)
        stage_args += [wk, brow]
        plans.append(plan)
        hi_, wi_, ci_ = plan["h_out"], plan["w_out"], plan["cout"]

    last = plans[-1]
    kernel = _make_encoder_kernel(plans)

    in_specs = [pl.BlockSpec((None, h, w * cin_pad), lambda b: (b, 0, 0))]
    for wk, brow in zip(stage_args[0::2], stage_args[1::2]):
        in_specs.append(pl.BlockSpec(wk.shape, lambda b: (0, 0)))
        in_specs.append(pl.BlockSpec(brow.shape, lambda b: (0, 0)))
    out_spec = pl.BlockSpec((None, last["h_out"], last["cols_out"]),
                            lambda b: (b, 0, 0))
    # Stage 1-3 outputs never leave VMEM.
    scratch = [pltpu.VMEM((p["h_out"], p["cols_out"]), jnp.float32)
               for p in plans[:-1]]

    y4 = pl.pallas_call(
        kernel,
        grid=(n,),
        in_specs=in_specs,
        out_specs=out_spec,
        out_shape=jax.ShapeDtypeStruct((n, last["h_out"], last["cols_out"]),
                                       jnp.bfloat16),
        scratch_shapes=scratch,
        compiler_params=pltpu.CompilerParams(
            dimension_semantics=("parallel",)),     # v7x: split batch over 2 TCs
    )(a0, *stage_args)

    features_lowest = y4.reshape(n, last["h_out"], last["w_out"], last["cout"])

    out = {}  # TODO(synk): ASPP + decoder heads are never constructed in the
    #           reference module's __init__, so forward has nothing further.
    return out, features_lowest


forward = jax.jit(_forward_impl)


# ---------------------------------------------------------------------------
# Pure-JAX reference (f32 lax.conv) for numerical validation of the lowest
# scale feature map (the only tensor forward() uses).
# ---------------------------------------------------------------------------
def _reference_lowest(params, x_nchw):
    x = jnp.transpose(x_nchw, (0, 2, 3, 1)).astype(jnp.float32)
    for name, stride, dil in _STAGE_PLAN:
        wgt, bias = params[name]["w"], params[name]["b"]
        w_hwio = jnp.transpose(wgt, (2, 3, 1, 0))
        x = jax.lax.conv_general_dilated(
            x, w_hwio, window_strides=(stride, stride),
            padding=[(dil, dil), (dil, dil)], rhs_dilation=(dil, dil),
            dimension_numbers=("NHWC", "HWIO", "NHWC"))
        x = jnp.maximum(x + bias, 0.0)
    return x


if __name__ == "__main__":
    key = jax.random.PRNGKey(0)
    x = jax.random.normal(key, (2, 4, 16, 16), jnp.float32)  # NCHW, like PyTorch

    params = init_params(cin=4)
    out, feat_lowest = forward(params, x)
    jax.block_until_ready(feat_lowest)

    assert out == {}
    assert feat_lowest.shape == (2, 2, 2, 96)

    ref = _reference_lowest(params, x)
    assert jnp.allclose(feat_lowest.astype(jnp.float32), ref,
                        rtol=5e-2, atol=5e-2), "lowest-scale feature mismatch"

    print("KERNEL_OK")
</pallas_src>

<mosaic_0001>
module attributes {stable_mosaic.version = 11 : i64} {
  func.func @kernel(%arg0: i32, %arg1: memref<1x16x128xf32, #tpu.memory_space<vmem>>, %arg2: memref<384x128xbf16, #tpu.memory_space<vmem>>, %arg3: memref<1x128xf32, #tpu.memory_space<vmem>>, %arg4: memref<384x128xbf16, #tpu.memory_space<vmem>>, %arg5: memref<1x128xf32, #tpu.memory_space<vmem>>, %arg6: memref<384x128xbf16, #tpu.memory_space<vmem>>, %arg7: memref<1x128xf32, #tpu.memory_space<vmem>>, %arg8: memref<128x192xbf16, #tpu.memory_space<vmem>>, %arg9: memref<1x192xf32, #tpu.memory_space<vmem>>, %arg10: memref<1x2x192xbf16, #tpu.memory_space<vmem>>, %arg11: memref<8x128xf32, #tpu.memory_space<vmem>>, %arg12: memref<4x128xf32, #tpu.memory_space<vmem>>, %arg13: memref<2x128xf32, #tpu.memory_space<vmem>>) attributes {dimension_semantics = [#tpu.dimension_semantics<parallel>], iteration_bounds = array<i64: 2>, scalar_prefetch = 0 : i64, scratch_operands = 3 : i64, tpu.core_type = #tpu.core_type<tc>, window_params = [{transform_indices = @transform_0, window_bounds = array<i64: 1, 16, 128>}, {pipeline_mode = #tpu.pipeline_mode<synchronous>, transform_indices = @transform_1, window_bounds = array<i64: 384, 128>}, {pipeline_mode = #tpu.pipeline_mode<synchronous>, transform_indices = @transform_2, window_bounds = array<i64: 1, 128>}, {pipeline_mode = #tpu.pipeline_mode<synchronous>, transform_indices = @transform_3, window_bounds = array<i64: 384, 128>}, {pipeline_mode = #tpu.pipeline_mode<synchronous>, transform_indices = @transform_4, window_bounds = array<i64: 1, 128>}, {pipeline_mode = #tpu.pipeline_mode<synchronous>, transform_indices = @transform_5, window_bounds = array<i64: 384, 128>}, {pipeline_mode = #tpu.pipeline_mode<synchronous>, transform_indices = @transform_6, window_bounds = array<i64: 1, 128>}, {pipeline_mode = #tpu.pipeline_mode<synchronous>, transform_indices = @transform_7, window_bounds = array<i64: 128, 192>}, {pipeline_mode = #tpu.pipeline_mode<synchronous>, transform_indices = @transform_8, window_bounds = array<i64: 1, 192>}, {transform_indices = @transform_9, window_bounds = array<i64: 1, 2, 192>}]} {
    %c0 = arith.constant 0 : index
    %c1 = arith.constant 1 : index
    %c0_0 = arith.constant 0 : index
    %0 = tpu.strided_load %arg1[%c0, %c1, %c0_0] {strides = array<i32: 1, 2, 1>} : memref<1x16x128xf32, #tpu.memory_space<vmem>>, vector<1x7x128xf32>
    %1 = vector.shape_cast %0 : vector<1x7x128xf32> to vector<7x128xf32>
    %cst = arith.constant 0.000000e+00 : f32
    %2 = vector.broadcast %cst : f32 to vector<1x128xf32>
    %3 = tpu.concatenate %2, %1 in 0 : vector<1x128xf32>, vector<7x128xf32> -> vector<8x128xf32>
    %c0_1 = arith.constant 0 : index
    %c0_2 = arith.constant 0 : index
    %c0_3 = arith.constant 0 : index
    %4 = tpu.strided_load %arg1[%c0_1, %c0_2, %c0_3] {strides = array<i32: 1, 2, 1>} : memref<1x16x128xf32, #tpu.memory_space<vmem>>, vector<1x8x128xf32>
    %5 = vector.shape_cast %4 : vector<1x8x128xf32> to vector<8x128xf32>
    %c0_4 = arith.constant 0 : index
    %c1_5 = arith.constant 1 : index
    %c0_6 = arith.constant 0 : index
    %6 = tpu.strided_load %arg1[%c0_4, %c1_5, %c0_6] {strides = array<i32: 1, 2, 1>} : memref<1x16x128xf32, #tpu.memory_space<vmem>>, vector<1x8x128xf32>
    %7 = vector.shape_cast %6 : vector<1x8x128xf32> to vector<8x128xf32>
    %8 = tpu.concatenate %3, %5, %7 in 1 : vector<8x128xf32>, vector<8x128xf32>, vector<8x128xf32> -> vector<8x384xf32>
    %9 = arith.truncf %8 : vector<8x384xf32> to vector<8x384xbf16>
    %c0_7 = arith.constant 0 : index
    %c0_8 = arith.constant 0 : index
    %10 = vector.load %arg2[%c0_7, %c0_8] : memref<384x128xbf16, #tpu.memory_space<vmem>>, vector<384x128xbf16>
    %cst_9 = arith.constant dense<0.000000e+00> : vector<8x128xf32>
    %11 = tpu.matmul %9, %10, %cst_9 {dimension_numbers = #tpu.dot_dimension_numbers<[1], [0], [0], [1], [0, 0, 1, 1], [], []>} : vector<8x384xbf16>, vector<384x128xbf16>, vector<8x128xf32> -> vector<8x128xf32>
    %c0_10 = arith.constant 0 : index
    %c0_11 = arith.constant 0 : index
    %12 = vector.load %arg3[%c0_10, %c0_11] : memref<1x128xf32, #tpu.memory_space<vmem>>, vector<1x128xf32>
    %13 = vector.broadcast %12 : vector<1x128xf32> to vector<8x128xf32>
    %14 = arith.addf %11, %13 : vector<8x128xf32>
    %cst_12 = arith.constant 0.000000e+00 : f32
    %15 = vector.broadcast %cst_12 : f32 to vector<8x128xf32>
    %16 = arith.maximumf %14, %15 : vector<8x128xf32>
    %c0_13 = arith.constant 0 : index
    %c0_14 = arith.constant 0 : index
    %17 = vector.load %arg11[%c0_13, %c0_14] : memref<8x128xf32, #tpu.memory_space<vmem>>, vector<8x128xf32>
    tpu.vector_store %arg11[%c0_13, %c0_14], %16 {strides = array<i32>} : memref<8x128xf32, #tpu.memory_space<vmem>>, vector<8x128xf32>,
    %c1_15 = arith.constant 1 : index
    %c0_16 = arith.constant 0 : index
    %18 = tpu.strided_load %arg11[%c1_15, %c0_16] {strides = array<i32: 2, 1>} : memref<8x128xf32, #tpu.memory_space<vmem>>, vector<3x128xf32>
    %cst_17 = arith.constant 0.000000e+00 : f32
    %19 = vector.broadcast %cst_17 : f32 to vector<1x128xf32>
    %20 = tpu.concatenate %19, %18 in 0 : vector<1x128xf32>, vector<3x128xf32> -> vector<4x128xf32>
    %c0_18 = arith.constant 0 : index
    %c0_19 = arith.constant 0 : index
    %21 = tpu.strided_load %arg11[%c0_18, %c0_19] {strides = array<i32: 2, 1>} : memref<8x128xf32, #tpu.memory_space<vmem>>, vector<4x128xf32>
    %c1_20 = arith.constant 1 : index
    %c0_21 = arith.constant 0 : index
    %22 = tpu.strided_load %arg11[%c1_20, %c0_21] {strides = array<i32: 2, 1>} : memref<8x128xf32, #tpu.memory_space<vmem>>, vector<4x128xf32>
    %23 = tpu.concatenate %20, %21, %22 in 1 : vector<4x128xf32>, vector<4x128xf32>, vector<4x128xf32> -> vector<4x384xf32>
    %24 = arith.truncf %23 : vector<4x384xf32> to vector<4x384xbf16>
    %c0_22 = arith.constant 0 : index
    %c0_23 = arith.constant 0 : index
    %25 = vector.load %arg4[%c0_22, %c0_23] : memref<384x128xbf16, #tpu.memory_space<vmem>>, vector<384x128xbf16>
    %cst_24 = arith.constant dense<0.000000e+00> : vector<4x128xf32>
    %26 = tpu.matmul %24, %25, %cst_24 {dimension_numbers = #tpu.dot_dimension_numbers<[1], [0], [0], [1], [0, 0, 1, 1], [], []>} : vector<4x384xbf16>, vector<384x128xbf16>, vector<4x128xf32> -> vector<4x128xf32>
    %c0_25 = arith.constant 0 : index
    %c0_26 = arith.constant 0 : index
    %27 = vector.load %arg5[%c0_25, %c0_26] : memref<1x128xf32, #tpu.memory_space<vmem>>, vector<1x128xf32>
    %28 = vector.broadcast %27 : vector<1x128xf32> to vector<4x128xf32>
    %29 = arith.addf %26, %28 : vector<4x128xf32>
    %cst_27 = arith.constant 0.000000e+00 : f32
    %30 = vector.broadcast %cst_27 : f32 to vector<4x128xf32>
    %31 = arith.maximumf %29, %30 : vector<4x128xf32>
    %c0_28 = arith.constant 0 : index
    %c0_29 = arith.constant 0 : index
    %32 = vector.load %arg12[%c0_28, %c0_29] : memref<4x128xf32, #tpu.memory_space<vmem>>, vector<4x128xf32>
    tpu.vector_store %arg12[%c0_28, %c0_29], %31 {strides = array<i32>} : memref<4x128xf32, #tpu.memory_space<vmem>>, vector<4x128xf32>,
    %c1_30 = arith.constant 1 : index
    %c0_31 = arith.constant 0 : index
    %33 = tpu.strided_load %arg12[%c1_30, %c0_31] {strides = array<i32: 2, 1>} : memref<4x128xf32, #tpu.memory_space<vmem>>, vector<1x128xf32>
    %cst_32 = arith.constant 0.000000e+00 : f32
    %34 = vector.broadcast %cst_32 : f32 to vector<1x128xf32>
    %35 = tpu.concatenate %34, %33 in 0 : vector<1x128xf32>, vector<1x128xf32> -> vector<2x128xf32>
    %c0_33 = arith.constant 0 : index
    %c0_34 = arith.constant 0 : index
    %36 = tpu.strided_load %arg12[%c0_33, %c0_34] {strides = array<i32: 2, 1>} : memref<4x128xf32, #tpu.memory_space<vmem>>, vector<2x128xf32>
    %c1_35 = arith.constant 1 : index
    %c0_36 = arith.constant 0 : index
    %37 = tpu.strided_load %arg12[%c1_35, %c0_36] {strides = array<i32: 2, 1>} : memref<4x128xf32, #tpu.memory_space<vmem>>, vector<2x128xf32>
    %38 = tpu.concatenate %35, %36, %37 in 1 : vector<2x128xf32>, vector<2x128xf32>, vector<2x128xf32> -> vector<2x384xf32>
    %39 = arith.truncf %38 : vector<2x384xf32> to vector<2x384xbf16>
    %c0_37 = arith.constant 0 : index
    %c0_38 = arith.constant 0 : index
    %40 = vector.load %arg6[%c0_37, %c0_38] : memref<384x128xbf16, #tpu.memory_space<vmem>>, vector<384x128xbf16>
    %cst_39 = arith.constant dense<0.000000e+00> : vector<2x128xf32>
    %41 = tpu.matmul %39, %40, %cst_39 {dimension_numbers = #tpu.dot_dimension_numbers<[1], [0], [0], [1], [0, 0, 1, 1], [], []>} : vector<2x384xbf16>, vector<384x128xbf16>, vector<2x128xf32> -> vector<2x128xf32>
    %c0_40 = arith.constant 0 : index
    %c0_41 = arith.constant 0 : index
    %42 = vector.load %arg7[%c0_40, %c0_41] : memref<1x128xf32, #tpu.memory_space<vmem>>, vector<1x128xf32>
    %43 = vector.broadcast %42 : vector<1x128xf32> to vector<2x128xf32>
    %44 = arith.addf %41, %43 : vector<2x128xf32>
    %cst_42 = arith.constant 0.000000e+00 : f32
    %45 = vector.broadcast %cst_42 : f32 to vector<2x128xf32>
    %46 = arith.maximumf %44, %45 : vector<2x128xf32>
    %c0_43 = arith.constant 0 : index
    %c0_44 = arith.constant 0 : index
    %47 = vector.load %arg13[%c0_43, %c0_44] : memref<2x128xf32, #tpu.memory_space<vmem>>, vector<2x128xf32>
    tpu.vector_store %arg13[%c0_43, %c0_44], %46 {strides = array<i32>} : memref<2x128xf32, #tpu.memory_space<vmem>>, vector<2x128xf32>,
    %c0_45 = arith.constant 0 : index
    %c0_46 = arith.constant 0 : index
    %48 = vector.load %arg13[%c0_45, %c0_46] : memref<2x128xf32, #tpu.memory_space<vmem>>, vector<2x128xf32>
    %49 = arith.truncf %48 : vector<2x128xf32> to vector<2x128xbf16>
    %c0_47 = arith.constant 0 : index
    %c0_48 = arith.constant 0 : index
    %50 = vector.load %arg8[%c0_47, %c0_48] : memref<128x192xbf16, #tpu.memory_space<vmem>>, vector<128x192xbf16>
    %cst_49 = arith.constant dense<0.000000e+00> : vector<2x192xf32>
    %51 = tpu.matmul %49, %50, %cst_49 {dimension_numbers = #tpu.dot_dimension_numbers<[1], [0], [0], [1], [0, 0, 1, 1], [], []>} : vector<2x128xbf16>, vector<128x192xbf16>, vector<2x192xf32> -> vector<2x192xf32>
    %c0_50 = arith.constant 0 : index
    %c0_51 = arith.constant 0 : index
    %52 = vector.load %arg9[%c0_50, %c0_51] : memref<1x192xf32, #tpu.memory_space<vmem>>, vector<1x192xf32>
    %53 = vector.broadcast %52 : vector<1x192xf32> to vector<2x192xf32>
    %54 = arith.addf %51, %53 : vector<2x192xf32>
    %cst_52 = arith.constant 0.000000e+00 : f32
    %55 = vector.broadcast %cst_52 : f32 to vector<2x192xf32>
    %56 = arith.maximumf %54, %55 : vector<2x192xf32>
    %57 = arith.truncf %56 : vector<2x192xf32> to vector<2x192xbf16>
    %c0_53 = arith.constant 0 : index
    %c0_54 = arith.constant 0 : index
    %c0_55 = arith.constant 0 : index
    %58 = vector.load %arg10[%c0_53, %c0_54, %c0_55] : memref<1x2x192xbf16, #tpu.memory_space<vmem>>, vector<1x2x192xbf16>
    %59 = vector.shape_cast %58 : vector<1x2x192xbf16> to vector<2x192xbf16>
    %60 = vector.shape_cast %57 : vector<2x192xbf16> to vector<1x2x192xbf16>
    tpu.vector_store %arg10[%c0_53, %c0_54, %c0_55], %60 {strides = array<i32>} : memref<1x2x192xbf16, #tpu.memory_space<vmem>>, vector<1x2x192xbf16>,
    return
  }
  func.func @transform_0(%arg0: i32) -> (i32, i32, i32) {
    %c0_i32 = arith.constant 0 : i32
    %c0_i32_0 = arith.constant 0 : i32
    %c0_i32_1 = arith.constant 0 : i32
    return %arg0, %c0_i32, %c0_i32_0 : i32, i32, i32
  }
  func.func @transform_1(%arg0: i32) -> (i32, i32) {
    %c0_i32 = arith.constant 0 : i32
    %c0_i32_0 = arith.constant 0 : i32
    %c0_i32_1 = arith.constant 0 : i32
    return %c0_i32, %c0_i32_0 : i32, i32
  }
  func.func @transform_2(%arg0: i32) -> (i32, i32) {
    %c0_i32 = arith.constant 0 : i32
    %c0_i32_0 = arith.constant 0 : i32
    %c0_i32_1 = arith.constant 0 : i32
    return %c0_i32, %c0_i32_0 : i32, i32
  }
  func.func @transform_3(%arg0: i32) -> (i32, i32) {
    %c0_i32 = arith.constant 0 : i32
    %c0_i32_0 = arith.constant 0 : i32
    %c0_i32_1 = arith.constant 0 : i32
    return %c0_i32, %c0_i32_0 : i32, i32
  }
  func.func @transform_4(%arg0: i32) -> (i32, i32) {
    %c0_i32 = arith.constant 0 : i32
    %c0_i32_0 = arith.constant 0 : i32
    %c0_i32_1 = arith.constant 0 : i32
    return %c0_i32, %c0_i32_0 : i32, i32
  }
  func.func @transform_5(%arg0: i32) -> (i32, i32) {
    %c0_i32 = arith.constant 0 : i32
    %c0_i32_0 = arith.constant 0 : i32
    %c0_i32_1 = arith.constant 0 : i32
    return %c0_i32, %c0_i32_0 : i32, i32
  }
  func.func @transform_6(%arg0: i32) -> (i32, i32) {
    %c0_i32 = arith.constant 0 : i32
    %c0_i32_0 = arith.constant 0 : i32
    %c0_i32_1 = arith.constant 0 : i32
    return %c0_i32, %c0_i32_0 : i32, i32
  }
  func.func @transform_7(%arg0: i32) -> (i32, i32) {
    %c0_i32 = arith.constant 0 : i32
    %c0_i32_0 = arith.constant 0 : i32
    %c0_i32_1 = arith.constant 0 : i32
    return %c0_i32, %c0_i32_0 : i32, i32
  }
  func.func @transform_8(%arg0: i32) -> (i32, i32) {
    %c0_i32 = arith.constant 0 : i32
    %c0_i32_0 = arith.constant 0 : i32
    %c0_i32_1 = arith.constant 0 : i32
    return %c0_i32, %c0_i32_0 : i32, i32
  }
  func.func @transform_9(%arg0: i32) -> (i32, i32, i32) {
    %c0_i32 = arith.constant 0 : i32
    %c0_i32_0 = arith.constant 0 : i32
    %c0_i32_1 = arith.constant 0 : i32
    return %arg0, %c0_i32, %c0_i32_0 : i32, i32, i32
  }
}

</mosaic_0001>

<bundles_post_ra>
// kernel: squeeze.8
= control target key start
LH: loop header
LB: loop body
LE: loop exit
PB: predicated region body
PF: predicated region fallthrough
CT: control target
= control target key end

     0   :  { %vm2051_vm0 = vcmask 1047556   ;;  %s4462_s18 = smov 112   ;;  %s4465_s21 = smov 64   ;;  %vm2053_vm1 = vcmask 130048   ;;  %vm2198_vm2 = vcmask 1048448   ;;  %vm2373_vm3 = vcmask 917248   ;;  %s5007_s0 = inlined_call_operand.vmem [shape: bf16[1,16,8,8,16], index: 0, kind: input, shape index: {}]   ;;  %s5008_s1 = inlined_call_operand.vmem [shape: bf16[128,128], index: 1, kind: output, shape index: {}]  }
   0x1   :  { %v4149_v0 = vld [vmem:[%s5007_s0 + $0x98] sm:$0xff]   ;;  %v4150_v1 = vld [vmem:[%s5007_s0 + $0x90] sm:$0xff]   ;;  %v4151_v2 = vld [vmem:[%s5007_s0 + $0x88] sm:$0xff]   ;;  %s4466_s22 = smov 48   ;;  %s4467_s23 = smov 32   ;;  %vm2548_vm4 = vcmask 786048  }
   0x2   :  { %v3987_v3 = vunpack.c.l.bf16 %v4149_v0  ;;  %v3988_v4 = vunpack.c.h.bf16 %v4149_v0  ;;  %v3991_v5 = vunpack.c.l.bf16 %v4150_v1  ;;  %v3992_v6 = vunpack.c.h.bf16 %v4150_v1  ;;  %v4152_v7 = vld [vmem:[%s5007_s0 + $0x80] sm:$0xff]   ;;  %v4165_v8 = vld [vmem:[%s5007_s0 + $0x18] sm:$0xff]   ;;  %v4166_v9 = vld [vmem:[%s5007_s0 + $0x10] sm:$0xff]   ;;  %s4468_s24 = smov 16  }
   0x3   :  { %v3995_v10 = vunpack.c.l.bf16 %v4151_v2  ;;  %v3996_v11 = vunpack.c.h.bf16 %v4151_v2  ;;  %v3999_v12 = vunpack.c.l.bf16 %v4152_v7  ;;  %v4000_v13 = vunpack.c.h.bf16 %v4152_v7  ;;  %v4167_v14 = vld [vmem:[%s5007_s0 + $0x8] sm:$0xff]   ;;  %v4062_v15 = vld [vmem:[%s5007_s0] sm:$0xff]   ;;  %v4145_v16 = vld [vmem:[%s5007_s0 + $0xb8] sm:$0xff]  }
   0x4   :  { %1428 = vst [vmem:[#allocation1 + $0x138] sm:$0xff] %v3988_v4  ;;  %1444 = vst [vmem:[#allocation1 + $0x130] sm:$0xff] %v3987_v3  ;;  %v4051_v17 = vunpack.c.l.bf16 %v4165_v8  ;;  %v4052_v18 = vunpack.c.h.bf16 %v4165_v8  ;;  %v4055_v19 = vunpack.c.l.bf16 %v4166_v9  ;;  %v4056_v20 = vunpack.c.h.bf16 %v4166_v9  ;;  %v4146_v21 = vld [vmem:[%s5007_s0 + $0xb0] sm:$0xff]   ;;  %v4147_v22 = vld [vmem:[%s5007_s0 + $0xa8] sm:$0xff]  }
   0x5   :  { %1460 = vst [vmem:[#allocation1 + $0x128] sm:$0xff] %v3992_v6  ;;  %1476 = vst [vmem:[#allocation1 + $0x120] sm:$0xff] %v3991_v5  ;;  %v4148_v23 = vld [vmem:[%s5007_s0 + $0xa0] sm:$0xff]   ;;  %v4059_v24 = vunpack.c.l.bf16 %v4167_v14  ;;  %v4060_v25 = vunpack.c.h.bf16 %v4167_v14  ;;  %v4063_v26 = vunpack.c.l.bf16 %v4062_v15  ;;  %v4064_v27 = vunpack.c.h.bf16 %v4062_v15  ;;  %v4161_v28 = vld [vmem:[%s5007_s0 + $0x38] sm:$0xff]  }
   0x6   :  { %1492 = vst [vmem:[#allocation1 + $0x118] sm:$0xff] %v3996_v11  ;;  %1508 = vst [vmem:[#allocation1 + $0x110] sm:$0xff] %v3995_v10  ;;  %v4162_v29 = vld [vmem:[%s5007_s0 + $0x30] sm:$0xff]   ;;  %v3971_v30 = vunpack.c.l.bf16 %v4145_v16  ;;  %v3972_v31 = vunpack.c.h.bf16 %v4145_v16  ;;  %v3975_v32 = vunpack.c.l.bf16 %v4146_v21  ;;  %v3976_v33 = vunpack.c.h.bf16 %v4146_v21  ;;  %v4163_v34 = vld [vmem:[%s5007_s0 + $0x28] sm:$0xff]  }
   0x7   :  { %1524 = vst [vmem:[#allocation1 + $0x108] sm:$0xff] %v4000_v13  ;;  %1540 = vst [vmem:[#allocation1 + $0x100] sm:$0xff] %v3999_v12  ;;  %v4164_v35 = vld [vmem:[%s5007_s0 + $0x20] sm:$0xff]   ;;  %v3979_v36 = vunpack.c.l.bf16 %v4147_v22  ;;  %v3980_v37 = vunpack.c.h.bf16 %v4147_v22  ;;  %v3983_v38 = vunpack.c.l.bf16 %v4148_v23  ;;  %v3984_v39 = vunpack.c.h.bf16 %v4148_v23  ;;  %v4117_v40 = vld [vmem:[%s5007_s0 + $0x198] sm:$0xff]  }
   0x8   :  { %1940 = vst [vmem:[#allocation1 + $0x38] sm:$0xff] %v4052_v18  ;;  %1956 = vst [vmem:[#allocation1 + $0x30] sm:$0xff] %v4051_v17  ;;  %v4118_v41 = vld [vmem:[%s5007_s0 + $0x190] sm:$0xff]   ;;  %v4035_v42 = vunpack.c.l.bf16 %v4161_v28  ;;  %v4036_v43 = vunpack.c.h.bf16 %v4161_v28  ;;  %v4039_v44 = vunpack.c.l.bf16 %v4162_v29  ;;  %v4040_v45 = vunpack.c.h.bf16 %v4162_v29  ;;  %v4119_v46 = vld [vmem:[%s5007_s0 + $0x188] sm:$0xff]  }
   0x9   :  { %1972 = vst [vmem:[#allocation1 + $0x28] sm:$0xff] %v4056_v20  ;;  %1988 = vst [vmem:[#allocation1 + $0x20] sm:$0xff] %v4055_v19  ;;  %v4120_v47 = vld [vmem:[%s5007_s0 + $0x180] sm:$0xff]   ;;  %v4043_v48 = vunpack.c.l.bf16 %v4163_v34  ;;  %v4044_v49 = vunpack.c.h.bf16 %v4163_v34  ;;  %v4047_v50 = vunpack.c.l.bf16 %v4164_v35  ;;  %v4048_v51 = vunpack.c.h.bf16 %v4164_v35  ;;  %v4133_v52 = vld [vmem:[%s5007_s0 + $0x118] sm:$0xff]  }
   0xa   :  { %2004 = vst [vmem:[#allocation1 + $0x18] sm:$0xff] %v4060_v25  ;;  %2020 = vst [vmem:[#allocation1 + $0x10] sm:$0xff] %v4059_v24  ;;  %v4134_v53 = vld [vmem:[%s5007_s0 + $0x110] sm:$0xff]   ;;  %v3859_v54 = vunpack.c.l.bf16 %v4117_v40  ;;  %v3860_v55 = vunpack.c.h.bf16 %v4117_v40  ;;  %v3863_v56 = vunpack.c.l.bf16 %v4118_v41  ;;  %v3864_v57 = vunpack.c.h.bf16 %v4118_v41  ;;  %v4135_v58 = vld [vmem:[%s5007_s0 + $0x108] sm:$0xff]  }
   0xb   :  { %2035 = vst [vmem:[#allocation1 + $0x8] sm:$0xff] %v4064_v27  ;;  %2048 = vst [vmem:[#allocation1] sm:$0xff] %v4063_v26  ;;  %v4136_v59 = vld [vmem:[%s5007_s0 + $0x100] sm:$0xff]   ;;  %v3867_v61 = vunpack.c.l.bf16 %v4119_v46  ;;  %v3868_v62 = vunpack.c.h.bf16 %v4119_v46  ;;  %v3871_v63 = vunpack.c.l.bf16 %v4120_v47  ;;  %v3872_v0 = vunpack.c.h.bf16 %v4120_v47  ;;  %v4113_v1 = vld [vmem:[%s5007_s0 + $0x1b8] sm:$0xff]  }
   0xc   :  { %1300 = vst [vmem:[#allocation1 + $0x178] sm:$0xff] %v3972_v31  ;;  %1316 = vst [vmem:[#allocation1 + $0x170] sm:$0xff] %v3971_v30  ;;  %v2203_v60 = vld [vmem:[#allocation1 + $0x107] ss:$8 sm:$0xf0]   ;;  %v3923_v4 = vunpack.c.l.bf16 %v4133_v52  ;;  %v3924_v5 = vunpack.c.h.bf16 %v4133_v52  ;;  %v3927_v6 = vunpack.c.l.bf16 %v4134_v53  ;;  %v3928_v7 = vunpack.c.h.bf16 %v4134_v53 }
   0xd   :  { %1332 = vst [vmem:[#allocation1 + $0x168] sm:$0xff] %v3976_v33  ;;  %1348 = vst [vmem:[#allocation1 + $0x160] sm:$0xff] %v3975_v32  ;;  %v4114_v2 = vld [vmem:[%s5007_s0 + $0x1b0] sm:$0xff]   ;;  %v4115_v8 = vld [vmem:[%s5007_s0 + $0x1a8] sm:$0xff]   ;;  %v3931_v11 = vunpack.c.l.bf16 %v4135_v58  ;;  %v3932_v12 = vunpack.c.h.bf16 %v4135_v58  ;;  %v3935_v13 = vunpack.c.l.bf16 %v4136_v59  ;;  %v3936_v17 = vunpack.c.h.bf16 %v4136_v59 }
   0xe   :  { %1364 = vst [vmem:[#allocation1 + $0x158] sm:$0xff] %v3980_v37  ;;  %1380 = vst [vmem:[#allocation1 + $0x150] sm:$0xff] %v3979_v36  ;;  %v2201_v3 = vld [vmem:[#allocation1 + $0x107] ss:$8 sm:$0xf]   ;;  %v3843_v18 = vunpack.c.l.bf16 %v4113_v1  ;;  %v3844_v19 = vunpack.c.h.bf16 %v4113_v1  ;;  %v3847_v20 = vunpack.c.l.bf16 %v4114_v2  ;;  %v3848_v24 = vunpack.c.h.bf16 %v4114_v2 }
   0xf   :  { %1396 = vst [vmem:[#allocation1 + $0x148] sm:$0xff] %v3984_v39  ;;  %1412 = vst [vmem:[#allocation1 + $0x140] sm:$0xff] %v3983_v38  ;;  %v2205_v10 = vsel %vm2051_vm0, %v2203_v60, %v2201_v3  ;;  %v4116_v14 = vld [vmem:[%s5007_s0 + $0x1a0] sm:$0xff]   ;;  %v4129_v15 = vld [vmem:[%s5007_s0 + $0x138] sm:$0xff]   ;;  %v3851_v25 = vunpack.c.l.bf16 %v4115_v8  ;;  %v3852_v26 = vunpack.c.h.bf16 %v4115_v8  ;;  %vm2723_vm5 = vcmask 654848  }
  0x10   :  { %1812 = vst [vmem:[#allocation1 + $0x78] sm:$0xff] %v4036_v43  ;;  %1828 = vst [vmem:[#allocation1 + $0x70] sm:$0xff] %v4035_v42  ;;  %v2193_v9 = vld [vmem:[#allocation1 + $0x7] ss:$8 sm:$0xf0]   ;;  %v3855_v31 = vunpack.c.l.bf16 %v4116_v14  ;;  %v3856_v32 = vunpack.c.h.bf16 %v4116_v14  ;;  %v3907_v33 = vunpack.c.l.bf16 %v4129_v15  ;;  %v3908_v38 = vunpack.c.h.bf16 %v4129_v15 }
  0x11   :  { %1844 = vst [vmem:[#allocation1 + $0x68] sm:$0xff] %v4040_v45  ;;  %1860 = vst [vmem:[#allocation1 + $0x60] sm:$0xff] %v4039_v44  ;;  %v4130_v21 = vld [vmem:[%s5007_s0 + $0x130] sm:$0xff]   ;;  %v4131_v27 = vld [vmem:[%s5007_s0 + $0x128] sm:$0xff]   ;;  %vm2898_vm6 = vcmask 523648   ;;  %vm3073_vm7 = vcmask 392448  }
  0x12   :  { %1876 = vst [vmem:[#allocation1 + $0x58] sm:$0xff] %v4044_v49  ;;  %1892 = vst [vmem:[#allocation1 + $0x50] sm:$0xff] %v4043_v48  ;;  %v2191_v16 = vld [vmem:[#allocation1 + $0x7] ss:$8 sm:$0xf]   ;;  %v3911_v39 = vunpack.c.l.bf16 %v4130_v21  ;;  %v3912_v40 = vunpack.c.h.bf16 %v4130_v21  ;;  %v3915_v43 = vunpack.c.l.bf16 %v4131_v27  ;;  %v3916_v44 = vunpack.c.h.bf16 %v4131_v27 }
  0x13   :  { %1908 = vst [vmem:[#allocation1 + $0x48] sm:$0xff] %v4048_v51  ;;  %1924 = vst [vmem:[#allocation1 + $0x40] sm:$0xff] %v4047_v50  ;;  %v2195_v22 = vsel %vm2051_vm0, %v2193_v9, %v2191_v16  ;;  %v4132_v28 = vld [vmem:[%s5007_s0 + $0x120] sm:$0xff]   ;;  %v4141_v34 = vld [vmem:[%s5007_s0 + $0xd8] sm:$0xff]   ;;  %vm3248_vm8 = vcmask 261248  }
  0x14   :  { %404 = vst [vmem:[#allocation1 + $0x338] sm:$0xff] %v3860_v55  ;;  %420 = vst [vmem:[#allocation1 + $0x330] sm:$0xff] %v3859_v54  ;;  %v2247_v23 = vld [vmem:[#allocation1 + $0x147] ss:$8 sm:$0xf0]   ;;  %v4182_v29 = vpack.i.bf16 %v2205_v10, %v2195_v22  ;;  %v3919_v45 = vunpack.c.l.bf16 %v4132_v28  ;;  %v3920_v46 = vunpack.c.h.bf16 %v4132_v28  ;;  %v3955_v51 = vunpack.c.l.bf16 %v4141_v34 }
  0x15   :  { %436 = vst [vmem:[#allocation1 + $0x328] sm:$0xff] %v3864_v57  ;;  %452 = vst [vmem:[#allocation1 + $0x320] sm:$0xff] %v3863_v56  ;;  %v4142_v35 = vld [vmem:[%s5007_s0 + $0xd0] sm:$0xff]   ;;  %v4143_v41 = vld [vmem:[%s5007_s0 + $0xc8] sm:$0xff]   ;;  %v3956_v52 = vunpack.c.h.bf16 %v4141_v34 }
  0x16   :  { %468 = vst [vmem:[#allocation1 + $0x318] sm:$0xff] %v3868_v62  ;;  %484 = vst [vmem:[#allocation1 + $0x310] sm:$0xff] %v3867_v61  ;;  %v2245_v30 = vld [vmem:[#allocation1 + $0x147] ss:$8 sm:$0xf]   ;;  %4183 = vrot.lane.b32.xlu0 %v4182_v29, %s4462_s18  ;;  %v3959_v53 = vunpack.c.l.bf16 %v4142_v35  ;;  %v3960_v58 = vunpack.c.h.bf16 %v4142_v35  ;;  %v3963_v59 = vunpack.c.l.bf16 %v4143_v41  ;;  %v3964_v60 = vunpack.c.h.bf16 %v4143_v41 }
  0x17   :  { %500 = vst [vmem:[#allocation1 + $0x308] sm:$0xff] %v3872_v0  ;;  %516 = vst [vmem:[#allocation1 + $0x300] sm:$0xff] %v3871_v63  ;;  %v2249_v37 = vsel %vm2051_vm0, %v2247_v23, %v2245_v30  ;;  %v4144_v47 = vld [vmem:[%s5007_s0 + $0xc0] sm:$0xff]   ;;  %v4157_v48 = vld [vmem:[%s5007_s0 + $0x58] sm:$0xff]  }
  0x18   :  { %916 = vst [vmem:[#allocation1 + $0x238] sm:$0xff] %v3924_v5  ;;  %932 = vst [vmem:[#allocation1 + $0x230] sm:$0xff] %v3923_v4  ;;  %v2236_v36 = vld [vmem:[#allocation1 + $0x47] ss:$8 sm:$0xf0]   ;;  %v3967_v1 = vunpack.c.l.bf16 %v4144_v47  ;;  %v3968_v2 = vunpack.c.h.bf16 %v4144_v47  ;;  %v4019_v3 = vunpack.c.l.bf16 %v4157_v48  ;;  %v4020_v5 = vunpack.c.h.bf16 %v4157_v48 }
  0x19   :  { %948 = vst [vmem:[#allocation1 + $0x228] sm:$0xff] %v3928_v7  ;;  %964 = vst [vmem:[#allocation1 + $0x220] sm:$0xff] %v3927_v6  ;;  %v4158_v54 = vld [vmem:[%s5007_s0 + $0x50] sm:$0xff]   ;;  %v4159_v55 = vld [vmem:[%s5007_s0 + $0x48] sm:$0xff]  }
  0x1a   :  { %980 = vst [vmem:[#allocation1 + $0x218] sm:$0xff] %v3932_v12  ;;  %996 = vst [vmem:[#allocation1 + $0x210] sm:$0xff] %v3931_v11  ;;  %v2234_v42 = vld [vmem:[#allocation1 + $0x47] ss:$8 sm:$0xf]   ;;  %v4023_v6 = vunpack.c.l.bf16 %v4158_v54  ;;  %v4024_v7 = vunpack.c.h.bf16 %v4158_v54  ;;  %v4027_v8 = vunpack.c.l.bf16 %v4159_v55  ;;  %v4028_v12 = vunpack.c.h.bf16 %v4159_v55 }
  0x1b   :  { %1028 = vst [vmem:[#allocation1 + $0x200] sm:$0xff] %v3935_v13  ;;  %1012 = vst [vmem:[#allocation1 + $0x208] sm:$0xff] %v3936_v17  ;;  %v2238_v49 = vsel %vm2051_vm0, %v2236_v36, %v2234_v42  ;;  %v4160_v61 = vld [vmem:[%s5007_s0 + $0x40] sm:$0xff]   ;;  %v4109_v62 = vld [vmem:[%s5007_s0 + $0x1d8] sm:$0xff]  }
  0x1c   :  { %276 = vst [vmem:[#allocation1 + $0x378] sm:$0xff] %v3844_v19  ;;  %292 = vst [vmem:[#allocation1 + $0x370] sm:$0xff] %v3843_v18  ;;  %v2225_v50 = vld [vmem:[#allocation1 + $0x307] ss:$8 sm:$0xf0]   ;;  %v4192_v56 = vpack.i.bf16 %v2249_v37, %v2238_v49  ;;  %v4031_v13 = vunpack.c.l.bf16 %v4160_v61  ;;  %v4032_v14 = vunpack.c.h.bf16 %v4160_v61  ;;  %v3827_v15 = vunpack.c.l.bf16 %v4109_v62 }
  0x1d   :  { %324 = vst [vmem:[#allocation1 + $0x360] sm:$0xff] %v3847_v20  ;;  %308 = vst [vmem:[#allocation1 + $0x368] sm:$0xff] %v3848_v24  ;;  %v4110_v4 = vld [vmem:[%s5007_s0 + $0x1d0] sm:$0xff]   ;;  %v4111_v9 = vld [vmem:[%s5007_s0 + $0x1c8] sm:$0xff]   ;;  %v3828_v19 = vunpack.c.h.bf16 %v4109_v62 }
  0x1e   :  { %340 = vst [vmem:[#allocation1 + $0x358] sm:$0xff] %v3852_v26  ;;  %356 = vst [vmem:[#allocation1 + $0x350] sm:$0xff] %v3851_v25  ;;  %v2223_v57 = vld [vmem:[#allocation1 + $0x307] ss:$8 sm:$0xf]   ;;  %4193 = vrot.lane.b32.xlu1 %v4192_v56, %s4462_s18  ;;  %v3831_v20 = vunpack.c.l.bf16 %v4110_v4  ;;  %v3832_v21 = vunpack.c.h.bf16 %v4110_v4  ;;  %v3835_v26 = vunpack.c.l.bf16 %v4111_v9  ;;  %v3836_v27 = vunpack.c.h.bf16 %v4111_v9 }
  0x1f   :  { %372 = vst [vmem:[#allocation1 + $0x348] sm:$0xff] %v3856_v32  ;;  %388 = vst [vmem:[#allocation1 + $0x340] sm:$0xff] %v3855_v31  ;;  %v2227_v0 = vsel %vm2051_vm0, %v2225_v50, %v2223_v57  ;;  %v4112_v10 = vld [vmem:[%s5007_s0 + $0x1c0] sm:$0xff]   ;;  %v4125_v16 = vld [vmem:[%s5007_s0 + $0x158] sm:$0xff]  }
  0x20   :  { %804 = vst [vmem:[#allocation1 + $0x270] sm:$0xff] %v3907_v33  ;;  %788 = vst [vmem:[#allocation1 + $0x278] sm:$0xff] %v3908_v38  ;;  %v2214_v63 = vld [vmem:[#allocation1 + $0x207] ss:$8 sm:$0xf0]   ;;  %v3839_v28 = vunpack.c.l.bf16 %v4112_v10  ;;  %v3840_v33 = vunpack.c.h.bf16 %v4112_v10  ;;  %v3891_v34 = vunpack.c.l.bf16 %v4125_v16  ;;  %v3892_v35 = vunpack.c.h.bf16 %v4125_v16 }
  0x21   :  { %820 = vst [vmem:[#allocation1 + $0x268] sm:$0xff] %v3912_v40  ;;  %836 = vst [vmem:[#allocation1 + $0x260] sm:$0xff] %v3911_v39  ;;  %v4126_v22 = vld [vmem:[%s5007_s0 + $0x150] sm:$0xff]   ;;  %v4127_v23 = vld [vmem:[%s5007_s0 + $0x148] sm:$0xff]  }
  0x22   :  { %852 = vst [vmem:[#allocation1 + $0x258] sm:$0xff] %v3916_v44  ;;  %868 = vst [vmem:[#allocation1 + $0x250] sm:$0xff] %v3915_v43  ;;  %v2212_v11 = vld [vmem:[#allocation1 + $0x207] ss:$8 sm:$0xf]   ;;  %v3895_v38 = vunpack.c.l.bf16 %v4126_v22  ;;  %v3896_v39 = vunpack.c.h.bf16 %v4126_v22  ;;  %v3899_v40 = vunpack.c.l.bf16 %v4127_v23  ;;  %v3900_v41 = vunpack.c.h.bf16 %v4127_v23 }
  0x23   :  { %884 = vst [vmem:[#allocation1 + $0x248] sm:$0xff] %v3920_v46  ;;  %900 = vst [vmem:[#allocation1 + $0x240] sm:$0xff] %v3919_v45  ;;  %v2216_v17 = vsel %vm2051_vm0, %v2214_v63, %v2212_v11  ;;  %v4128_v29 = vld [vmem:[%s5007_s0 + $0x140] sm:$0xff]   ;;  %v4137_v30 = vld [vmem:[%s5007_s0 + $0xf8] sm:$0xff]  }
  0x24   :  { %1172 = vst [vmem:[#allocation1 + $0x1b8] sm:$0xff] %v3956_v52  ;;  %1188 = vst [vmem:[#allocation1 + $0x1b0] sm:$0xff] %v3955_v51  ;;  %v2269_v18 = vld [vmem:[#allocation1 + $0x347] ss:$8 sm:$0xf0]   ;;  %v4187_v24 = vpack.i.bf16 %v2227_v0, %v2216_v17  ;;  %v3903_v45 = vunpack.c.l.bf16 %v4128_v29  ;;  %v3904_v46 = vunpack.c.h.bf16 %v4128_v29  ;;  %v3939_v47 = vunpack.c.l.bf16 %v4137_v30 }
  0x25   :  { %1220 = vst [vmem:[#allocation1 + $0x1a0] sm:$0xff] %v3959_v53  ;;  %1204 = vst [vmem:[#allocation1 + $0x1a8] sm:$0xff] %v3960_v58  ;;  %v4138_v36 = vld [vmem:[%s5007_s0 + $0xf0] sm:$0xff]   ;;  %v4139_v42 = vld [vmem:[%s5007_s0 + $0xe8] sm:$0xff]   ;;  %v3940_v52 = vunpack.c.h.bf16 %v4137_v30 }
  0x26   :  { %1236 = vst [vmem:[#allocation1 + $0x198] sm:$0xff] %v3964_v60  ;;  %1252 = vst [vmem:[#allocation1 + $0x190] sm:$0xff] %v3963_v59  ;;  %v2267_v25 = vld [vmem:[#allocation1 + $0x347] ss:$8 sm:$0xf]   ;;  %4188 = vrot.lane.b32.xlu0 %v4187_v24, %s4462_s18  ;;  %v3943_v53 = vunpack.c.l.bf16 %v4138_v36  ;;  %v3944_v54 = vunpack.c.h.bf16 %v4138_v36  ;;  %v3947_v58 = vunpack.c.l.bf16 %v4139_v42  ;;  %v3948_v59 = vunpack.c.h.bf16 %v4139_v42 }
  0x27   :  { %1268 = vst [vmem:[#allocation1 + $0x188] sm:$0xff] %v3968_v2  ;;  %1284 = vst [vmem:[#allocation1 + $0x180] sm:$0xff] %v3967_v1  ;;  %v2271_v32 = vsel %vm2051_vm0, %v2269_v18, %v2267_v25  ;;  %v4140_v43 = vld [vmem:[%s5007_s0 + $0xe0] sm:$0xff]   ;;  %v4153_v48 = vld [vmem:[%s5007_s0 + $0x78] sm:$0xff]  }
  0x28   :  { %1700 = vst [vmem:[#allocation1 + $0xb0] sm:$0xff] %v4019_v3  ;;  %1684 = vst [vmem:[#allocation1 + $0xb8] sm:$0xff] %v4020_v5  ;;  %v2258_v31 = vld [vmem:[#allocation1 + $0x247] ss:$8 sm:$0xf0]   ;;  %v3951_v60 = vunpack.c.l.bf16 %v4140_v43  ;;  %v3952_v61 = vunpack.c.h.bf16 %v4140_v43  ;;  %v4003_v1 = vunpack.c.l.bf16 %v4153_v48  ;;  %v4004_v2 = vunpack.c.h.bf16 %v4153_v48 }
  0x29   :  { %1716 = vst [vmem:[#allocation1 + $0xa8] sm:$0xff] %v4024_v7  ;;  %1732 = vst [vmem:[#allocation1 + $0xa0] sm:$0xff] %v4023_v6  ;;  %v4154_v49 = vld [vmem:[%s5007_s0 + $0x70] sm:$0xff]   ;;  %v4155_v55 = vld [vmem:[%s5007_s0 + $0x68] sm:$0xff]  }
  0x2a   :  { %1764 = vst [vmem:[#allocation1 + $0x90] sm:$0xff] %v4027_v8  ;;  %1748 = vst [vmem:[#allocation1 + $0x98] sm:$0xff] %v4028_v12  ;;  %v2256_v37 = vld [vmem:[#allocation1 + $0x247] ss:$8 sm:$0xf]   ;;  %v4007_v3 = vunpack.c.l.bf16 %v4154_v49  ;;  %v4008_v7 = vunpack.c.h.bf16 %v4154_v49  ;;  %v4011_v8 = vunpack.c.l.bf16 %v4155_v55  ;;  %v4012_v9 = vunpack.c.h.bf16 %v4155_v55 }
  0x2b   :  { %1780 = vst [vmem:[#allocation1 + $0x88] sm:$0xff] %v4032_v14  ;;  %1796 = vst [vmem:[#allocation1 + $0x80] sm:$0xff] %v4031_v13  ;;  %v2260_v44 = vsel %vm2051_vm0, %v2258_v31, %v2256_v37  ;;  %v4156_v56 = vld [vmem:[%s5007_s0 + $0x60] sm:$0xff]   ;;  %v4105_v62 = vld [vmem:[%s5007_s0 + $0x1f8] sm:$0xff]  }
  0x2c   :  { %164 = vst [vmem:[#allocation1 + $0x3b0] sm:$0xff] %v3827_v15  ;;  %148 = vst [vmem:[#allocation1 + $0x3b8] sm:$0xff] %v3828_v19  ;;  %v4197_v50 = vpack.i.bf16 %v2271_v32, %v2260_v44  ;;  %v2291_v51 = vld [vmem:[#allocation1 + $0x187] ss:$8 sm:$0xf0]   ;;  %v4015_v10 = vunpack.c.l.bf16 %v4156_v56  ;;  %v4016_v15 = vunpack.c.h.bf16 %v4156_v56  ;;  %v3811_v16 = vunpack.c.l.bf16 %v4105_v62 }
  0x2d   :  { %180 = vst [vmem:[#allocation1 + $0x3a8] sm:$0xff] %v3832_v21  ;;  %196 = vst [vmem:[#allocation1 + $0x3a0] sm:$0xff] %v3831_v20  ;;  %v4106_v4 = vld [vmem:[%s5007_s0 + $0x1f0] sm:$0xff]   ;;  %v4107_v5 = vld [vmem:[%s5007_s0 + $0x1e8] sm:$0xff]   ;;  %v3812_v17 = vunpack.c.h.bf16 %v4105_v62 }
  0x2e   :  { %212 = vst [vmem:[#allocation1 + $0x398] sm:$0xff] %v3836_v27  ;;  %228 = vst [vmem:[#allocation1 + $0x390] sm:$0xff] %v3835_v26  ;;  %v2289_v57 = vld [vmem:[#allocation1 + $0x187] ss:$8 sm:$0xf]   ;;  %4198 = vrot.lane.b32.xlu1 %v4197_v50, %s4462_s18  ;;  %v3815_v20 = vunpack.c.l.bf16 %v4106_v4  ;;  %v3816_v21 = vunpack.c.h.bf16 %v4106_v4  ;;  %v3819_v22 = vunpack.c.l.bf16 %v4107_v5  ;;  %v3820_v26 = vunpack.c.h.bf16 %v4107_v5 }
  0x2f   :  { %260 = vst [vmem:[#allocation1 + $0x380] sm:$0xff] %v3839_v28  ;;  %244 = vst [vmem:[#allocation1 + $0x388] sm:$0xff] %v3840_v33  ;;  %v2293_v0 = vsel %vm2051_vm0, %v2291_v51, %v2289_v57  ;;  %v4108_v11 = vld [vmem:[%s5007_s0 + $0x1e0] sm:$0xff]   ;;  %v4121_v12 = vld [vmem:[%s5007_s0 + $0x178] sm:$0xff]  }
  0x30   :  { %660 = vst [vmem:[#allocation1 + $0x2b8] sm:$0xff] %v3892_v35  ;;  %676 = vst [vmem:[#allocation1 + $0x2b0] sm:$0xff] %v3891_v34  ;;  %v2280_v63 = vld [vmem:[#allocation1 + $0x87] ss:$8 sm:$0xf0]   ;;  %v3823_v27 = vunpack.c.l.bf16 %v4108_v11  ;;  %v3824_v28 = vunpack.c.h.bf16 %v4108_v11  ;;  %v3875_v29 = vunpack.c.l.bf16 %v4121_v12  ;;  %v3876_v32 = vunpack.c.h.bf16 %v4121_v12 }
  0x31   :  { %692 = vst [vmem:[#allocation1 + $0x2a8] sm:$0xff] %v3896_v39  ;;  %708 = vst [vmem:[#allocation1 + $0x2a0] sm:$0xff] %v3895_v38  ;;  %v4122_v18 = vld [vmem:[%s5007_s0 + $0x170] sm:$0xff]   ;;  %v4123_v23 = vld [vmem:[%s5007_s0 + $0x168] sm:$0xff]  }
  0x32   :  { %724 = vst [vmem:[#allocation1 + $0x298] sm:$0xff] %v3900_v41  ;;  %740 = vst [vmem:[#allocation1 + $0x290] sm:$0xff] %v3899_v40  ;;  %v2278_v6 = vld [vmem:[#allocation1 + $0x87] ss:$8 sm:$0xf]   ;;  %v3879_v33 = vunpack.c.l.bf16 %v4122_v18  ;;  %v3880_v34 = vunpack.c.h.bf16 %v4122_v18  ;;  %v3883_v36 = vunpack.c.l.bf16 %v4123_v23  ;;  %v3884_v37 = vunpack.c.h.bf16 %v4123_v23 }
  0x33   :  { %756 = vst [vmem:[#allocation1 + $0x288] sm:$0xff] %v3904_v46  ;;  %772 = vst [vmem:[#allocation1 + $0x280] sm:$0xff] %v3903_v45  ;;  %v2282_v13 = vsel %vm2051_vm0, %v2280_v63, %v2278_v6  ;;  %v4124_v24 = vld [vmem:[%s5007_s0 + $0x160] sm:$0xff]   ;;  %s4463_s0 = smov 96  }
  0x34   :  { %1060 = vst [vmem:[#allocation1 + $0x1f0] sm:$0xff] %v3939_v47  ;;  %1044 = vst [vmem:[#allocation1 + $0x1f8] sm:$0xff] %v3940_v52  ;;  %v2313_v14 = vld [vmem:[#allocation1 + $0x387] ss:$8 sm:$0xf0]   ;;  %v4202_v19 = vpack.i.bf16 %v2293_v0, %v2282_v13  ;;  %v3887_v38 = vunpack.c.l.bf16 %v4124_v24  ;;  %v3888_v39 = vunpack.c.h.bf16 %v4124_v24 }
  0x35   :  { %1076 = vst [vmem:[#allocation1 + $0x1e8] sm:$0xff] %v3944_v54  ;;  %1092 = vst [vmem:[#allocation1 + $0x1e0] sm:$0xff] %v3943_v53  ;;  %v2366_v42 = vld [vmem:[#allocation1 + $0x6] ss:$8 sm:$0xf]  }
  0x36   :  { %1108 = vst [vmem:[#allocation1 + $0x1d8] sm:$0xff] %v3948_v59  ;;  %1124 = vst [vmem:[#allocation1 + $0x1d0] sm:$0xff] %v3947_v58  ;;  %v2311_v25 = vld [vmem:[#allocation1 + $0x387] ss:$8 sm:$0xf]   ;;  %4203 = vrot.lane.b32.xlu0 %v4202_v19, %s4462_s18 }
  0x37   :  { %1140 = vst [vmem:[#allocation1 + $0x1c8] sm:$0xff] %v3952_v61  ;;  %1156 = vst [vmem:[#allocation1 + $0x1c0] sm:$0xff] %v3951_v60  ;;  %v2315_v31 = vsel %vm2051_vm0, %v2313_v14, %v2311_v25  ;;  %v2368_v45 = vld [vmem:[#allocation1 + $0x6] ss:$8 sm:$0xf0]  }
  0x38   :  { %1556 = vst [vmem:[#allocation1 + $0xf8] sm:$0xff] %v4004_v2  ;;  %1572 = vst [vmem:[#allocation1 + $0xf0] sm:$0xff] %v4003_v1  ;;  %v2302_v30 = vld [vmem:[#allocation1 + $0x287] ss:$8 sm:$0xf0]   ;;  %v2370_v59 = vsel %vm2051_vm0, %v2368_v45, %v2366_v42 }
  0x39   :  { %1604 = vst [vmem:[#allocation1 + $0xe0] sm:$0xff] %v4007_v3  ;;  %1588 = vst [vmem:[#allocation1 + $0xe8] sm:$0xff] %v4008_v7  ;;  %v2376_v46 = vld [vmem:[#allocation1 + $0x106] ss:$8 sm:$0xf]  }
  0x3a   :  { %1620 = vst [vmem:[#allocation1 + $0xd8] sm:$0xff] %v4012_v9  ;;  %1636 = vst [vmem:[#allocation1 + $0xd0] sm:$0xff] %v4011_v8  ;;  %v2300_v35 = vld [vmem:[#allocation1 + $0x287] ss:$8 sm:$0xf]  }
  0x3b   :  { %1668 = vst [vmem:[#allocation1 + $0xc0] sm:$0xff] %v4015_v10  ;;  %1652 = vst [vmem:[#allocation1 + $0xc8] sm:$0xff] %v4016_v15  ;;  %v2304_v40 = vsel %vm2051_vm0, %v2302_v30, %v2300_v35  ;;  %v2378_v47 = vld [vmem:[#allocation1 + $0x106] ss:$8 sm:$0xf0]  }
  0x3c   :  { %20 = vst [vmem:[#allocation1 + $0x3f8] sm:$0xff] %v3812_v17  ;;  %36 = vst [vmem:[#allocation1 + $0x3f0] sm:$0xff] %v3811_v16  ;;  %v2335_v41 = vld [vmem:[#allocation1 + $0x1c7] ss:$8 sm:$0xf0]   ;;  %v4207_v43 = vpack.i.bf16 %v2315_v31, %v2304_v40  ;;  %v2380_v60 = vsel %vm2051_vm0, %v2378_v47, %v2376_v46 }
  0x3d   :  { %52 = vst [vmem:[#allocation1 + $0x3e8] sm:$0xff] %v3816_v21  ;;  %68 = vst [vmem:[#allocation1 + $0x3e0] sm:$0xff] %v3815_v20  ;;  %v2387_v50 = vld [vmem:[#allocation1 + $0x206] ss:$8 sm:$0xf]   ;;  %v4222_v7 = vpack.i.bf16 %v2380_v60, %v2370_v59 }
  0x3e   :  { %100 = vst [vmem:[#allocation1 + $0x3d0] sm:$0xff] %v3819_v22  ;;  %84 = vst [vmem:[#allocation1 + $0x3d8] sm:$0xff] %v3820_v26  ;;  %v2333_v44 = vld [vmem:[#allocation1 + $0x1c7] ss:$8 sm:$0xf]   ;;  %4208 = vrot.lane.b32.xlu1 %v4207_v43, %s4462_s18 }
  0x3f   :  { %116 = vst [vmem:[#allocation1 + $0x3c8] sm:$0xff] %v3824_v28  ;;  %132 = vst [vmem:[#allocation1 + $0x3c0] sm:$0xff] %v3823_v27  ;;  %v2337_v49 = vsel %vm2051_vm0, %v2335_v41, %v2333_v44  ;;  %v2389_v51 = vld [vmem:[#allocation1 + $0x206] ss:$8 sm:$0xf0]  }
  0x40   :  { %548 = vst [vmem:[#allocation1 + $0x2f0] sm:$0xff] %v3875_v29  ;;  %532 = vst [vmem:[#allocation1 + $0x2f8] sm:$0xff] %v3876_v32  ;;  %v2324_v48 = vld [vmem:[#allocation1 + $0xc7] ss:$8 sm:$0xf0]   ;;  %v2391_v8 = vsel %vm2051_vm0, %v2389_v51, %v2387_v50 }
  0x41   :  { %564 = vst [vmem:[#allocation1 + $0x2e8] sm:$0xff] %v3880_v34  ;;  %580 = vst [vmem:[#allocation1 + $0x2e0] sm:$0xff] %v3879_v33  ;;  %v2398_v52 = vld [vmem:[#allocation1 + $0x306] ss:$8 sm:$0xf]  }
  0x42   :  { %596 = vst [vmem:[#allocation1 + $0x2d8] sm:$0xff] %v3884_v37  ;;  %612 = vst [vmem:[#allocation1 + $0x2d0] sm:$0xff] %v3883_v36  ;;  %v2400_v53 = vld [vmem:[#allocation1 + $0x306] ss:$8 sm:$0xf0]  }
  0x43   :  { %628 = vst [vmem:[#allocation1 + $0x2c8] sm:$0xff] %v3888_v39  ;;  %644 = vst [vmem:[#allocation1 + $0x2c0] sm:$0xff] %v3887_v38  ;;  %v2322_v54 = vld [vmem:[#allocation1 + $0xc7] ss:$8 sm:$0xf]   ;;  %v2402_v9 = vsel %vm2051_vm0, %v2400_v53, %v2398_v52 }
  0x44   :  { %v2409_v55 = vld [vmem:[#allocation1 + $0x46] ss:$8 sm:$0xf]   ;;  %v2326_v57 = vsel %vm2051_vm0, %v2324_v48, %v2322_v54  ;;  %v2357_v58 = vld [vmem:[#allocation1 + $0x3c7] ss:$8 sm:$0xf0]   ;;  %v4227_v19 = vpack.i.bf16 %v2402_v9, %v2391_v8 }
  0x45   :  { %v2411_v56 = vld [vmem:[#allocation1 + $0x46] ss:$8 sm:$0xf0]   ;;  %v4212_v62 = vpack.i.bf16 %v2337_v49, %v2326_v57  ;;  %v2541_v43 = vld [vmem:[#allocation1 + $0x5] ss:$8 sm:$0xf]  }
  0x46   :  { %v2420_v61 = vld [vmem:[#allocation1 + $0x146] ss:$8 sm:$0xf]   ;;  %v2355_v63 = vld [vmem:[#allocation1 + $0x3c7] ss:$8 sm:$0xf]   ;;  %v2413_v12 = vsel %vm2051_vm0, %v2411_v56, %v2409_v55 }
  0x47   :  { %v2422_v0 = vld [vmem:[#allocation1 + $0x146] ss:$8 sm:$0xf0]   ;;  %v2359_v2 = vsel %vm2051_vm0, %v2357_v58, %v2355_v63  ;;  %4213 = vrot.lane.b32.xlu0 %v4212_v62, %s4462_s18  ;;  %v2543_v44 = vld [vmem:[#allocation1 + $0x5] ss:$8 sm:$0xf0]  }
  0x48   :  { %v2346_v1 = vld [vmem:[#allocation1 + $0x2c7] ss:$8 sm:$0xf0]   ;;  %v2431_v3 = vld [vmem:[#allocation1 + $0x246] ss:$8 sm:$0xf]   ;;  %v2424_v13 = vsel %vm2051_vm0, %v2422_v0, %v2420_v61  ;;  %v2545_v55 = vsel %vm2051_vm0, %v2543_v44, %v2541_v43 }
  0x49   :  { %v2433_v4 = vld [vmem:[#allocation1 + $0x246] ss:$8 sm:$0xf0]   ;;  %v4232_v22 = vpack.i.bf16 %v2424_v13, %v2413_v12  ;;  %v2551_v45 = vld [vmem:[#allocation1 + $0x105] ss:$8 sm:$0xf]  }
  0x4a   :  { %v2442_v5 = vld [vmem:[#allocation1 + $0x346] ss:$8 sm:$0xf]   ;;  %v2344_v6 = vld [vmem:[#allocation1 + $0x2c7] ss:$8 sm:$0xf]   ;;  %v2435_v23 = vsel %vm2051_vm0, %v2433_v4, %v2431_v3 }
  0x4b   :  { %v2444_v10 = vld [vmem:[#allocation1 + $0x346] ss:$8 sm:$0xf0]   ;;  %v2348_v11 = vsel %vm2051_vm0, %v2346_v1, %v2344_v6  ;;  %4223 = vrot.lane.b32.xlu0 %v4222_v7, %s4463_s0  ;;  %v2553_v46 = vld [vmem:[#allocation1 + $0x105] ss:$8 sm:$0xf0]  }
  0x4c   :  { %v2453_v14 = vld [vmem:[#allocation1 + $0x86] ss:$8 sm:$0xf]   ;;  %v4217_v16 = vpack.i.bf16 %v2359_v2, %v2348_v11  ;;  %v2446_v24 = vsel %vm2051_vm0, %v2444_v10, %v2442_v5  ;;  %v2562_v48 = vld [vmem:[#allocation1 + $0x205] ss:$8 sm:$0xf]   ;;  %v2555_v56 = vsel %vm2051_vm0, %v2553_v46, %v2551_v45 }
  0x4d   :  { %v2455_v15 = vld [vmem:[#allocation1 + $0x86] ss:$8 sm:$0xf0]   ;;  %v4237_v33 = vpack.i.bf16 %v2446_v24, %v2435_v23  ;;  %v2564_v49 = vld [vmem:[#allocation1 + $0x205] ss:$8 sm:$0xf0]   ;;  %v4262_v0 = vpack.i.bf16 %v2555_v56, %v2545_v55 }
  0x4e   :  { %v2464_v17 = vld [vmem:[#allocation1 + $0x186] ss:$8 sm:$0xf]   ;;  %4218 = vrot.lane.b32.xlu1 %v4217_v16, %s4462_s18  ;;  %v2457_v27 = vsel %vm2051_vm0, %v2455_v15, %v2453_v14  ;;  %v2573_v53 = vld [vmem:[#allocation1 + $0x305] ss:$8 sm:$0xf]   ;;  %v2566_v1 = vsel %vm2051_vm0, %v2564_v49, %v2562_v48 }
  0x4f   :  { %v2466_v18 = vld [vmem:[#allocation1 + $0x186] ss:$8 sm:$0xf0]   ;;  %4233 = vrot.lane.b32.xlu0 %v4232_v22, %s4463_s0  ;;  %v2575_v54 = vld [vmem:[#allocation1 + $0x305] ss:$8 sm:$0xf0]  }
  0x50   :  { %v2475_v20 = vld [vmem:[#allocation1 + $0x286] ss:$8 sm:$0xf]   ;;  %v2468_v28 = vsel %vm2051_vm0, %v2466_v18, %v2464_v17  ;;  %v2584_v57 = vld [vmem:[#allocation1 + $0x45] ss:$8 sm:$0xf]   ;;  %v2577_v2 = vsel %vm2051_vm0, %v2575_v54, %v2573_v53 }
  0x51   :  { %v2477_v21 = vld [vmem:[#allocation1 + $0x286] ss:$8 sm:$0xf0]   ;;  %v4242_v36 = vpack.i.bf16 %v2468_v28, %v2457_v27  ;;  %v2586_v58 = vld [vmem:[#allocation1 + $0x45] ss:$8 sm:$0xf0]   ;;  %v4267_v11 = vpack.i.bf16 %v2577_v2, %v2566_v1 }
  0x52   :  { %v2486_v25 = vld [vmem:[#allocation1 + $0x386] ss:$8 sm:$0xf]   ;;  %4228 = vrot.lane.b32.xlu1 %v4227_v19, %s4463_s0  ;;  %v2479_v37 = vsel %vm2051_vm0, %v2477_v21, %v2475_v20  ;;  %v2595_v59 = vld [vmem:[#allocation1 + $0x145] ss:$8 sm:$0xf]   ;;  %v2588_v5 = vsel %vm2051_vm0, %v2586_v58, %v2584_v57 }
  0x53   :  { %v2488_v26 = vld [vmem:[#allocation1 + $0x386] ss:$8 sm:$0xf0]   ;;  %4243 = vrot.lane.b32.xlu0 %v4242_v36, %s4463_s0  ;;  %v2597_v60 = vld [vmem:[#allocation1 + $0x145] ss:$8 sm:$0xf0]  }
  0x54   :  { %v2497_v29 = vld [vmem:[#allocation1 + $0xc6] ss:$8 sm:$0xf]   ;;  %v2490_v38 = vsel %vm2051_vm0, %v2488_v26, %v2486_v25  ;;  %v2606_v62 = vld [vmem:[#allocation1 + $0x245] ss:$8 sm:$0xf]   ;;  %v2599_v6 = vsel %vm2051_vm0, %v2597_v60, %v2595_v59 }
  0x55   :  { %v2499_v30 = vld [vmem:[#allocation1 + $0xc6] ss:$8 sm:$0xf0]   ;;  %v4247_v47 = vpack.i.bf16 %v2490_v38, %v2479_v37  ;;  %v2608_v63 = vld [vmem:[#allocation1 + $0x245] ss:$8 sm:$0xf0]   ;;  %v4272_v14 = vpack.i.bf16 %v2599_v6, %v2588_v5 }
  0x56   :  { %v2508_v31 = vld [vmem:[#allocation1 + $0x1c6] ss:$8 sm:$0xf]   ;;  %v2501_v41 = vsel %vm2051_vm0, %v2499_v30, %v2497_v29  ;;  %4238 = vrot.lane.b32.xlu1 %v4237_v33, %s4463_s0  ;;  %v2617_v3 = vld [vmem:[#allocation1 + $0x345] ss:$8 sm:$0xf]   ;;  %v2610_v15 = vsel %vm2051_vm0, %v2608_v63, %v2606_v62 }
  0x57   :  { %v2510_v32 = vld [vmem:[#allocation1 + $0x1c6] ss:$8 sm:$0xf0]   ;;  %v2619_v4 = vld [vmem:[#allocation1 + $0x345] ss:$8 sm:$0xf0]  }
  0x58   :  { %v2519_v34 = vld [vmem:[#allocation1 + $0x2c6] ss:$8 sm:$0xf]   ;;  %v2512_v42 = vsel %vm2051_vm0, %v2510_v32, %v2508_v31  ;;  %v2628_v7 = vld [vmem:[#allocation1 + $0x85] ss:$8 sm:$0xf]   ;;  %v2621_v16 = vsel %vm2051_vm0, %v2619_v4, %v2617_v3 }
  0x59   :  { %v2521_v35 = vld [vmem:[#allocation1 + $0x2c6] ss:$8 sm:$0xf0]   ;;  %v4252_v50 = vpack.i.bf16 %v2512_v42, %v2501_v41  ;;  %v2630_v8 = vld [vmem:[#allocation1 + $0x85] ss:$8 sm:$0xf0]   ;;  %v4277_v25 = vpack.i.bf16 %v2621_v16, %v2610_v15 }
  0x5a   :  { %v2530_v39 = vld [vmem:[#allocation1 + $0x3c6] ss:$8 sm:$0xf]   ;;  %v2523_v51 = vsel %vm2051_vm0, %v2521_v35, %v2519_v34  ;;  %4248 = vrot.lane.b32.xlu1 %v4247_v47, %s4463_s0  ;;  %v2639_v9 = vld [vmem:[#allocation1 + $0x185] ss:$8 sm:$0xf]   ;;  %v2632_v19 = vsel %vm2051_vm0, %v2630_v8, %v2628_v7 }
  0x5b   :  { %v2532_v40 = vld [vmem:[#allocation1 + $0x3c6] ss:$8 sm:$0xf0]   ;;  %4253 = vrot.lane.b32.xlu0 %v4252_v50, %s4463_s0  ;;  %v2641_v10 = vld [vmem:[#allocation1 + $0x185] ss:$8 sm:$0xf0]  }
  0x5c   :  { %v2534_v52 = vsel %vm2051_vm0, %v2532_v40, %v2530_v39  ;;  %v2650_v12 = vld [vmem:[#allocation1 + $0x285] ss:$8 sm:$0xf]   ;;  %s4464_s18 = smov 80   ;;  %v2643_v20 = vsel %vm2051_vm0, %v2641_v10, %v2639_v9 }
  0x5d   :  { %v4257_v61 = vpack.i.bf16 %v2534_v52, %v2523_v51  ;;  %v2652_v13 = vld [vmem:[#allocation1 + $0x285] ss:$8 sm:$0xf0]   ;;  %v4282_v28 = vpack.i.bf16 %v2643_v20, %v2632_v19  ;;  %v2716_v35 = vld [vmem:[#allocation1 + $0x4] ss:$8 sm:$0xf]  }
  0x5e   :  { %v2661_v17 = vld [vmem:[#allocation1 + $0x385] ss:$8 sm:$0xf]   ;;  %v2654_v29 = vsel %vm2051_vm0, %v2652_v13, %v2650_v12  ;;  %v2718_v36 = vld [vmem:[#allocation1 + $0x4] ss:$8 sm:$0xf0]  }
  0x5f   :  { %4258 = vrot.lane.b32.xlu1 %v4257_v61, %s4463_s0  ;;  %4263 = vrot.lane.b32.xlu0 %v4262_v0, %s4464_s18  ;;  %v2663_v18 = vld [vmem:[#allocation1 + $0x385] ss:$8 sm:$0xf0]   ;;  %v2726_v37 = vld [vmem:[#allocation1 + $0x104] ss:$8 sm:$0xf]   ;;  %v2720_v47 = vsel %vm2051_vm0, %v2718_v36, %v2716_v35 }
  0x60   :  { %v2672_v21 = vld [vmem:[#allocation1 + $0xc5] ss:$8 sm:$0xf]   ;;  %v2665_v30 = vsel %vm2051_vm0, %v2663_v18, %v2661_v17  ;;  %v2728_v38 = vld [vmem:[#allocation1 + $0x104] ss:$8 sm:$0xf0]  }
  0x61   :  { %v2674_v22 = vld [vmem:[#allocation1 + $0xc5] ss:$8 sm:$0xf0]   ;;  %v4287_v39 = vpack.i.bf16 %v2665_v30, %v2654_v29  ;;  %v2737_v40 = vld [vmem:[#allocation1 + $0x204] ss:$8 sm:$0xf]   ;;  %v2730_v48 = vsel %vm2051_vm0, %v2728_v38, %v2726_v37 }
  0x62   :  { %v2683_v23 = vld [vmem:[#allocation1 + $0x1c5] ss:$8 sm:$0xf]   ;;  %v2676_v33 = vsel %vm2051_vm0, %v2674_v22, %v2672_v21  ;;  %v2739_v41 = vld [vmem:[#allocation1 + $0x204] ss:$8 sm:$0xf0]   ;;  %v4302_v56 = vpack.i.bf16 %v2730_v48, %v2720_v47 }
  0x63   :  { %v2685_v24 = vld [vmem:[#allocation1 + $0x1c5] ss:$8 sm:$0xf0]   ;;  %4268 = vrot.lane.b32.xlu1 %v4267_v11, %s4464_s18  ;;  %4273 = vrot.lane.b32.xlu0 %v4272_v14, %s4464_s18  ;;  %v2748_v45 = vld [vmem:[#allocation1 + $0x304] ss:$8 sm:$0xf]   ;;  %v2741_v57 = vsel %vm2051_vm0, %v2739_v41, %v2737_v40 }
  0x64   :  { %v2694_v26 = vld [vmem:[#allocation1 + $0x2c5] ss:$8 sm:$0xf]   ;;  %v2687_v34 = vsel %vm2051_vm0, %v2685_v24, %v2683_v23  ;;  %v2750_v46 = vld [vmem:[#allocation1 + $0x304] ss:$8 sm:$0xf0]  }
  0x65   :  { %v2696_v27 = vld [vmem:[#allocation1 + $0x2c5] ss:$8 sm:$0xf0]   ;;  %v4292_v42 = vpack.i.bf16 %v2687_v34, %v2676_v33  ;;  %v2759_v49 = vld [vmem:[#allocation1 + $0x44] ss:$8 sm:$0xf]   ;;  %v2752_v58 = vsel %vm2051_vm0, %v2750_v46, %v2748_v45 }
  0x66   :  { %v2705_v31 = vld [vmem:[#allocation1 + $0x3c5] ss:$8 sm:$0xf]   ;;  %v2698_v43 = vsel %vm2051_vm0, %v2696_v27, %v2694_v26  ;;  %v2761_v50 = vld [vmem:[#allocation1 + $0x44] ss:$8 sm:$0xf0]   ;;  %v4307_v3 = vpack.i.bf16 %v2752_v58, %v2741_v57 }
  0x67   :  { %v2707_v32 = vld [vmem:[#allocation1 + $0x3c5] ss:$8 sm:$0xf0]   ;;  %4278 = vrot.lane.b32.xlu1 %v4277_v25, %s4464_s18  ;;  %4283 = vrot.lane.b32.xlu0 %v4282_v28, %s4464_s18  ;;  %v2770_v51 = vld [vmem:[#allocation1 + $0x144] ss:$8 sm:$0xf]   ;;  %v2763_v61 = vsel %vm2051_vm0, %v2761_v50, %v2759_v49 }
  0x68   :  { %v2709_v44 = vsel %vm2051_vm0, %v2707_v32, %v2705_v31  ;;  %v2772_v52 = vld [vmem:[#allocation1 + $0x144] ss:$8 sm:$0xf0]   ;;  %v2891_v27 = vld [vmem:[#allocation1 + $0x3] ss:$8 sm:$0xf]  }
  0x69   :  { %v4297_v53 = vpack.i.bf16 %v2709_v44, %v2698_v43  ;;  %v2781_v54 = vld [vmem:[#allocation1 + $0x244] ss:$8 sm:$0xf]   ;;  %v2774_v62 = vsel %vm2051_vm0, %v2772_v52, %v2770_v51  ;;  %v2893_v28 = vld [vmem:[#allocation1 + $0x3] ss:$8 sm:$0xf0]  }
  0x6a   :  { %v2783_v55 = vld [vmem:[#allocation1 + $0x244] ss:$8 sm:$0xf0]   ;;  %v4312_v6 = vpack.i.bf16 %v2774_v62, %v2763_v61  ;;  %v2901_v29 = vld [vmem:[#allocation1 + $0x103] ss:$8 sm:$0xf]  }
  0x6b   :  { %4288 = vrot.lane.b32.xlu1 %v4287_v39, %s4464_s18  ;;  %4293 = vrot.lane.b32.xlu0 %v4292_v42, %s4464_s18  ;;  %v2792_v59 = vld [vmem:[#allocation1 + $0x344] ss:$8 sm:$0xf]   ;;  %v2785_v7 = vsel %vm2051_vm0, %v2783_v55, %v2781_v54  ;;  %v2903_v30 = vld [vmem:[#allocation1 + $0x103] ss:$8 sm:$0xf0]   ;;  %v2895_v39 = vsel %vm2051_vm0, %v2893_v28, %v2891_v27 }
  0x6c   :  { %v2794_v60 = vld [vmem:[#allocation1 + $0x344] ss:$8 sm:$0xf0]   ;;  %v2912_v32 = vld [vmem:[#allocation1 + $0x203] ss:$8 sm:$0xf]   ;;  %v2905_v40 = vsel %vm2051_vm0, %v2903_v30, %v2901_v29 }
  0x6d   :  { %v2803_v63 = vld [vmem:[#allocation1 + $0x84] ss:$8 sm:$0xf]   ;;  %v2796_v8 = vsel %vm2051_vm0, %v2794_v60, %v2792_v59  ;;  %v2914_v33 = vld [vmem:[#allocation1 + $0x203] ss:$8 sm:$0xf0]   ;;  %v4342_v48 = vpack.i.bf16 %v2905_v40, %v2895_v39 }
  0x6e   :  { %v2805_v0 = vld [vmem:[#allocation1 + $0x84] ss:$8 sm:$0xf0]   ;;  %v4317_v17 = vpack.i.bf16 %v2796_v8, %v2785_v7  ;;  %v2923_v37 = vld [vmem:[#allocation1 + $0x303] ss:$8 sm:$0xf]   ;;  %v2916_v49 = vsel %vm2051_vm0, %v2914_v33, %v2912_v32 }
  0x6f   :  { %v2814_v1 = vld [vmem:[#allocation1 + $0x184] ss:$8 sm:$0xf]   ;;  %4298 = vrot.lane.b32.xlu1 %v4297_v53, %s4464_s18  ;;  %4303 = vrot.lane.b32.xlu0 %v4302_v56, %s4465_s21  ;;  %v2807_v11 = vsel %vm2051_vm0, %v2805_v0, %v2803_v63  ;;  %v2925_v38 = vld [vmem:[#allocation1 + $0x303] ss:$8 sm:$0xf0]  }
  0x70   :  { %v2816_v2 = vld [vmem:[#allocation1 + $0x184] ss:$8 sm:$0xf0]   ;;  %v2934_v41 = vld [vmem:[#allocation1 + $0x43] ss:$8 sm:$0xf]   ;;  %v2927_v50 = vsel %vm2051_vm0, %v2925_v38, %v2923_v37 }
  0x71   :  { %v2825_v4 = vld [vmem:[#allocation1 + $0x284] ss:$8 sm:$0xf]   ;;  %v2818_v12 = vsel %vm2051_vm0, %v2816_v2, %v2814_v1  ;;  %v2936_v42 = vld [vmem:[#allocation1 + $0x43] ss:$8 sm:$0xf0]   ;;  %v4347_v59 = vpack.i.bf16 %v2927_v50, %v2916_v49 }
  0x72   :  { %v2827_v5 = vld [vmem:[#allocation1 + $0x284] ss:$8 sm:$0xf0]   ;;  %v4322_v20 = vpack.i.bf16 %v2818_v12, %v2807_v11  ;;  %v2945_v43 = vld [vmem:[#allocation1 + $0x143] ss:$8 sm:$0xf]   ;;  %v2938_v53 = vsel %vm2051_vm0, %v2936_v42, %v2934_v41 }
  0x73   :  { %v2836_v9 = vld [vmem:[#allocation1 + $0x384] ss:$8 sm:$0xf]   ;;  %4308 = vrot.lane.b32.xlu1 %v4307_v3, %s4465_s21  ;;  %4313 = vrot.lane.b32.xlu0 %v4312_v6, %s4465_s21  ;;  %v2829_v21 = vsel %vm2051_vm0, %v2827_v5, %v2825_v4  ;;  %v2947_v44 = vld [vmem:[#allocation1 + $0x143] ss:$8 sm:$0xf0]  }
  0x74   :  { %v2838_v10 = vld [vmem:[#allocation1 + $0x384] ss:$8 sm:$0xf0]   ;;  %v2956_v46 = vld [vmem:[#allocation1 + $0x243] ss:$8 sm:$0xf]   ;;  %v2949_v54 = vsel %vm2051_vm0, %v2947_v44, %v2945_v43 }
  0x75   :  { %v2847_v13 = vld [vmem:[#allocation1 + $0xc4] ss:$8 sm:$0xf]   ;;  %v2840_v22 = vsel %vm2051_vm0, %v2838_v10, %v2836_v9  ;;  %v2958_v47 = vld [vmem:[#allocation1 + $0x243] ss:$8 sm:$0xf0]   ;;  %v4352_v62 = vpack.i.bf16 %v2949_v54, %v2938_v53 }
  0x76   :  { %v2849_v14 = vld [vmem:[#allocation1 + $0xc4] ss:$8 sm:$0xf0]   ;;  %v4327_v31 = vpack.i.bf16 %v2840_v22, %v2829_v21  ;;  %v2967_v51 = vld [vmem:[#allocation1 + $0x343] ss:$8 sm:$0xf]   ;;  %v2960_v63 = vsel %vm2051_vm0, %v2958_v47, %v2956_v46 }
  0x77   :  { %v2858_v15 = vld [vmem:[#allocation1 + $0x1c4] ss:$8 sm:$0xf]   ;;  %v2851_v25 = vsel %vm2051_vm0, %v2849_v14, %v2847_v13  ;;  %4318 = vrot.lane.b32.xlu1 %v4317_v17, %s4465_s21  ;;  %4323 = vrot.lane.b32.xlu0 %v4322_v20, %s4465_s21  ;;  %v2969_v52 = vld [vmem:[#allocation1 + $0x343] ss:$8 sm:$0xf0]  }
  0x78   :  { %v2860_v16 = vld [vmem:[#allocation1 + $0x1c4] ss:$8 sm:$0xf0]   ;;  %v2978_v55 = vld [vmem:[#allocation1 + $0x83] ss:$8 sm:$0xf]   ;;  %v2971_v0 = vsel %vm2051_vm0, %v2969_v52, %v2967_v51 }
  0x79   :  { %v2869_v18 = vld [vmem:[#allocation1 + $0x2c4] ss:$8 sm:$0xf]   ;;  %v2862_v26 = vsel %vm2051_vm0, %v2860_v16, %v2858_v15  ;;  %v2980_v56 = vld [vmem:[#allocation1 + $0x83] ss:$8 sm:$0xf0]   ;;  %v4357_v9 = vpack.i.bf16 %v2971_v0, %v2960_v63 }
  0x7a   :  { %v2871_v19 = vld [vmem:[#allocation1 + $0x2c4] ss:$8 sm:$0xf0]   ;;  %v4332_v34 = vpack.i.bf16 %v2862_v26, %v2851_v25  ;;  %v2989_v57 = vld [vmem:[#allocation1 + $0x183] ss:$8 sm:$0xf]   ;;  %v2982_v3 = vsel %vm2051_vm0, %v2980_v56, %v2978_v55 }
  0x7b   :  { %v2880_v23 = vld [vmem:[#allocation1 + $0x3c4] ss:$8 sm:$0xf]   ;;  %v2873_v35 = vsel %vm2051_vm0, %v2871_v19, %v2869_v18  ;;  %4328 = vrot.lane.b32.xlu1 %v4327_v31, %s4465_s21  ;;  %v2991_v58 = vld [vmem:[#allocation1 + $0x183] ss:$8 sm:$0xf0]  }
  0x7c   :  { %v2882_v24 = vld [vmem:[#allocation1 + $0x3c4] ss:$8 sm:$0xf0]   ;;  %4333 = vrot.lane.b32.xlu0 %v4332_v34, %s4465_s21  ;;  %v3000_v60 = vld [vmem:[#allocation1 + $0x283] ss:$8 sm:$0xf]   ;;  %v2993_v4 = vsel %vm2051_vm0, %v2991_v58, %v2989_v57 }
  0x7d   :  { %v2884_v36 = vsel %vm2051_vm0, %v2882_v24, %v2880_v23  ;;  %v3002_v61 = vld [vmem:[#allocation1 + $0x283] ss:$8 sm:$0xf0]   ;;  %v4362_v12 = vpack.i.bf16 %v2993_v4, %v2982_v3  ;;  %v3066_v19 = vld [vmem:[#allocation1 + $0x2] ss:$8 sm:$0xf]  }
  0x7e   :  { %v4337_v45 = vpack.i.bf16 %v2884_v36, %v2873_v35  ;;  %v3011_v1 = vld [vmem:[#allocation1 + $0x383] ss:$8 sm:$0xf]   ;;  %v3004_v13 = vsel %vm2051_vm0, %v3002_v61, %v3000_v60  ;;  %v3068_v20 = vld [vmem:[#allocation1 + $0x2] ss:$8 sm:$0xf0]  }
  0x7f   :  { %v3013_v2 = vld [vmem:[#allocation1 + $0x383] ss:$8 sm:$0xf0]   ;;  %v3076_v21 = vld [vmem:[#allocation1 + $0x102] ss:$8 sm:$0xf]   ;;  %v3070_v31 = vsel %vm2051_vm0, %v3068_v20, %v3066_v19 }
  0x80   :  { %4338 = vrot.lane.b32.xlu1 %v4337_v45, %s4465_s21  ;;  %4343 = vrot.lane.b32.xlu0 %v4342_v48, %s4466_s22  ;;  %v3022_v5 = vld [vmem:[#allocation1 + $0xc3] ss:$8 sm:$0xf]   ;;  %v3015_v14 = vsel %vm2051_vm0, %v3013_v2, %v3011_v1  ;;  %v3078_v22 = vld [vmem:[#allocation1 + $0x102] ss:$8 sm:$0xf0]  }
  0x81   :  { %v3024_v6 = vld [vmem:[#allocation1 + $0xc3] ss:$8 sm:$0xf0]   ;;  %v4367_v23 = vpack.i.bf16 %v3015_v14, %v3004_v13  ;;  %v3087_v24 = vld [vmem:[#allocation1 + $0x202] ss:$8 sm:$0xf]   ;;  %v3080_v32 = vsel %vm2051_vm0, %v3078_v22, %v3076_v21 }
  0x82   :  { %v3033_v7 = vld [vmem:[#allocation1 + $0x1c3] ss:$8 sm:$0xf]   ;;  %v3026_v17 = vsel %vm2051_vm0, %v3024_v6, %v3022_v5  ;;  %v3089_v25 = vld [vmem:[#allocation1 + $0x202] ss:$8 sm:$0xf0]   ;;  %v4382_v40 = vpack.i.bf16 %v3080_v32, %v3070_v31 }
  0x83   :  { %v3035_v8 = vld [vmem:[#allocation1 + $0x1c3] ss:$8 sm:$0xf0]   ;;  %v3098_v29 = vld [vmem:[#allocation1 + $0x302] ss:$8 sm:$0xf]   ;;  %v3091_v41 = vsel %vm2051_vm0, %v3089_v25, %v3087_v24 }
  0x84   :  { %v3044_v10 = vld [vmem:[#allocation1 + $0x2c3] ss:$8 sm:$0xf]   ;;  %4348 = vrot.lane.b32.xlu1 %v4347_v59, %s4466_s22  ;;  %4353 = vrot.lane.b32.xlu0 %v4352_v62, %s4466_s22  ;;  %v3037_v18 = vsel %vm2051_vm0, %v3035_v8, %v3033_v7  ;;  %v3100_v30 = vld [vmem:[#allocation1 + $0x302] ss:$8 sm:$0xf0]  }
  0x85   :  { %v3046_v11 = vld [vmem:[#allocation1 + $0x2c3] ss:$8 sm:$0xf0]   ;;  %v4372_v26 = vpack.i.bf16 %v3037_v18, %v3026_v17  ;;  %v3109_v33 = vld [vmem:[#allocation1 + $0x42] ss:$8 sm:$0xf]   ;;  %v3102_v42 = vsel %vm2051_vm0, %v3100_v30, %v3098_v29 }
  0x86   :  { %v3055_v15 = vld [vmem:[#allocation1 + $0x3c3] ss:$8 sm:$0xf]   ;;  %v3048_v27 = vsel %vm2051_vm0, %v3046_v11, %v3044_v10  ;;  %v3111_v34 = vld [vmem:[#allocation1 + $0x42] ss:$8 sm:$0xf0]   ;;  %v4387_v51 = vpack.i.bf16 %v3102_v42, %v3091_v41 }
  0x87   :  { %v3057_v16 = vld [vmem:[#allocation1 + $0x3c3] ss:$8 sm:$0xf0]   ;;  %v3120_v35 = vld [vmem:[#allocation1 + $0x142] ss:$8 sm:$0xf]   ;;  %v3113_v45 = vsel %vm2051_vm0, %v3111_v34, %v3109_v33 }
  0x88   :  { %4358 = vrot.lane.b32.xlu1 %v4357_v9, %s4466_s22  ;;  %4363 = vrot.lane.b32.xlu0 %v4362_v12, %s4466_s22  ;;  %v3059_v28 = vsel %vm2051_vm0, %v3057_v16, %v3055_v15  ;;  %v3122_v36 = vld [vmem:[#allocation1 + $0x142] ss:$8 sm:$0xf0]   ;;  %v3241_v11 = vld [vmem:[#allocation1 + $0x1] ss:$8 sm:$0xf]  }
  0x89   :  { %v4377_v37 = vpack.i.bf16 %v3059_v28, %v3048_v27  ;;  %v3131_v38 = vld [vmem:[#allocation1 + $0x242] ss:$8 sm:$0xf]   ;;  %v3124_v46 = vsel %vm2051_vm0, %v3122_v36, %v3120_v35  ;;  %v3243_v12 = vld [vmem:[#allocation1 + $0x1] ss:$8 sm:$0xf0]  }
  0x8a   :  { %v3133_v39 = vld [vmem:[#allocation1 + $0x242] ss:$8 sm:$0xf0]   ;;  %v4392_v54 = vpack.i.bf16 %v3124_v46, %v3113_v45  ;;  %v3251_v13 = vld [vmem:[#allocation1 + $0x101] ss:$8 sm:$0xf]  }
  0x8b   :  { %v3142_v43 = vld [vmem:[#allocation1 + $0x342] ss:$8 sm:$0xf]   ;;  %v3135_v55 = vsel %vm2051_vm0, %v3133_v39, %v3131_v38  ;;  %v3253_v14 = vld [vmem:[#allocation1 + $0x101] ss:$8 sm:$0xf0]  }
  0x8c   :  { %4368 = vrot.lane.b32.xlu1 %v4367_v23, %s4466_s22  ;;  %4373 = vrot.lane.b32.xlu0 %v4372_v26, %s4466_s22  ;;  %v3144_v44 = vld [vmem:[#allocation1 + $0x342] ss:$8 sm:$0xf0]   ;;  %v3262_v16 = vld [vmem:[#allocation1 + $0x201] ss:$8 sm:$0xf]   ;;  %v3245_v23 = vsel %vm2051_vm0, %v3243_v12, %v3241_v11  ;;  %v3255_v24 = vsel %vm2051_vm0, %v3253_v14, %v3251_v13 }
  0x8d   :  { %v3153_v47 = vld [vmem:[#allocation1 + $0x82] ss:$8 sm:$0xf]   ;;  %v3146_v56 = vsel %vm2051_vm0, %v3144_v44, %v3142_v43  ;;  %v3264_v17 = vld [vmem:[#allocation1 + $0x201] ss:$8 sm:$0xf0]   ;;  %v4422_v32 = vpack.i.bf16 %v3255_v24, %v3245_v23 }
  0x8e   :  { %v3155_v48 = vld [vmem:[#allocation1 + $0x82] ss:$8 sm:$0xf0]   ;;  %v4397_v1 = vpack.i.bf16 %v3146_v56, %v3135_v55  ;;  %v3273_v21 = vld [vmem:[#allocation1 + $0x301] ss:$8 sm:$0xf]   ;;  %v3266_v33 = vsel %vm2051_vm0, %v3264_v17, %v3262_v16 }
  0x8f   :  { %v3164_v49 = vld [vmem:[#allocation1 + $0x182] ss:$8 sm:$0xf]   ;;  %v3157_v59 = vsel %vm2051_vm0, %v3155_v48, %v3153_v47  ;;  %v3275_v22 = vld [vmem:[#allocation1 + $0x301] ss:$8 sm:$0xf0]  }
  0x90   :  { %v3166_v50 = vld [vmem:[#allocation1 + $0x182] ss:$8 sm:$0xf0]   ;;  %4378 = vrot.lane.b32.xlu1 %v4377_v37, %s4466_s22  ;;  %4383 = vrot.lane.b32.xlu0 %v4382_v40, %s4467_s23  ;;  %v3284_v25 = vld [vmem:[#allocation1 + $0x41] ss:$8 sm:$0xf]   ;;  %v3277_v34 = vsel %vm2051_vm0, %v3275_v22, %v3273_v21  ;;  %v4194_v16 = vpop.permute.xlu1 %4193 }
  0x91   :  { %v3175_v52 = vld [vmem:[#allocation1 + $0x282] ss:$8 sm:$0xf]   ;;  %v3168_v60 = vsel %vm2051_vm0, %v3166_v50, %v3164_v49  ;;  %v3286_v26 = vld [vmem:[#allocation1 + $0x41] ss:$8 sm:$0xf0]   ;;  %v4427_v43 = vpack.i.bf16 %v3277_v34, %v3266_v33 }
  0x92   :  { %v3177_v53 = vld [vmem:[#allocation1 + $0x282] ss:$8 sm:$0xf0]   ;;  %v4402_v4 = vpack.i.bf16 %v3168_v60, %v3157_v59  ;;  %v3295_v27 = vld [vmem:[#allocation1 + $0x141] ss:$8 sm:$0xf]   ;;  %v3288_v37 = vsel %vm2051_vm0, %v3286_v26, %v3284_v25  ;;  %v4184_v59 = vpop.permute.xlu0 %4183 }
  0x93   :  { %v3186_v57 = vld [vmem:[#allocation1 + $0x382] ss:$8 sm:$0xf]   ;;  %v3179_v5 = vsel %vm2051_vm0, %v3177_v53, %v3175_v52  ;;  %v3297_v28 = vld [vmem:[#allocation1 + $0x141] ss:$8 sm:$0xf0]  }
  0x94   :  { %v3188_v58 = vld [vmem:[#allocation1 + $0x382] ss:$8 sm:$0xf0]   ;;  %4388 = vrot.lane.b32.xlu1 %v4387_v51, %s4467_s23  ;;  %4393 = vrot.lane.b32.xlu0 %v4392_v54, %s4467_s23  ;;  %v3306_v30 = vld [vmem:[#allocation1 + $0x241] ss:$8 sm:$0xf]   ;;  %v3299_v38 = vsel %vm2051_vm0, %v3297_v28, %v3295_v27 }
  0x95   :  { %v3197_v61 = vld [vmem:[#allocation1 + $0xc2] ss:$8 sm:$0xf]   ;;  %v3190_v6 = vsel %vm2051_vm0, %v3188_v58, %v3186_v57  ;;  %v3308_v31 = vld [vmem:[#allocation1 + $0x241] ss:$8 sm:$0xf0]   ;;  %v4432_v46 = vpack.i.bf16 %v3299_v38, %v3288_v37 }
  0x96   :  { %v3199_v62 = vld [vmem:[#allocation1 + $0xc2] ss:$8 sm:$0xf0]   ;;  %v4407_v15 = vpack.i.bf16 %v3190_v6, %v3179_v5  ;;  %v3317_v35 = vld [vmem:[#allocation1 + $0x341] ss:$8 sm:$0xf]   ;;  %v3310_v47 = vsel %vm2051_vm0, %v3308_v31, %v3306_v30  ;;  %v4186_v5 = vunpack.i.h.bf16 %v4184_v59  ;;  %v4185_v6 = vunpack.i.l.bf16 %v4184_v59 }
  0x97   :  { %v3208_v63 = vld [vmem:[#allocation1 + $0x1c2] ss:$8 sm:$0xf]   ;;  %v3201_v9 = vsel %vm2051_vm0, %v3199_v62, %v3197_v61  ;;  %v3319_v36 = vld [vmem:[#allocation1 + $0x341] ss:$8 sm:$0xf0]  }
  0x98   :  { %v3210_v0 = vld [vmem:[#allocation1 + $0x1c2] ss:$8 sm:$0xf0]   ;;  %4398 = vrot.lane.b32.xlu1 %v4397_v1, %s4467_s23  ;;  %4403 = vrot.lane.b32.xlu0 %v4402_v4, %s4467_s23  ;;  %v3328_v39 = vld [vmem:[#allocation1 + $0x81] ss:$8 sm:$0xf]   ;;  %v3321_v48 = vsel %vm2051_vm0, %v3319_v36, %v3317_v35  ;;  %v4189_v37 = vpop.permute.xlu0 %4188 }
  0x99   :  { %v3219_v2 = vld [vmem:[#allocation1 + $0x2c2] ss:$8 sm:$0xf]   ;;  %v3212_v10 = vsel %vm2051_vm0, %v3210_v0, %v3208_v63  ;;  %v3330_v40 = vld [vmem:[#allocation1 + $0x81] ss:$8 sm:$0xf0]   ;;  %v4437_v60 = vpack.i.bf16 %v3321_v48, %v3310_v47 }
  0x9a   :  { %v3221_v3 = vld [vmem:[#allocation1 + $0x2c2] ss:$8 sm:$0xf0]   ;;  %v4412_v18 = vpack.i.bf16 %v3212_v10, %v3201_v9  ;;  %v3339_v41 = vld [vmem:[#allocation1 + $0x181] ss:$8 sm:$0xf]   ;;  %v3332_v53 = vsel %vm2051_vm0, %v3330_v40, %v3328_v39 }
  0x9b   :  { %v3230_v7 = vld [vmem:[#allocation1 + $0x3c2] ss:$8 sm:$0xf]   ;;  %v3223_v19 = vsel %vm2051_vm0, %v3221_v3, %v3219_v2  ;;  %v3341_v42 = vld [vmem:[#allocation1 + $0x181] ss:$8 sm:$0xf0]  }
  0x9c   :  { %v3232_v8 = vld [vmem:[#allocation1 + $0x3c2] ss:$8 sm:$0xf0]   ;;  %4408 = vrot.lane.b32.xlu1 %v4407_v15, %s4467_s23  ;;  %4413 = vrot.lane.b32.xlu0 %v4412_v18, %s4467_s23  ;;  %v3350_v44 = vld [vmem:[#allocation1 + $0x281] ss:$8 sm:$0xf]   ;;  %v3343_v54 = vsel %vm2051_vm0, %v3341_v42, %v3339_v41  ;;  %v4191_v42 = vunpack.i.h.bf16 %v4189_v37 }
  0x9d   :  { %v3234_v20 = vsel %vm2051_vm0, %v3232_v8, %v3230_v7  ;;  %v3352_v45 = vld [vmem:[#allocation1 + $0x281] ss:$8 sm:$0xf0]   ;;  %v2049_v57 = vld [vmem:[#allocation1] ss:$8 sm:$0xf]   ;;  %v4442_v63 = vpack.i.bf16 %v3343_v54, %v3332_v53 }
  0x9e   :  { %v4417_v29 = vpack.i.bf16 %v3234_v20, %v3223_v19  ;;  %v3361_v49 = vld [vmem:[#allocation1 + $0x381] ss:$8 sm:$0xf]   ;;  %v2050_v58 = vld [vmem:[#allocation1] ss:$8 sm:$0xf0]   ;;  %v3354_v0 = vsel %vm2051_vm0, %v3352_v45, %v3350_v44  ;;  %v4196_v19 = vunpack.i.h.bf16 %v4194_v16  ;;  %v4195_v20 = vunpack.i.l.bf16 %v4194_v16 }
  0x9f   :  { %v3363_v50 = vld [vmem:[#allocation1 + $0x381] ss:$8 sm:$0xf0]   ;;  %v2052_v61 = vsel %vm2051_vm0, %v2050_v58, %v2049_v57  ;;  %v2083_v62 = vld [vmem:[#allocation1 + $0x100] ss:$8 sm:$0xf]  }
  0xa0   :  { %4418 = vrot.lane.b32.xlu1 %v4417_v29, %s4467_s23  ;;  %4423 = vrot.lane.b32.xlu0 %v4422_v32, %s4468_s24  ;;  %v3372_v51 = vld [vmem:[#allocation1 + $0xc1] ss:$8 sm:$0xf]   ;;  %2054 = vst.msk [vmem:[#allocation0] sm:$0xff] %vm2053_vm1, %v2052_v61   ;;  %v3365_v9 = vsel %vm2051_vm0, %v3363_v50, %v3361_v49  ;;  %v4199_v53 = vpop.permute.xlu1 %4198 }
  0xa1   :  { %v3374_v52 = vld [vmem:[#allocation1 + $0xc1] ss:$8 sm:$0xf0]   ;;  %v2085_v7 = vld [vmem:[#allocation1 + $0x100] ss:$8 sm:$0xf0]   ;;  %v4447_v24 = vpack.i.bf16 %v3365_v9, %v3354_v0  ;;  %v4201_v57 = vunpack.i.h.bf16 %v4199_v53  ;;  %v4200_v58 = vunpack.i.l.bf16 %v4199_v53 }
  0xa2   :  { %v3383_v55 = vld [vmem:[#allocation1 + $0x1c1] ss:$8 sm:$0xf]   ;;  %v2056_v8 = vld [vmem:[#allocation1 + $0x40] ss:$8 sm:$0xf]   ;;  %v3376_v10 = vsel %vm2051_vm0, %v3374_v52, %v3372_v51  ;;  %v2087_v12 = vsel %vm2051_vm0, %v2085_v7, %v2083_v62 }
  0xa3   :  { %v3385_v56 = vld [vmem:[#allocation1 + $0x1c1] ss:$8 sm:$0xf0]   ;;  %v2058_v13 = vld [vmem:[#allocation1 + $0x40] ss:$8 sm:$0xf0]  }
  0xa4   :  { %4428 = vrot.lane.b32.xlu1 %v4427_v43, %s4468_s24  ;;  %4433 = vrot.lane.b32.xlu0 %v4432_v46, %s4468_s24  ;;  %v3394_v1 = vld [vmem:[#allocation1 + $0x2c1] ss:$8 sm:$0xf]   ;;  %v3387_v11 = vsel %vm2051_vm0, %v3385_v56, %v3383_v55  ;;  %v2092_v14 = vld [vmem:[#allocation1 + $0x140] ss:$8 sm:$0xf]   ;;  %v2060_v15 = vsel %vm2051_vm0, %v2058_v13, %v2056_v8  ;;  %v4190_v43 = vunpack.i.l.bf16 %v4189_v37 }
  0xa5   :  { %v3396_v2 = vld [vmem:[#allocation1 + $0x2c1] ss:$8 sm:$0xf0]   ;;  %2090 = vst.msk [vmem:[#allocation0 + $0x20] sm:$0xff] %vm2053_vm1, %v2087_v12   ;;  %2063 = vst.msk [vmem:[#allocation0 + $0x8] sm:$0xff] %vm2053_vm1, %v2060_v15   ;;  %v4452_v25 = vpack.i.bf16 %v3387_v11, %v3376_v10 }
  0xa6   :  { %v3405_v3 = vld [vmem:[#allocation1 + $0x3c1] ss:$8 sm:$0xf]   ;;  %2199 = vst.msk [vmem:[#allocation0] sm:$0xff] %vm2198_vm2, %v4185_v6   ;;  %2210 = vst.msk [vmem:[#allocation0 + $0x20] sm:$0xff] %vm2198_vm2, %v4186_v5   ;;  %v3398_v29 = vsel %vm2051_vm0, %v3396_v2, %v3394_v1 }
  0xa7   :  { %v3407_v4 = vld [vmem:[#allocation1 + $0x3c1] ss:$8 sm:$0xf0]   ;;  %v2094_v17 = vld [vmem:[#allocation1 + $0x140] ss:$8 sm:$0xf0]  }
  0xa8   :  { %v2119_v18 = vld [vmem:[#allocation1 + $0x200] ss:$8 sm:$0xf]   ;;  %v2096_v21 = vsel %vm2051_vm0, %v2094_v17, %v2092_v14  ;;  %4438 = vrot.lane.b32.xlu1 %v4437_v60, %s4468_s24  ;;  %4443 = vrot.lane.b32.xlu0 %v4442_v63, %s4468_s24  ;;  %v3409_v30 = vsel %vm2051_vm0, %v3407_v4, %v3405_v3  ;;  %2243 = vst.msk [vmem:[#allocation0 + $0x8] sm:$0xff] %vm2198_vm2, %v4195_v20   ;;  %v4204_v4 = vpop.permute.xlu0 %4203 }
  0xa9   :  { %v2121_v22 = vld [vmem:[#allocation1 + $0x200] ss:$8 sm:$0xf0]   ;;  %2099 = vst.msk [vmem:[#allocation0 + $0x28] sm:$0xff] %vm2053_vm1, %v2096_v21   ;;  %v4457_v41 = vpack.i.bf16 %v3409_v30, %v3398_v29  ;;  %v4206_v5 = vunpack.i.h.bf16 %v4204_v4  ;;  %v4205_v6 = vunpack.i.l.bf16 %v4204_v4 }
  0xaa   :  { %v2155_v23 = vld [vmem:[#allocation1 + $0x300] ss:$8 sm:$0xf]   ;;  %v2123_v26 = vsel %vm2051_vm0, %v2121_v22, %v2119_v18  ;;  %2254 = vst.msk [vmem:[#allocation0 + $0x28] sm:$0xff] %vm2198_vm2, %v4196_v19  }
  0xab   :  { %v2157_v27 = vld [vmem:[#allocation1 + $0x300] ss:$8 sm:$0xf0]   ;;  %2126 = vst.msk [vmem:[#allocation0 + $0x40] sm:$0xff] %vm2053_vm1, %v2123_v26  }
  0xac   :  { %v2128_v28 = vld [vmem:[#allocation1 + $0x240] ss:$8 sm:$0xf]   ;;  %v2159_v31 = vsel %vm2051_vm0, %v2157_v27, %v2155_v23  ;;  %4448 = vrot.lane.b32.xlu1 %v4447_v24, %s4468_s24  ;;  %4453 = vrot.lane.b32.xlu0 %v4452_v25, %s4468_s24  ;;  %2221 = vst.msk [vmem:[#allocation0 + $0x40] sm:$0xff] %vm2198_vm2, %v4190_v43  }
  0xad   :  { %v2130_v32 = vld [vmem:[#allocation1 + $0x240] ss:$8 sm:$0xf0]   ;;  %2162 = vst.msk [vmem:[#allocation0 + $0x60] sm:$0xff] %vm2053_vm1, %v2159_v31  }
  0xae   :  { %v2164_v33 = vld [vmem:[#allocation1 + $0x340] ss:$8 sm:$0xf]   ;;  %v2132_v34 = vsel %vm2051_vm0, %v2130_v32, %v2128_v28  ;;  %2232 = vst.msk [vmem:[#allocation0 + $0x60] sm:$0xff] %vm2198_vm2, %v4191_v42  }
  0xaf   :  { %v2166_v35 = vld [vmem:[#allocation1 + $0x340] ss:$8 sm:$0xf0]   ;;  %2135 = vst.msk [vmem:[#allocation0 + $0x48] sm:$0xff] %vm2053_vm1, %v2132_v34  }
  0xb0   :  { %v2065_v36 = vld [vmem:[#allocation1 + $0x80] ss:$8 sm:$0xf]   ;;  %v2168_v38 = vsel %vm2051_vm0, %v2166_v35, %v2164_v33  ;;  %4458 = vrot.lane.b32.xlu1 %v4457_v41, %s4468_s24  ;;  %2265 = vst.msk [vmem:[#allocation0 + $0x48] sm:$0xff] %vm2198_vm2, %v4200_v58   ;;  %v4209_v7 = vpop.permute.xlu1 %4208 }
  0xb1   :  { %v2067_v39 = vld [vmem:[#allocation1 + $0x80] ss:$8 sm:$0xf0]   ;;  %2171 = vst.msk [vmem:[#allocation0 + $0x68] sm:$0xff] %vm2053_vm1, %v2168_v38   ;;  %v4211_v8 = vunpack.i.h.bf16 %v4209_v7  ;;  %v4210_v9 = vunpack.i.l.bf16 %v4209_v7 }
  0xb2   :  { %v2101_v40 = vld [vmem:[#allocation1 + $0x180] ss:$8 sm:$0xf]   ;;  %v2069_v44 = vsel %vm2051_vm0, %v2067_v39, %v2065_v36  ;;  %2276 = vst.msk [vmem:[#allocation0 + $0x68] sm:$0xff] %vm2198_vm2, %v4201_v57  }
  0xb3   :  { %v2103_v45 = vld [vmem:[#allocation1 + $0x180] ss:$8 sm:$0xf0]   ;;  %2072 = vst.msk [vmem:[#allocation0 + $0x10] sm:$0xff] %vm2053_vm1, %v2069_v44  }
  0xb4   :  { %v2137_v46 = vld [vmem:[#allocation1 + $0x280] ss:$8 sm:$0xf]   ;;  %v2105_v47 = vsel %vm2051_vm0, %v2103_v45, %v2101_v40  ;;  %2287 = vst.msk [vmem:[#allocation0 + $0x10] sm:$0xff] %vm2198_vm2, %v4205_v6  }
  0xb5   :  { %v2139_v48 = vld [vmem:[#allocation1 + $0x280] ss:$8 sm:$0xf0]   ;;  %2108 = vst.msk [vmem:[#allocation0 + $0x30] sm:$0xff] %vm2053_vm1, %v2105_v47  }
  0xb6   :  { %v2173_v49 = vld [vmem:[#allocation1 + $0x380] ss:$8 sm:$0xf]   ;;  %v2141_v50 = vsel %vm2051_vm0, %v2139_v48, %v2137_v46  ;;  %2298 = vst.msk [vmem:[#allocation0 + $0x30] sm:$0xff] %vm2198_vm2, %v4206_v5  }
  0xb7   :  { %v2175_v51 = vld [vmem:[#allocation1 + $0x380] ss:$8 sm:$0xf0]   ;;  %2144 = vst.msk [vmem:[#allocation0 + $0x50] sm:$0xff] %vm2053_vm1, %v2141_v50  }
  0xb8   :  { %v2074_v52 = vld [vmem:[#allocation1 + $0xc0] ss:$8 sm:$0xf]   ;;  %v2177_v54 = vsel %vm2051_vm0, %v2175_v51, %v2173_v49  ;;  %2309 = vst.msk [vmem:[#allocation0 + $0x50] sm:$0xff] %vm2198_vm2, %v4210_v9  }
  0xb9   :  { %v2076_v55 = vld [vmem:[#allocation1 + $0xc0] ss:$8 sm:$0xf0]   ;;  %2180 = vst.msk [vmem:[#allocation0 + $0x70] sm:$0xff] %vm2053_vm1, %v2177_v54   ;;  %v4214_v10 = vpop.permute.xlu0 %4213 }
  0xba   :  { %v2110_v56 = vld [vmem:[#allocation1 + $0x1c0] ss:$8 sm:$0xf]   ;;  %v2078_v59 = vsel %vm2051_vm0, %v2076_v55, %v2074_v52  ;;  %2320 = vst.msk [vmem:[#allocation0 + $0x70] sm:$0xff] %vm2198_vm2, %v4211_v8   ;;  %v4216_v11 = vunpack.i.h.bf16 %v4214_v10  ;;  %v4215_v12 = vunpack.i.l.bf16 %v4214_v10 }
  0xbb   :  { %v2112_v60 = vld [vmem:[#allocation1 + $0x1c0] ss:$8 sm:$0xf0]   ;;  %2081 = vst.msk [vmem:[#allocation0 + $0x18] sm:$0xff] %vm2053_vm1, %v2078_v59  }
  0xbc   :  { %v2146_v61 = vld [vmem:[#allocation1 + $0x2c0] ss:$8 sm:$0xf]   ;;  %v2114_v62 = vsel %vm2051_vm0, %v2112_v60, %v2110_v56  ;;  %2331 = vst.msk [vmem:[#allocation0 + $0x18] sm:$0xff] %vm2198_vm2, %v4215_v12  }
  0xbd   :  { %v2148_v63 = vld [vmem:[#allocation1 + $0x2c0] ss:$8 sm:$0xf0]   ;;  %2117 = vst.msk [vmem:[#allocation0 + $0x38] sm:$0xff] %vm2053_vm1, %v2114_v62   ;;  %v4224_v14 = vpop.permute.xlu0 %4223 }
  0xbe   :  { %v2182_v0 = vld [vmem:[#allocation1 + $0x3c0] ss:$8 sm:$0xf]   ;;  %v2150_v1 = vsel %vm2051_vm0, %v2148_v63, %v2146_v61  ;;  %2342 = vst.msk [vmem:[#allocation0 + $0x38] sm:$0xff] %vm2198_vm2, %v4216_v11   ;;  %v4226_v17 = vunpack.i.h.bf16 %v4224_v14  ;;  %v4225_v18 = vunpack.i.l.bf16 %v4224_v14 }
  0xbf   :  { %v2184_v2 = vld [vmem:[#allocation1 + $0x3c0] ss:$8 sm:$0xf0]   ;;  %2153 = vst.msk [vmem:[#allocation0 + $0x58] sm:$0xff] %vm2053_vm1, %v2150_v1  }
  0xc0   :  { %v2186_v3 = vsel %vm2051_vm0, %v2184_v2, %v2182_v0  ;;  %v4219_v13 = vpop.permute.xlu1 %4218  ;;  %2385 = vst.msk [vmem:[#allocation0 + $0x20] sm:$0xff] %vm2373_vm3, %v4226_v17   ;;  %2374 = vst.msk [vmem:[#allocation0] sm:$0xff] %vm2373_vm3, %v4225_v18  }
  0xc1   :  { %2189 = vst.msk [vmem:[#allocation0 + $0x78] sm:$0xff] %vm2053_vm1, %v2186_v3   ;;  %v4221_v15 = vunpack.i.h.bf16 %v4219_v13  ;;  %v4220_v16 = vunpack.i.l.bf16 %v4219_v13  ;;  %v4234_v20 = vpop.permute.xlu0 %4233 }
  0xc2   :  { %v4236_v23 = vunpack.i.h.bf16 %v4234_v20  ;;  %v4235_v24 = vunpack.i.l.bf16 %v4234_v20 }
  0xc3   :  { %2353 = vst.msk [vmem:[#allocation0 + $0x58] sm:$0xff] %vm2198_vm2, %v4220_v16   ;;  %2364 = vst.msk [vmem:[#allocation0 + $0x78] sm:$0xff] %vm2198_vm2, %v4221_v15  }
  0xc4   :  { %v4229_v19 = vpop.permute.xlu1 %4228  ;;  %2429 = vst.msk [vmem:[#allocation0 + $0x28] sm:$0xff] %vm2373_vm3, %v4236_v23   ;;  %2418 = vst.msk [vmem:[#allocation0 + $0x8] sm:$0xff] %vm2373_vm3, %v4235_v24  }
  0xc5   :  { %v4231_v21 = vunpack.i.h.bf16 %v4229_v19  ;;  %v4230_v22 = vunpack.i.l.bf16 %v4229_v19  ;;  %v4244_v26 = vpop.permute.xlu0 %4243 }
  0xc6   :  { %v4246_v29 = vunpack.i.h.bf16 %v4244_v26  ;;  %v4245_v30 = vunpack.i.l.bf16 %v4244_v26 }
  0xc7   :  { %2407 = vst.msk [vmem:[#allocation0 + $0x60] sm:$0xff] %vm2373_vm3, %v4231_v21   ;;  %2396 = vst.msk [vmem:[#allocation0 + $0x40] sm:$0xff] %vm2373_vm3, %v4230_v22  }
  0xc8   :  { %v4239_v25 = vpop.permute.xlu1 %4238  ;;  %2462 = vst.msk [vmem:[#allocation0 + $0x10] sm:$0xff] %vm2373_vm3, %v4245_v30   ;;  %2473 = vst.msk [vmem:[#allocation0 + $0x30] sm:$0xff] %vm2373_vm3, %v4246_v29  }
  0xc9   :  { %v4241_v27 = vunpack.i.h.bf16 %v4239_v25  ;;  %v4240_v28 = vunpack.i.l.bf16 %v4239_v25 }
  0xcb   :  { %2451 = vst.msk [vmem:[#allocation0 + $0x68] sm:$0xff] %vm2373_vm3, %v4241_v27   ;;  %2440 = vst.msk [vmem:[#allocation0 + $0x48] sm:$0xff] %vm2373_vm3, %v4240_v28  }
  0xcc   :  { %v4249_v31 = vpop.permute.xlu1 %4248 }
  0xcd   :  { %v4254_v32 = vpop.permute.xlu0 %4253  ;;  %v4251_v33 = vunpack.i.h.bf16 %v4249_v31  ;;  %v4250_v34 = vunpack.i.l.bf16 %v4249_v31 }
  0xce   :  { %v4256_v35 = vunpack.i.h.bf16 %v4254_v32  ;;  %v4255_v36 = vunpack.i.l.bf16 %v4254_v32 }
  0xcf   :  { %2495 = vst.msk [vmem:[#allocation0 + $0x70] sm:$0xff] %vm2373_vm3, %v4251_v33   ;;  %2484 = vst.msk [vmem:[#allocation0 + $0x50] sm:$0xff] %vm2373_vm3, %v4250_v34  }
  0xd0   :  { %2506 = vst.msk [vmem:[#allocation0 + $0x18] sm:$0xff] %vm2373_vm3, %v4255_v36   ;;  %2517 = vst.msk [vmem:[#allocation0 + $0x38] sm:$0xff] %vm2373_vm3, %v4256_v35  }
  0xd1   :  { %v4259_v37 = vpop.permute.xlu1 %4258  ;;  %v4264_v38 = vpop.permute.xlu0 %4263 }
  0xd2   :  { %v4261_v39 = vunpack.i.h.bf16 %v4259_v37  ;;  %v4260_v40 = vunpack.i.l.bf16 %v4259_v37  ;;  %v4266_v41 = vunpack.i.h.bf16 %v4264_v38  ;;  %v4265_v42 = vunpack.i.l.bf16 %v4264_v38 }
  0xd4   :  { %2528 = vst.msk [vmem:[#allocation0 + $0x58] sm:$0xff] %vm2373_vm3, %v4260_v40   ;;  %2539 = vst.msk [vmem:[#allocation0 + $0x78] sm:$0xff] %vm2373_vm3, %v4261_v39  }
  0xd5   :  { %2549 = vst.msk [vmem:[#allocation0] sm:$0xff] %vm2548_vm4, %v4265_v42   ;;  %2560 = vst.msk [vmem:[#allocation0 + $0x20] sm:$0xff] %vm2548_vm4, %v4266_v41   ;;  %v4269_v43 = vpop.permute.xlu1 %4268  ;;  %v4274_v44 = vpop.permute.xlu0 %4273 }
  0xd6   :  { %v4271_v45 = vunpack.i.h.bf16 %v4269_v43  ;;  %v4270_v46 = vunpack.i.l.bf16 %v4269_v43  ;;  %v4276_v47 = vunpack.i.h.bf16 %v4274_v44  ;;  %v4275_v48 = vunpack.i.l.bf16 %v4274_v44 }
  0xd8   :  { %2571 = vst.msk [vmem:[#allocation0 + $0x40] sm:$0xff] %vm2548_vm4, %v4270_v46   ;;  %2582 = vst.msk [vmem:[#allocation0 + $0x60] sm:$0xff] %vm2548_vm4, %v4271_v45  }
  0xd9   :  { %2593 = vst.msk [vmem:[#allocation0 + $0x8] sm:$0xff] %vm2548_vm4, %v4275_v48   ;;  %2604 = vst.msk [vmem:[#allocation0 + $0x28] sm:$0xff] %vm2548_vm4, %v4276_v47   ;;  %v4279_v49 = vpop.permute.xlu1 %4278  ;;  %v4284_v50 = vpop.permute.xlu0 %4283 }
  0xda   :  { %v4281_v51 = vunpack.i.h.bf16 %v4279_v49  ;;  %v4280_v52 = vunpack.i.l.bf16 %v4279_v49  ;;  %v4286_v53 = vunpack.i.h.bf16 %v4284_v50  ;;  %v4285_v54 = vunpack.i.l.bf16 %v4284_v50 }
  0xdc   :  { %2615 = vst.msk [vmem:[#allocation0 + $0x48] sm:$0xff] %vm2548_vm4, %v4280_v52   ;;  %2626 = vst.msk [vmem:[#allocation0 + $0x68] sm:$0xff] %vm2548_vm4, %v4281_v51  }
  0xdd   :  { %2637 = vst.msk [vmem:[#allocation0 + $0x10] sm:$0xff] %vm2548_vm4, %v4285_v54   ;;  %2648 = vst.msk [vmem:[#allocation0 + $0x30] sm:$0xff] %vm2548_vm4, %v4286_v53   ;;  %v4289_v55 = vpop.permute.xlu1 %4288  ;;  %v4294_v56 = vpop.permute.xlu0 %4293 }
  0xde   :  { %v4291_v57 = vunpack.i.h.bf16 %v4289_v55  ;;  %v4290_v58 = vunpack.i.l.bf16 %v4289_v55  ;;  %v4296_v59 = vunpack.i.h.bf16 %v4294_v56  ;;  %v4295_v60 = vunpack.i.l.bf16 %v4294_v56 }
  0xe0   :  { %2659 = vst.msk [vmem:[#allocation0 + $0x50] sm:$0xff] %vm2548_vm4, %v4290_v58   ;;  %2670 = vst.msk [vmem:[#allocation0 + $0x70] sm:$0xff] %vm2548_vm4, %v4291_v57  }
  0xe1   :  { %2681 = vst.msk [vmem:[#allocation0 + $0x18] sm:$0xff] %vm2548_vm4, %v4295_v60   ;;  %2692 = vst.msk [vmem:[#allocation0 + $0x38] sm:$0xff] %vm2548_vm4, %v4296_v59   ;;  %v4299_v61 = vpop.permute.xlu1 %4298  ;;  %v4304_v62 = vpop.permute.xlu0 %4303 }
  0xe2   :  { %v4301_v63 = vunpack.i.h.bf16 %v4299_v61  ;;  %v4300_v0 = vunpack.i.l.bf16 %v4299_v61  ;;  %v4306_v1 = vunpack.i.h.bf16 %v4304_v62  ;;  %v4305_v2 = vunpack.i.l.bf16 %v4304_v62 }
  0xe4   :  { %2703 = vst.msk [vmem:[#allocation0 + $0x58] sm:$0xff] %vm2548_vm4, %v4300_v0   ;;  %2714 = vst.msk [vmem:[#allocation0 + $0x78] sm:$0xff] %vm2548_vm4, %v4301_v63  }
  0xe5   :  { %2724 = vst.msk [vmem:[#allocation0] sm:$0xff] %vm2723_vm5, %v4305_v2   ;;  %2735 = vst.msk [vmem:[#allocation0 + $0x20] sm:$0xff] %vm2723_vm5, %v4306_v1   ;;  %v4309_v3 = vpop.permute.xlu1 %4308  ;;  %v4314_v4 = vpop.permute.xlu0 %4313 }
  0xe6   :  { %v4311_v5 = vunpack.i.h.bf16 %v4309_v3  ;;  %v4310_v6 = vunpack.i.l.bf16 %v4309_v3  ;;  %v4316_v7 = vunpack.i.h.bf16 %v4314_v4  ;;  %v4315_v8 = vunpack.i.l.bf16 %v4314_v4 }
  0xe8   :  { %2746 = vst.msk [vmem:[#allocation0 + $0x40] sm:$0xff] %vm2723_vm5, %v4310_v6   ;;  %2757 = vst.msk [vmem:[#allocation0 + $0x60] sm:$0xff] %vm2723_vm5, %v4311_v5  }
  0xe9   :  { %2768 = vst.msk [vmem:[#allocation0 + $0x8] sm:$0xff] %vm2723_vm5, %v4315_v8   ;;  %2779 = vst.msk [vmem:[#allocation0 + $0x28] sm:$0xff] %vm2723_vm5, %v4316_v7   ;;  %v4319_v9 = vpop.permute.xlu1 %4318  ;;  %v4324_v10 = vpop.permute.xlu0 %4323 }
  0xea   :  { %v4321_v11 = vunpack.i.h.bf16 %v4319_v9  ;;  %v4320_v12 = vunpack.i.l.bf16 %v4319_v9  ;;  %v4326_v13 = vunpack.i.h.bf16 %v4324_v10  ;;  %v4325_v14 = vunpack.i.l.bf16 %v4324_v10 }
  0xec   :  { %2790 = vst.msk [vmem:[#allocation0 + $0x48] sm:$0xff] %vm2723_vm5, %v4320_v12   ;;  %2801 = vst.msk [vmem:[#allocation0 + $0x68] sm:$0xff] %vm2723_vm5, %v4321_v11  }
  0xed   :  { %2812 = vst.msk [vmem:[#allocation0 + $0x10] sm:$0xff] %vm2723_vm5, %v4325_v14   ;;  %2823 = vst.msk [vmem:[#allocation0 + $0x30] sm:$0xff] %vm2723_vm5, %v4326_v13   ;;  %v4329_v15 = vpop.permute.xlu1 %4328 }
  0xee   :  { %v4334_v16 = vpop.permute.xlu0 %4333  ;;  %v4331_v17 = vunpack.i.h.bf16 %v4329_v15  ;;  %v4330_v18 = vunpack.i.l.bf16 %v4329_v15 }
  0xef   :  { %v4336_v19 = vunpack.i.h.bf16 %v4334_v16  ;;  %v4335_v20 = vunpack.i.l.bf16 %v4334_v16 }
  0xf0   :  { %2834 = vst.msk [vmem:[#allocation0 + $0x50] sm:$0xff] %vm2723_vm5, %v4330_v18   ;;  %2845 = vst.msk [vmem:[#allocation0 + $0x70] sm:$0xff] %vm2723_vm5, %v4331_v17  }
  0xf1   :  { %2856 = vst.msk [vmem:[#allocation0 + $0x18] sm:$0xff] %vm2723_vm5, %v4335_v20   ;;  %2867 = vst.msk [vmem:[#allocation0 + $0x38] sm:$0xff] %vm2723_vm5, %v4336_v19  }
  0xf2   :  { %v4339_v21 = vpop.permute.xlu1 %4338  ;;  %v4344_v22 = vpop.permute.xlu0 %4343 }
  0xf3   :  { %v4341_v23 = vunpack.i.h.bf16 %v4339_v21  ;;  %v4340_v24 = vunpack.i.l.bf16 %v4339_v21  ;;  %v4346_v25 = vunpack.i.h.bf16 %v4344_v22  ;;  %v4345_v26 = vunpack.i.l.bf16 %v4344_v22 }
  0xf5   :  { %2878 = vst.msk [vmem:[#allocation0 + $0x58] sm:$0xff] %vm2723_vm5, %v4340_v24   ;;  %2889 = vst.msk [vmem:[#allocation0 + $0x78] sm:$0xff] %vm2723_vm5, %v4341_v23  }
  0xf6   :  { %2899 = vst.msk [vmem:[#allocation0] sm:$0xff] %vm2898_vm6, %v4345_v26   ;;  %2910 = vst.msk [vmem:[#allocation0 + $0x20] sm:$0xff] %vm2898_vm6, %v4346_v25   ;;  %v4349_v27 = vpop.permute.xlu1 %4348  ;;  %v4354_v28 = vpop.permute.xlu0 %4353 }
  0xf7   :  { %v4351_v29 = vunpack.i.h.bf16 %v4349_v27  ;;  %v4350_v30 = vunpack.i.l.bf16 %v4349_v27  ;;  %v4356_v31 = vunpack.i.h.bf16 %v4354_v28  ;;  %v4355_v32 = vunpack.i.l.bf16 %v4354_v28 }
  0xf9   :  { %2921 = vst.msk [vmem:[#allocation0 + $0x40] sm:$0xff] %vm2898_vm6, %v4350_v30   ;;  %2932 = vst.msk [vmem:[#allocation0 + $0x60] sm:$0xff] %vm2898_vm6, %v4351_v29  }
  0xfa   :  { %2943 = vst.msk [vmem:[#allocation0 + $0x8] sm:$0xff] %vm2898_vm6, %v4355_v32   ;;  %2954 = vst.msk [vmem:[#allocation0 + $0x28] sm:$0xff] %vm2898_vm6, %v4356_v31   ;;  %v4359_v33 = vpop.permute.xlu1 %4358  ;;  %v4364_v34 = vpop.permute.xlu0 %4363 }
  0xfb   :  { %v4361_v35 = vunpack.i.h.bf16 %v4359_v33  ;;  %v4360_v36 = vunpack.i.l.bf16 %v4359_v33  ;;  %v4366_v37 = vunpack.i.h.bf16 %v4364_v34  ;;  %v4365_v38 = vunpack.i.l.bf16 %v4364_v34 }
  0xfd   :  { %2965 = vst.msk [vmem:[#allocation0 + $0x48] sm:$0xff] %vm2898_vm6, %v4360_v36   ;;  %2976 = vst.msk [vmem:[#allocation0 + $0x68] sm:$0xff] %vm2898_vm6, %v4361_v35  }
  0xfe   :  { %2987 = vst.msk [vmem:[#allocation0 + $0x10] sm:$0xff] %vm2898_vm6, %v4365_v38   ;;  %2998 = vst.msk [vmem:[#allocation0 + $0x30] sm:$0xff] %vm2898_vm6, %v4366_v37   ;;  %v4369_v39 = vpop.permute.xlu1 %4368  ;;  %v4374_v40 = vpop.permute.xlu0 %4373 }
  0xff   :  { %v4371_v41 = vunpack.i.h.bf16 %v4369_v39  ;;  %v4370_v42 = vunpack.i.l.bf16 %v4369_v39  ;;  %v4376_v43 = vunpack.i.h.bf16 %v4374_v40  ;;  %v4375_v44 = vunpack.i.l.bf16 %v4374_v40 }
 0x101   :  { %3009 = vst.msk [vmem:[#allocation0 + $0x50] sm:$0xff] %vm2898_vm6, %v4370_v42   ;;  %3020 = vst.msk [vmem:[#allocation0 + $0x70] sm:$0xff] %vm2898_vm6, %v4371_v41  }
 0x102   :  { %3031 = vst.msk [vmem:[#allocation0 + $0x18] sm:$0xff] %vm2898_vm6, %v4375_v44   ;;  %3042 = vst.msk [vmem:[#allocation0 + $0x38] sm:$0xff] %vm2898_vm6, %v4376_v43   ;;  %v4379_v45 = vpop.permute.xlu1 %4378  ;;  %v4384_v46 = vpop.permute.xlu0 %4383 }
 0x103   :  { %v4381_v47 = vunpack.i.h.bf16 %v4379_v45  ;;  %v4380_v48 = vunpack.i.l.bf16 %v4379_v45  ;;  %v4386_v49 = vunpack.i.h.bf16 %v4384_v46  ;;  %v4385_v50 = vunpack.i.l.bf16 %v4384_v46 }
 0x105   :  { %3053 = vst.msk [vmem:[#allocation0 + $0x58] sm:$0xff] %vm2898_vm6, %v4380_v48   ;;  %3064 = vst.msk [vmem:[#allocation0 + $0x78] sm:$0xff] %vm2898_vm6, %v4381_v47  }
 0x106   :  { %3074 = vst.msk [vmem:[#allocation0] sm:$0xff] %vm3073_vm7, %v4385_v50   ;;  %3085 = vst.msk [vmem:[#allocation0 + $0x20] sm:$0xff] %vm3073_vm7, %v4386_v49   ;;  %v4389_v51 = vpop.permute.xlu1 %4388  ;;  %v4394_v52 = vpop.permute.xlu0 %4393 }
 0x107   :  { %v4391_v53 = vunpack.i.h.bf16 %v4389_v51  ;;  %v4390_v54 = vunpack.i.l.bf16 %v4389_v51  ;;  %v4396_v55 = vunpack.i.h.bf16 %v4394_v52  ;;  %v4395_v56 = vunpack.i.l.bf16 %v4394_v52 }
 0x109   :  { %3096 = vst.msk [vmem:[#allocation0 + $0x40] sm:$0xff] %vm3073_vm7, %v4390_v54   ;;  %3107 = vst.msk [vmem:[#allocation0 + $0x60] sm:$0xff] %vm3073_vm7, %v4391_v53  }
 0x10a   :  { %3118 = vst.msk [vmem:[#allocation0 + $0x8] sm:$0xff] %vm3073_vm7, %v4395_v56   ;;  %3129 = vst.msk [vmem:[#allocation0 + $0x28] sm:$0xff] %vm3073_vm7, %v4396_v55   ;;  %v4399_v57 = vpop.permute.xlu1 %4398  ;;  %v4404_v58 = vpop.permute.xlu0 %4403 }
 0x10b   :  { %v4401_v59 = vunpack.i.h.bf16 %v4399_v57  ;;  %v4400_v60 = vunpack.i.l.bf16 %v4399_v57  ;;  %v4406_v61 = vunpack.i.h.bf16 %v4404_v58  ;;  %v4405_v62 = vunpack.i.l.bf16 %v4404_v58 }
 0x10d   :  { %3140 = vst.msk [vmem:[#allocation0 + $0x48] sm:$0xff] %vm3073_vm7, %v4400_v60   ;;  %3151 = vst.msk [vmem:[#allocation0 + $0x68] sm:$0xff] %vm3073_vm7, %v4401_v59  }
 0x10e   :  { %3162 = vst.msk [vmem:[#allocation0 + $0x10] sm:$0xff] %vm3073_vm7, %v4405_v62   ;;  %3173 = vst.msk [vmem:[#allocation0 + $0x30] sm:$0xff] %vm3073_vm7, %v4406_v61   ;;  %v4409_v63 = vpop.permute.xlu1 %4408  ;;  %v4414_v0 = vpop.permute.xlu0 %4413 }
 0x10f   :  { %v4411_v1 = vunpack.i.h.bf16 %v4409_v63  ;;  %v4410_v2 = vunpack.i.l.bf16 %v4409_v63  ;;  %v4416_v3 = vunpack.i.h.bf16 %v4414_v0  ;;  %v4415_v4 = vunpack.i.l.bf16 %v4414_v0 }
 0x111   :  { %3184 = vst.msk [vmem:[#allocation0 + $0x50] sm:$0xff] %vm3073_vm7, %v4410_v2   ;;  %3195 = vst.msk [vmem:[#allocation0 + $0x70] sm:$0xff] %vm3073_vm7, %v4411_v1  }
 0x112   :  { %3206 = vst.msk [vmem:[#allocation0 + $0x18] sm:$0xff] %vm3073_vm7, %v4415_v4   ;;  %3217 = vst.msk [vmem:[#allocation0 + $0x38] sm:$0xff] %vm3073_vm7, %v4416_v3   ;;  %v4419_v5 = vpop.permute.xlu1 %4418  ;;  %v4424_v6 = vpop.permute.xlu0 %4423 }
 0x113   :  { %v4421_v7 = vunpack.i.h.bf16 %v4419_v5  ;;  %v4420_v8 = vunpack.i.l.bf16 %v4419_v5  ;;  %v4426_v9 = vunpack.i.h.bf16 %v4424_v6  ;;  %v4425_v10 = vunpack.i.l.bf16 %v4424_v6 }
 0x115   :  { %3228 = vst.msk [vmem:[#allocation0 + $0x58] sm:$0xff] %vm3073_vm7, %v4420_v8   ;;  %3239 = vst.msk [vmem:[#allocation0 + $0x78] sm:$0xff] %vm3073_vm7, %v4421_v7  }
 0x116   :  { %3249 = vst.msk [vmem:[#allocation0] sm:$0xff] %vm3248_vm8, %v4425_v10   ;;  %3260 = vst.msk [vmem:[#allocation0 + $0x20] sm:$0xff] %vm3248_vm8, %v4426_v9   ;;  %v4429_v11 = vpop.permute.xlu1 %4428  ;;  %v4434_v12 = vpop.permute.xlu0 %4433 }
 0x117   :  { %v4431_v13 = vunpack.i.h.bf16 %v4429_v11  ;;  %v4430_v14 = vunpack.i.l.bf16 %v4429_v11  ;;  %v4436_v15 = vunpack.i.h.bf16 %v4434_v12  ;;  %v4435_v16 = vunpack.i.l.bf16 %v4434_v12 }
 0x119   :  { %3271 = vst.msk [vmem:[#allocation0 + $0x40] sm:$0xff] %vm3248_vm8, %v4430_v14   ;;  %3282 = vst.msk [vmem:[#allocation0 + $0x60] sm:$0xff] %vm3248_vm8, %v4431_v13  }
 0x11a   :  { %3293 = vst.msk [vmem:[#allocation0 + $0x8] sm:$0xff] %vm3248_vm8, %v4435_v16   ;;  %3304 = vst.msk [vmem:[#allocation0 + $0x28] sm:$0xff] %vm3248_vm8, %v4436_v15   ;;  %v4439_v17 = vpop.permute.xlu1 %4438  ;;  %v4444_v18 = vpop.permute.xlu0 %4443 }
 0x11b   :  { %v4441_v19 = vunpack.i.h.bf16 %v4439_v17  ;;  %v4440_v20 = vunpack.i.l.bf16 %v4439_v17  ;;  %v4446_v21 = vunpack.i.h.bf16 %v4444_v18  ;;  %v4445_v22 = vunpack.i.l.bf16 %v4444_v18 }
 0x11d   :  { %3315 = vst.msk [vmem:[#allocation0 + $0x48] sm:$0xff] %vm3248_vm8, %v4440_v20   ;;  %3326 = vst.msk [vmem:[#allocation0 + $0x68] sm:$0xff] %vm3248_vm8, %v4441_v19   ;;  %v3419_v29 = vld [vmem:[#allocation0] sm:$0xff] }
 0x11e   :  { %3337 = vst.msk [vmem:[#allocation0 + $0x10] sm:$0xff] %vm3248_vm8, %v4445_v22   ;;  %3348 = vst.msk [vmem:[#allocation0 + $0x30] sm:$0xff] %vm3248_vm8, %v4446_v21   ;;  %v4449_v23 = vpop.permute.xlu1 %4448  ;;  %v4454_v24 = vpop.permute.xlu0 %4453  ;;  %v3444_v31 = vld [vmem:[#allocation0 + $0x20] sm:$0xff] }
 0x11f   :  { %v4451_v25 = vunpack.i.h.bf16 %v4449_v23  ;;  %v4450_v26 = vunpack.i.l.bf16 %v4449_v23  ;;  %v4456_v27 = vunpack.i.h.bf16 %v4454_v24  ;;  %v4455_v28 = vunpack.i.l.bf16 %v4454_v24 }
 0x120   :  { %v3472_v36 = vld [vmem:[#allocation0 + $0x40] sm:$0xff] }
 0x121   :  { %v3424_v30 = vld [vmem:[#allocation0 + $0x8] sm:$0xff]  ;;  %3359 = vst.msk [vmem:[#allocation0 + $0x50] sm:$0xff] %vm3248_vm8, %v4450_v26   ;;  %3370 = vst.msk [vmem:[#allocation0 + $0x70] sm:$0xff] %vm3248_vm8, %v4451_v25   ;;  %v3500_v39 = vld [vmem:[#allocation0 + $0x60] sm:$0xff] }
 0x122   :  { %v3451_v32 = vld [vmem:[#allocation0 + $0x28] sm:$0xff]  ;;  %v4068_v33 = vpack.c.bf16 %v3424_v30, %v3419_v29  ;;  %3381 = vst.msk [vmem:[#allocation0 + $0x18] sm:$0xff] %vm3248_vm8, %v4455_v28   ;;  %3392 = vst.msk [vmem:[#allocation0 + $0x38] sm:$0xff] %vm3248_vm8, %v4456_v27   ;;  %v4459_v35 = vpop.permute.xlu1 %4458 }
 0x123   :  { %v4078_v34 = vpack.c.bf16 %v3451_v32, %v3444_v31  ;;  %v4461_v37 = vunpack.i.h.bf16 %v4459_v35  ;;  %v4460_v38 = vunpack.i.l.bf16 %v4459_v35 }
 0x124   :  { %4069 = vst [vmem:[%s5008_s1] sm:$0xff] %v4068_v33   ;;  %v3479_v40 = vld [vmem:[#allocation0 + $0x48] sm:$0xff] }
 0x125   :  { %v3507_v41 = vld [vmem:[#allocation0 + $0x68] sm:$0xff]  ;;  %4169 = vst [vmem:[%s5008_s1 + $0x10] sm:$0xff] %v4078_v34   ;;  %v4088_v42 = vpack.c.bf16 %v3479_v40, %v3472_v36  ;;  %3403 = vst.msk [vmem:[#allocation0 + $0x58] sm:$0xff] %vm3248_vm8, %v4460_v38   ;;  %v3430_v44 = vld [vmem:[#allocation0 + $0x10] sm:$0xff] }
 0x126   :  { %v4098_v43 = vpack.c.bf16 %v3507_v41, %v3500_v39  ;;  %3414 = vst.msk [vmem:[#allocation0 + $0x78] sm:$0xff] %vm3248_vm8, %v4461_v37   ;;  %v3458_v46 = vld [vmem:[#allocation0 + $0x30] sm:$0xff] }
 0x127   :  { %4171 = vst [vmem:[%s5008_s1 + $0x20] sm:$0xff] %v4088_v42  }
 0x128   :  { %4173 = vst [vmem:[%s5008_s1 + $0x30] sm:$0xff] %v4098_v43   ;;  %v3486_v50 = vld [vmem:[#allocation0 + $0x50] sm:$0xff] }
 0x129   :  { %v3437_v45 = vld [vmem:[#allocation0 + $0x18] sm:$0xff]  ;;  %v3514_v51 = vld [vmem:[#allocation0 + $0x70] sm:$0xff] }
 0x12a   :  { %v4073_v47 = vpack.c.bf16 %v3437_v45, %v3430_v44  ;;  %v3465_v48 = vld [vmem:[#allocation0 + $0x38] sm:$0xff] }
 0x12b   :  { %v4083_v49 = vpack.c.bf16 %v3465_v48, %v3458_v46 }
 0x12c   :  { %4168 = vst [vmem:[%s5008_s1 + $0x8] sm:$0xff] %v4073_v47   ;;  %v3493_v52 = vld [vmem:[#allocation0 + $0x58] sm:$0xff] }
 0x12d   :  { %4170 = vst [vmem:[%s5008_s1 + $0x18] sm:$0xff] %v4083_v49   ;;  %v3521_v53 = vld [vmem:[#allocation0 + $0x78] sm:$0xff]  ;;  %v4093_v54 = vpack.c.bf16 %v3493_v52, %v3486_v50 }
 0x12e   :  { %v4103_v55 = vpack.c.bf16 %v3521_v53, %v3514_v51 }
 0x12f   :  { %4172 = vst [vmem:[%s5008_s1 + $0x28] sm:$0xff] %v4093_v54  }
 0x130   :  { %4174 = vst [vmem:[%s5008_s1 + $0x38] sm:$0xff] %v4103_v55  }

// kernel: squeeze.5
= control target key start
LH: loop header
LB: loop body
LE: loop exit
PB: predicated region body
PF: predicated region fallthrough
CT: control target
= control target key end

     0   :  { %vm2051_vm0 = vcmask 1047556   ;;  %s3279_s27 = smov 96   ;;  %vm2053_vm1 = vcmask 261120   ;;  %s3281_s23 = smov 32   ;;  %vm2198_vm2 = vcmask 1048320   ;;  %vm2373_vm3 = vcmask 785920   ;;  %s3619_s0 = inlined_call_operand.vmem [shape: bf16[1,8,16,4,32], index: 0, kind: input, shape index: {}]   ;;  %s3620_s1 = inlined_call_operand.vmem [shape: bf16[128,128], index: 1, kind: output, shape index: {}]  }
   0x1   :  { %v3055_v0 = vld [vmem:[%s3619_s0 + $0x4e] sm:$0xff]   ;;  %v3056_v1 = vld [vmem:[%s3619_s0 + $0x46] sm:$0xff]   ;;  %v3062_v6 = vld [vmem:[%s3619_s0 + $0x40] sm:$0x3]  ;;  %vm2548_vm4 = vcmask 523520  }
   0x2   :  { %v3301_v2 = vld [vmem:[%s3619_s0 + $0x26] ss:$28 sps:$4 sm:$0xff]   ;;  %v1425_v3 = vunpack.c.l.bf16 %v3055_v0  ;;  %v1441_v4 = vunpack.c.h.bf16 %v3056_v1  ;;  %v1473_v5 = vunpack.c.l.bf16 %v3056_v1  ;;  %v3087_v7 = vld [vmem:[%s3619_s0 + $0xe] sm:$0xff]   ;;  %v1537_v10 = vunpack.c.l.bf16 %v3062_v6  ;;  %v2045_v12 = vld [vmem:[%s3619_s0] sm:$0x3] }
   0x3   :  { %v3088_v8 = vld [vmem:[%s3619_s0 + $0x6] sm:$0xff]   ;;  %v1505_v9 = vunpack.c.h.bf16 %v3301_v2  ;;  %v3324_v13 = vld [vmem:[%s3619_s0 + $0x5e] sm:$0xff]   ;;  %v1937_v14 = vunpack.c.l.bf16 %v3087_v7  ;;  %v3048_v17 = vld [vmem:[%s3619_s0 + $0x56] sm:$0xff]   ;;  %v2046_v19 = vunpack.c.l.bf16 %v2045_v12  ;;  %v1377_v25 = vunpack.c.h.bf16 %v3055_v0 }
   0x4   :  { %v3316_v11 = vld [vmem:[%s3619_s0 + $0x2] ss:$228 sps:$4 sm:$0xff]   ;;  %1428 = vst [vmem:[#allocation1 + $0x138] ss:$8 sps:$4 sm:$0xff] %v1425_v3   ;;  %1444 = vst [vmem:[#allocation1 + $0x128] ss:$8 sps:$4 sm:$0xff] %v1441_v4   ;;  %v1953_v15 = vunpack.c.h.bf16 %v3088_v8  ;;  %v1985_v16 = vunpack.c.l.bf16 %v3088_v8  ;;  %v1297_v22 = vunpack.c.l.bf16 %v3324_v13  ;;  %v1313_v23 = vunpack.c.h.bf16 %v3048_v17 }
   0x5   :  { %1476 = vst [vmem:[#allocation1 + $0x118] ss:$8 sps:$4 sm:$0xff] %v1473_v5   ;;  %1508 = vst [vmem:[#allocation1 + $0x108] ss:$8 sps:$4 sm:$0xff] %v1505_v9   ;;  %v2017_v18 = vunpack.c.l.bf16 %v3316_v11  ;;  %v3333_v20 = vld [vmem:[%s3619_s0 + $0x1e] sm:$0xff]   ;;  %v3080_v21 = vld [vmem:[%s3619_s0 + $0x16] sm:$0xff]   ;;  %v1345_v24 = vunpack.c.l.bf16 %v3048_v17  ;;  %v1889_v33 = vunpack.c.h.bf16 %v3087_v7  ;;  %v1249_v13 = vunpack.c.h.bf16 %v3324_v13 }
   0x6   :  { %1540 = vst [vmem:[#allocation1 + $0x100] sm:$0xf] %v1537_v10  ;;  %1940 = vst [vmem:[#allocation1 + $0x38] ss:$8 sps:$4 sm:$0xff] %v1937_v14   ;;  %v3342_v26 = vld [vmem:[%s3619_s0 + $0xce] sm:$0xff]   ;;  %v2992_v27 = vld [vmem:[%s3619_s0 + $0xc6] sm:$0xff]   ;;  %v1809_v28 = vunpack.c.l.bf16 %v3333_v20  ;;  %v1825_v29 = vunpack.c.h.bf16 %v3080_v21  ;;  %v1857_v30 = vunpack.c.l.bf16 %v3080_v21  ;;  %v1729_v2 = vunpack.c.l.bf16 %v3301_v2 }
   0x7   :  { %1956 = vst [vmem:[#allocation1 + $0x28] ss:$8 sps:$4 sm:$0xff] %v1953_v15   ;;  %1988 = vst [vmem:[#allocation1 + $0x18] ss:$8 sps:$4 sm:$0xff] %v1985_v16   ;;  %v3351_v31 = vld [vmem:[%s3619_s0 + $0xa6] ss:$28 sps:$4 sm:$0xff]   ;;  %v401_v36 = vunpack.c.l.bf16 %v3342_v26  ;;  %v417_v37 = vunpack.c.h.bf16 %v2992_v27  ;;  %v449_v38 = vunpack.c.l.bf16 %v2992_v27  ;;  %v353_v61 = vunpack.c.h.bf16 %v3342_v26 }
   0x8   :  { %2020 = vst [vmem:[#allocation1 + $0x8] ss:$8 sps:$4 sm:$0xff] %v2017_v18   ;;  %2048 = vst [vmem:[#allocation1] sm:$0xf] %v2046_v19  ;;  %v3359_v34 = vld [vmem:[%s3619_s0 + $0x8e] sm:$0xff]   ;;  %v3024_v35 = vld [vmem:[%s3619_s0 + $0x86] sm:$0xff]   ;;  %v481_v41 = vunpack.c.h.bf16 %v3351_v31  ;;  %v1761_v20 = vunpack.c.h.bf16 %v3333_v20  ;;  %v193_v11 = vunpack.c.h.bf16 %v3316_v11  ;;  %v705_v31 = vunpack.c.l.bf16 %v3351_v31 }
   0x9   :  { %1300 = vst [vmem:[#allocation1 + $0x178] ss:$8 sps:$4 sm:$0xff] %v1297_v22   ;;  %1316 = vst [vmem:[#allocation1 + $0x168] ss:$8 sps:$4 sm:$0xff] %v1313_v23   ;;  %v3028_v39 = vld [vmem:[%s3619_s0 + $0x7e] sm:$0xff]   ;;  %v2984_v44 = vld [vmem:[%s3619_s0 + $0xd6] sm:$0xff]   ;;  %v913_v46 = vunpack.c.l.bf16 %v3359_v34  ;;  %v929_v47 = vunpack.c.h.bf16 %v3024_v35  ;;  %v961_v48 = vunpack.c.l.bf16 %v3024_v35  ;;  %v865_v9 = vunpack.c.h.bf16 %v3359_v34 }
   0xa   :  { %1348 = vst [vmem:[#allocation1 + $0x158] ss:$8 sps:$4 sm:$0xff] %v1345_v24   ;;  %v2998_v32 = vld [vmem:[%s3619_s0 + $0x32] ss:$142 sps:$2 sm:$0xf]   ;;  %v993_v51 = vunpack.c.h.bf16 %v3028_v39  ;;  %v1025_v54 = vunpack.c.l.bf16 %v3028_v39  ;;  %v289_v56 = vunpack.c.h.bf16 %v2984_v44  ;;  %v3016_v57 = vld [vmem:[%s3619_s0 + $0x96] sm:$0xff]   ;;  %v321_v60 = vunpack.c.l.bf16 %v2984_v44 }
   0xb   :  { %1380 = vst [vmem:[#allocation1 + $0x148] ss:$8 sps:$4 sm:$0xff] %v1377_v25   ;;  %1812 = vst [vmem:[#allocation1 + $0x78] ss:$8 sps:$4 sm:$0xff] %v1809_v28   ;;  %v513_v42 = vunpack.c.l.bf16 %v2998_v32  ;;  %v3372_v43 = vld [vmem:[%s3619_s0 + $0xde] sm:$0xff]   ;;  %v3394_v1 = vld [vmem:[%s3619_s0 + $0x6e] sm:$0xff]   ;;  %v801_v6 = vunpack.c.h.bf16 %v3016_v57  ;;  %v833_v7 = vunpack.c.l.bf16 %v3016_v57 }
   0xc   :  { %1828 = vst [vmem:[#allocation1 + $0x68] ss:$8 sps:$4 sm:$0xff] %v1825_v29   ;;  %1860 = vst [vmem:[#allocation1 + $0x58] ss:$8 sps:$4 sm:$0xff] %v1857_v30   ;;  %v3382_v52 = vld [vmem:[%s3619_s0 + $0x9e] sm:$0xff]   ;;  %v273_v55 = vunpack.c.l.bf16 %v3372_v43  ;;  %v3040_v3 = vld [vmem:[%s3619_s0 + $0x66] sm:$0xff]   ;;  %v1169_v15 = vunpack.c.l.bf16 %v3394_v1 }
   0xd   :  { %v2203_v40 = vld [vmem:[#allocation1 + $0x103] ss:$8 sm:$0xf0]   ;;  %1892 = vst [vmem:[#allocation1 + $0x48] ss:$8 sps:$4 sm:$0xff] %v1889_v33   ;;  %v785_v0 = vunpack.c.l.bf16 %v3382_v52  ;;  %v1185_v16 = vunpack.c.h.bf16 %v3040_v3  ;;  %v1217_v19 = vunpack.c.l.bf16 %v3040_v3 }
   0xe   :  { %v2201_v45 = vld [vmem:[#allocation1 + $0x103] ss:$8 sm:$0xf]   ;;  %404 = vst [vmem:[#allocation1 + $0x338] ss:$8 sps:$4 sm:$0xff] %v401_v36   ;;  %v225_v36 = vunpack.c.h.bf16 %v3372_v43 }
   0xf   :  { %420 = vst [vmem:[#allocation1 + $0x328] ss:$8 sps:$4 sm:$0xff] %v417_v37   ;;  %452 = vst [vmem:[#allocation1 + $0x318] ss:$8 sps:$4 sm:$0xff] %v449_v38   ;;  %v2205_v50 = vsel %vm2051_vm0, %v2203_v40, %v2201_v45  ;;  %v3071_v10 = vld [vmem:[%s3619_s0 + $0x2a] sm:$0xff]   ;;  %v3032_v40 = vld [vmem:[%s3619_s0 + $0x76] sm:$0xff]  }
  0x10   :  { %v2193_v49 = vld [vmem:[#allocation1 + $0x3] ss:$8 sm:$0xf0]   ;;  %484 = vst [vmem:[#allocation1 + $0x308] ss:$8 sps:$4 sm:$0xff] %v481_v41   ;;  %v1681_v24 = vunpack.c.h.bf16 %v3071_v10  ;;  %v1697_v25 = vunpack.c.l.bf16 %v3071_v10 }
  0x11   :  { %516 = vst [vmem:[#allocation1 + $0xc8] ss:$568 sps:$4 sm:$0xff] %v513_v42   ;;  %v2191_v53 = vld [vmem:[#allocation1 + $0x3] ss:$8 sm:$0xf]   ;;  %v737_v42 = vunpack.c.h.bf16 %v3382_v52  ;;  %v1121_v52 = vunpack.c.h.bf16 %v3394_v1 }
  0x12   :  { %916 = vst [vmem:[#allocation1 + $0x238] ss:$8 sps:$4 sm:$0xff] %v913_v46   ;;  %932 = vst [vmem:[#allocation1 + $0x228] ss:$8 sps:$4 sm:$0xff] %v929_v47   ;;  %v2195_v58 = vsel %vm2051_vm0, %v2193_v49, %v2191_v53  ;;  %v2975_v21 = vld [vmem:[%s3619_s0 + $0xea] sm:$0xff]   ;;  %v3063_v44 = vld [vmem:[%s3619_s0 + $0x38] sm:$0xff]   ;;  %v1057_v49 = vunpack.c.h.bf16 %v3032_v40 }
  0x13   :  { %964 = vst [vmem:[#allocation1 + $0x218] ss:$8 sps:$4 sm:$0xff] %v961_v48   ;;  %v2247_v59 = vld [vmem:[#allocation1 + $0x143] ss:$8 sm:$0xf0]   ;;  %v3159_v62 = vpack.i.bf16 %v2205_v50, %v2195_v58  ;;  %v145_v27 = vunpack.c.h.bf16 %v2975_v21  ;;  %v161_v33 = vunpack.c.l.bf16 %v2975_v21  ;;  %v1089_v50 = vunpack.c.l.bf16 %v3032_v40 }
  0x14   :  { %996 = vst [vmem:[#allocation1 + $0x208] ss:$8 sps:$4 sm:$0xff] %v993_v51   ;;  %v2245_v63 = vld [vmem:[#allocation1 + $0x143] ss:$8 sm:$0xf]  }
  0x15   :  { %1028 = vst [vmem:[#allocation1 + $0x1f8] ss:$8 sps:$4 sm:$0xff] %v1025_v54   ;;  %276 = vst [vmem:[#allocation1 + $0x378] ss:$8 sps:$4 sm:$0xff] %v273_v55   ;;  %v2249_v5 = vsel %vm2051_vm0, %v2247_v59, %v2245_v63  ;;  %3160 = vrot.lane.b32.xlu0 %v3159_v62, %s3279_s27  ;;  %v3007_v28 = vld [vmem:[%s3619_s0 + $0xaa] sm:$0xff]   ;;  %v2967_v53 = vld [vmem:[%s3619_s0 + $0xf8] sm:$0xff]   ;;  %v1553_v55 = vunpack.c.h.bf16 %v3063_v44 }
  0x16   :  { %292 = vst [vmem:[#allocation1 + $0x368] ss:$8 sps:$4 sm:$0xff] %v289_v56   ;;  %v2236_v4 = vld [vmem:[#allocation1 + $0x43] ss:$8 sm:$0xf0]   ;;  %v657_v38 = vunpack.c.h.bf16 %v3007_v28  ;;  %v673_v39 = vunpack.c.l.bf16 %v3007_v28  ;;  %v1585_v56 = vunpack.c.l.bf16 %v3063_v44  ;;  %v17_v63 = vunpack.c.h.bf16 %v2967_v53 }
  0x17   :  { %324 = vst [vmem:[#allocation1 + $0x358] ss:$8 sps:$4 sm:$0xff] %v321_v60   ;;  %356 = vst [vmem:[#allocation1 + $0x348] ss:$8 sps:$4 sm:$0xff] %v353_v61   ;;  %v3067_v45 = vld [vmem:[%s3619_s0 + $0x34] sm:$0xf]  }
  0x18   :  { %v2234_v8 = vld [vmem:[#allocation1 + $0x43] ss:$8 sm:$0xf]   ;;  %788 = vst [vmem:[#allocation1 + $0x278] ss:$8 sps:$4 sm:$0xff] %v785_v0   ;;  %v1617_v59 = vunpack.c.l.bf16 %v3067_v45 }
  0x19   :  { %v2238_v12 = vsel %vm2051_vm0, %v2236_v4, %v2234_v8  ;;  %v2225_v14 = vld [vmem:[#allocation1 + $0x303] ss:$8 sm:$0xf0]   ;;  %804 = vst [vmem:[#allocation1 + $0x268] ss:$8 sps:$4 sm:$0xff] %v801_v6  }
  0x1a   :  { %836 = vst [vmem:[#allocation1 + $0x258] ss:$8 sps:$4 sm:$0xff] %v833_v7   ;;  %v3169_v17 = vpack.i.bf16 %v2249_v5, %v2238_v12  ;;  %v2223_v18 = vld [vmem:[#allocation1 + $0x303] ss:$8 sm:$0xf]   ;;  %v49_v5 = vunpack.c.l.bf16 %v2967_v53 }
  0x1b   :  { %868 = vst [vmem:[#allocation1 + $0x248] ss:$8 sps:$4 sm:$0xff] %v865_v9   ;;  %v2214_v22 = vld [vmem:[#allocation1 + $0x203] ss:$8 sm:$0xf0]   ;;  %v2227_v23 = vsel %vm2051_vm0, %v2225_v14, %v2223_v18 }
  0x1c   :  { %1172 = vst [vmem:[#allocation1 + $0x1b8] ss:$8 sps:$4 sm:$0xff] %v1169_v15   ;;  %1188 = vst [vmem:[#allocation1 + $0x1a8] ss:$8 sps:$4 sm:$0xff] %v1185_v16   ;;  %3170 = vrot.lane.b32.xlu1 %v3169_v17, %s3279_s27  ;;  %v2971_v57 = vld [vmem:[%s3619_s0 + $0xf4] sm:$0xf]  }
  0x1d   :  { %1220 = vst [vmem:[#allocation1 + $0x198] ss:$8 sps:$4 sm:$0xff] %v1217_v19   ;;  %1252 = vst [vmem:[#allocation1 + $0x188] ss:$8 sps:$4 sm:$0xff] %v1249_v13   ;;  %v2973_v60 = vld [vmem:[%s3619_s0 + $0xf2] sm:$0x3]  ;;  %v81_v6 = vunpack.c.l.bf16 %v2971_v57 }
  0x1e   :  { %v2212_v26 = vld [vmem:[#allocation1 + $0x203] ss:$8 sm:$0xf]   ;;  %1684 = vst [vmem:[#allocation1 + $0xb8] ss:$8 sps:$4 sm:$0xff] %v1681_v24   ;;  %v113_v9 = vunpack.c.l.bf16 %v2973_v60 }
  0x1f   :  { %v2216_v29 = vsel %vm2051_vm0, %v2214_v22, %v2212_v26  ;;  %v2267_v30 = vld [vmem:[#allocation1 + $0x343] ss:$8 sm:$0xf]   ;;  %1700 = vst [vmem:[#allocation1 + $0xa8] ss:$8 sps:$4 sm:$0xff] %v1697_v25  }
  0x20   :  { %v2269_v32 = vld [vmem:[#allocation1 + $0x343] ss:$8 sm:$0xf0]   ;;  %1732 = vst [vmem:[#allocation1 + $0x98] ss:$8 sps:$4 sm:$0xff] %v1729_v2   ;;  %v3164_v34 = vpack.i.bf16 %v2227_v23, %v2216_v29 }
  0x21   :  { %v2271_v35 = vsel %vm2051_vm0, %v2269_v32, %v2267_v30  ;;  %1764 = vst [vmem:[#allocation1 + $0x88] ss:$8 sps:$4 sm:$0xff] %v1761_v20   ;;  %148 = vst [vmem:[#allocation1 + $0x3b8] ss:$8 sps:$4 sm:$0xff] %v145_v27   ;;  %v2999_v0 = vld [vmem:[%s3619_s0 + $0xb8] sm:$0xff]  }
  0x22   :  { %v2258_v37 = vld [vmem:[#allocation1 + $0x243] ss:$8 sm:$0xf0]   ;;  %164 = vst [vmem:[#allocation1 + $0x3a8] ss:$8 sps:$4 sm:$0xff] %v161_v33   ;;  %3165 = vrot.lane.b32.xlu0 %v3164_v34, %s3279_s27  ;;  %v529_v14 = vunpack.c.h.bf16 %v2999_v0  ;;  %v561_v15 = vunpack.c.l.bf16 %v2999_v0 }
  0x23   :  { %196 = vst [vmem:[#allocation1 + $0x398] ss:$8 sps:$4 sm:$0xff] %v193_v11   ;;  %v2256_v41 = vld [vmem:[#allocation1 + $0x243] ss:$8 sm:$0xf]  }
  0x24   :  { %228 = vst [vmem:[#allocation1 + $0x388] ss:$8 sps:$4 sm:$0xff] %v225_v36   ;;  %v2260_v43 = vsel %vm2051_vm0, %v2258_v37, %v2256_v41  ;;  %660 = vst [vmem:[#allocation1 + $0x2b8] ss:$8 sps:$4 sm:$0xff] %v657_v38   ;;  %v3003_v1 = vld [vmem:[%s3619_s0 + $0xb4] sm:$0xf]  }
  0x25   :  { %676 = vst [vmem:[#allocation1 + $0x2a8] ss:$8 sps:$4 sm:$0xff] %v673_v39   ;;  %v3174_v46 = vpack.i.bf16 %v2271_v35, %v2260_v43  ;;  %v2289_v47 = vld [vmem:[#allocation1 + $0x183] ss:$8 sm:$0xf]   ;;  %v593_v17 = vunpack.c.l.bf16 %v3003_v1 }
  0x26   :  { %v2291_v48 = vld [vmem:[#allocation1 + $0x183] ss:$8 sm:$0xf0]   ;;  %708 = vst [vmem:[#allocation1 + $0x298] ss:$8 sps:$4 sm:$0xff] %v705_v31  }
  0x27   :  { %740 = vst [vmem:[#allocation1 + $0x288] ss:$8 sps:$4 sm:$0xff] %v737_v42   ;;  %v2293_v51 = vsel %vm2051_vm0, %v2291_v48, %v2289_v47  ;;  %3175 = vrot.lane.b32.xlu1 %v3174_v46, %s3279_s27  ;;  %v2280_v54 = vld [vmem:[#allocation1 + $0x83] ss:$8 sm:$0xf0]  }
  0x28   :  { %1060 = vst [vmem:[#allocation1 + $0x1e8] ss:$8 sps:$4 sm:$0xff] %v1057_v49   ;;  %1092 = vst [vmem:[#allocation1 + $0x1d8] ss:$8 sps:$4 sm:$0xff] %v1089_v50   ;;  %v3005_v7 = vld [vmem:[%s3619_s0 + $0xb2] sm:$0x3] }
  0x29   :  { %v2278_v58 = vld [vmem:[#allocation1 + $0x83] ss:$8 sm:$0xf]   ;;  %1124 = vst [vmem:[#allocation1 + $0x1c8] ss:$8 sps:$4 sm:$0xff] %v1121_v52   ;;  %v625_v18 = vunpack.c.l.bf16 %v3005_v7  ;;  %s3280_s0 = smov 64  }
  0x2a   :  { %v2282_v61 = vsel %vm2051_vm0, %v2280_v54, %v2278_v58  ;;  %v2313_v62 = vld [vmem:[#allocation1 + $0x383] ss:$8 sm:$0xf0]   ;;  %1556 = vst [vmem:[#allocation1 + $0xf0] ss:$8 sps:$4 sm:$0xff] %v1553_v55  }
  0x2b   :  { %1588 = vst [vmem:[#allocation1 + $0xe0] ss:$8 sps:$4 sm:$0xff] %v1585_v56   ;;  %v3179_v3 = vpack.i.bf16 %v2293_v51, %v2282_v61  ;;  %v2311_v4 = vld [vmem:[#allocation1 + $0x383] ss:$8 sm:$0xf]  }
  0x2c   :  { %1620 = vst [vmem:[#allocation1 + $0xd0] ss:$8 sps:$4 sm:$0xff] %v1617_v59   ;;  %v2315_v8 = vsel %vm2051_vm0, %v2313_v62, %v2311_v4  ;;  %20 = vst [vmem:[#allocation1 + $0x3f0] ss:$8 sps:$4 sm:$0xff] %v17_v63  }
  0x2d   :  { %3180 = vrot.lane.b32.xlu0 %v3179_v3, %s3279_s27  ;;  %v2302_v12 = vld [vmem:[#allocation1 + $0x283] ss:$8 sm:$0xf0]   ;;  %52 = vst [vmem:[#allocation1 + $0x3e0] ss:$8 sps:$4 sm:$0xff] %v49_v5  }
  0x2e   :  { %v2300_v10 = vld [vmem:[#allocation1 + $0x283] ss:$8 sm:$0xf]   ;;  %84 = vst [vmem:[#allocation1 + $0x3d0] ss:$8 sps:$4 sm:$0xff] %v81_v6  }
  0x2f   :  { %v2304_v16 = vsel %vm2051_vm0, %v2302_v12, %v2300_v10  ;;  %116 = vst [vmem:[#allocation1 + $0x3c8] sm:$0xf] %v113_v9  ;;  %v2366_v19 = vld [vmem:[#allocation1 + $0x2] ss:$8 sm:$0xf]  }
  0x30   :  { %v2368_v13 = vld [vmem:[#allocation1 + $0x2] ss:$8 sm:$0xf0]   ;;  %v3184_v21 = vpack.i.bf16 %v2315_v8, %v2304_v16  ;;  %v2335_v22 = vld [vmem:[#allocation1 + $0x1c3] ss:$8 sm:$0xf0]  }
  0x31   :  { %532 = vst [vmem:[#allocation1 + $0x2f0] ss:$8 sps:$4 sm:$0xff] %v529_v14   ;;  %564 = vst [vmem:[#allocation1 + $0x2e0] ss:$8 sps:$4 sm:$0xff] %v561_v15   ;;  %v2370_v29 = vsel %vm2051_vm0, %v2368_v13, %v2366_v19 }
  0x32   :  { %v2376_v23 = vld [vmem:[#allocation1 + $0x102] ss:$8 sm:$0xf]   ;;  %v2333_v24 = vld [vmem:[#allocation1 + $0x1c3] ss:$8 sm:$0xf]   ;;  %3185 = vrot.lane.b32.xlu1 %v3184_v21, %s3279_s27 }
  0x33   :  { %596 = vst [vmem:[#allocation1 + $0x2d0] ss:$8 sps:$4 sm:$0xff] %v593_v17   ;;  %628 = vst [vmem:[#allocation1 + $0x2c8] sm:$0xf] %v625_v18  ;;  %v2337_v26 = vsel %vm2051_vm0, %v2335_v22, %v2333_v24 }
  0x34   :  { %v2378_v25 = vld [vmem:[#allocation1 + $0x102] ss:$8 sm:$0xf0]   ;;  %v2324_v2 = vld [vmem:[#allocation1 + $0xc3] ss:$8 sm:$0xf0]  }
  0x35   :  { %v2322_v20 = vld [vmem:[#allocation1 + $0xc3] ss:$8 sm:$0xf]   ;;  %v2409_v27 = vld [vmem:[#allocation1 + $0x42] ss:$8 sm:$0xf]   ;;  %v2380_v30 = vsel %vm2051_vm0, %v2378_v25, %v2376_v23 }
  0x36   :  { %v2326_v28 = vsel %vm2051_vm0, %v2324_v2, %v2322_v20  ;;  %v2389_v32 = vld [vmem:[#allocation1 + $0x202] ss:$8 sm:$0xf0]   ;;  %v2357_v37 = vld [vmem:[#allocation1 + $0x3c3] ss:$8 sm:$0xf0]   ;;  %v3199_v42 = vpack.i.bf16 %v2380_v30, %v2370_v29 }
  0x37   :  { %v2398_v33 = vld [vmem:[#allocation1 + $0x302] ss:$8 sm:$0xf]   ;;  %v3189_v36 = vpack.i.bf16 %v2337_v26, %v2326_v28  ;;  %v2355_v39 = vld [vmem:[#allocation1 + $0x3c3] ss:$8 sm:$0xf]  }
  0x38   :  { %v2400_v11 = vld [vmem:[#allocation1 + $0x302] ss:$8 sm:$0xf0]   ;;  %v2346_v41 = vld [vmem:[#allocation1 + $0x2c3] ss:$8 sm:$0xf0]   ;;  %v2359_v31 = vsel %vm2051_vm0, %v2357_v37, %v2355_v39 }
  0x39   :  { %v2411_v34 = vld [vmem:[#allocation1 + $0x42] ss:$8 sm:$0xf0]   ;;  %3190 = vrot.lane.b32.xlu0 %v3189_v36, %s3279_s27  ;;  %v2402_v52 = vsel %vm2051_vm0, %v2400_v11, %v2398_v33  ;;  %v2541_v10 = vld [vmem:[#allocation1 + $0x1] ss:$8 sm:$0xf]  }
  0x3a   :  { %v2420_v35 = vld [vmem:[#allocation1 + $0x142] ss:$8 sm:$0xf]   ;;  %v2344_v44 = vld [vmem:[#allocation1 + $0x2c3] ss:$8 sm:$0xf]   ;;  %v2413_v45 = vsel %vm2051_vm0, %v2411_v34, %v2409_v27 }
  0x3b   :  { %v2422_v38 = vld [vmem:[#allocation1 + $0x142] ss:$8 sm:$0xf0]   ;;  %v2348_v50 = vsel %vm2051_vm0, %v2346_v41, %v2344_v44  ;;  %v2543_v12 = vld [vmem:[#allocation1 + $0x1] ss:$8 sm:$0xf0]  }
  0x3c   :  { %v2387_v40 = vld [vmem:[#allocation1 + $0x202] ss:$8 sm:$0xf]   ;;  %v2424_v46 = vsel %vm2051_vm0, %v2422_v38, %v2420_v35  ;;  %v3194_v55 = vpack.i.bf16 %v2359_v31, %v2348_v50  ;;  %v2551_v18 = vld [vmem:[#allocation1 + $0x101] ss:$8 sm:$0xf]   ;;  %v2545_v26 = vsel %vm2051_vm0, %v2543_v12, %v2541_v10 }
  0x3d   :  { %v2464_v43 = vld [vmem:[#allocation1 + $0x182] ss:$8 sm:$0xf]   ;;  %v2391_v51 = vsel %vm2051_vm0, %v2389_v32, %v2387_v40  ;;  %3200 = vrot.lane.b32.xlu0 %v3199_v42, %s3280_s0  ;;  %v3209_v58 = vpack.i.bf16 %v2424_v46, %v2413_v45  ;;  %v2553_v22 = vld [vmem:[#allocation1 + $0x101] ss:$8 sm:$0xf0]  }
  0x3e   :  { %v2431_v47 = vld [vmem:[#allocation1 + $0x242] ss:$8 sm:$0xf]   ;;  %3195 = vrot.lane.b32.xlu1 %v3194_v55, %s3279_s27  ;;  %v3204_v59 = vpack.i.bf16 %v2402_v52, %v2391_v51  ;;  %v2555_v20 = vsel %vm2051_vm0, %v2553_v22, %v2551_v18  ;;  %v2562_v27 = vld [vmem:[#allocation1 + $0x201] ss:$8 sm:$0xf]  }
  0x3f   :  { %v2433_v48 = vld [vmem:[#allocation1 + $0x242] ss:$8 sm:$0xf0]   ;;  %v2564_v28 = vld [vmem:[#allocation1 + $0x201] ss:$8 sm:$0xf0]   ;;  %v3239_v37 = vpack.i.bf16 %v2555_v20, %v2545_v26 }
  0x40   :  { %v2455_v49 = vld [vmem:[#allocation1 + $0x82] ss:$8 sm:$0xf0]   ;;  %v2435_v3 = vsel %vm2051_vm0, %v2433_v48, %v2431_v47  ;;  %v2584_v29 = vld [vmem:[#allocation1 + $0x41] ss:$8 sm:$0xf]   ;;  %v2566_v50 = vsel %vm2051_vm0, %v2564_v28, %v2562_v27 }
  0x41   :  { %v2453_v53 = vld [vmem:[#allocation1 + $0x82] ss:$8 sm:$0xf]   ;;  %3210 = vrot.lane.b32.xlu0 %v3209_v58, %s3280_s0  ;;  %v2586_v30 = vld [vmem:[#allocation1 + $0x41] ss:$8 sm:$0xf0]  }
  0x42   :  { %v2466_v54 = vld [vmem:[#allocation1 + $0x182] ss:$8 sm:$0xf0]   ;;  %v2457_v60 = vsel %vm2051_vm0, %v2455_v49, %v2453_v53  ;;  %3205 = vrot.lane.b32.xlu1 %v3204_v59, %s3280_s0  ;;  %v2595_v11 = vld [vmem:[#allocation1 + $0x141] ss:$8 sm:$0xf]  }
  0x43   :  { %v2442_v56 = vld [vmem:[#allocation1 + $0x342] ss:$8 sm:$0xf]   ;;  %v2468_v61 = vsel %vm2051_vm0, %v2466_v54, %v2464_v43  ;;  %v2597_v34 = vld [vmem:[#allocation1 + $0x141] ss:$8 sm:$0xf0]   ;;  %v2588_v43 = vsel %vm2051_vm0, %v2586_v30, %v2584_v29 }
  0x44   :  { %v2444_v57 = vld [vmem:[#allocation1 + $0x342] ss:$8 sm:$0xf0]   ;;  %v3219_v9 = vpack.i.bf16 %v2468_v61, %v2457_v60  ;;  %v2573_v35 = vld [vmem:[#allocation1 + $0x301] ss:$8 sm:$0xf]   ;;  %v2599_v44 = vsel %vm2051_vm0, %v2597_v34, %v2595_v11 }
  0x45   :  { %v2486_v62 = vld [vmem:[#allocation1 + $0x382] ss:$8 sm:$0xf]   ;;  %v2446_v4 = vsel %vm2051_vm0, %v2444_v57, %v2442_v56  ;;  %v2575_v36 = vld [vmem:[#allocation1 + $0x301] ss:$8 sm:$0xf0]   ;;  %v3249_v58 = vpack.i.bf16 %v2599_v44, %v2588_v43 }
  0x46   :  { %v2488_v63 = vld [vmem:[#allocation1 + $0x382] ss:$8 sm:$0xf0]   ;;  %v3214_v14 = vpack.i.bf16 %v2446_v4, %v2435_v3  ;;  %3220 = vrot.lane.b32.xlu0 %v3219_v9, %s3280_s0  ;;  %v2628_v38 = vld [vmem:[#allocation1 + $0x81] ss:$8 sm:$0xf]   ;;  %v2577_v51 = vsel %vm2051_vm0, %v2575_v36, %v2573_v35 }
  0x47   :  { %v2508_v0 = vld [vmem:[#allocation1 + $0x1c2] ss:$8 sm:$0xf]   ;;  %v2490_v13 = vsel %vm2051_vm0, %v2488_v63, %v2486_v62  ;;  %v2630_v39 = vld [vmem:[#allocation1 + $0x81] ss:$8 sm:$0xf0]   ;;  %v3244_v3 = vpack.i.bf16 %v2577_v51, %v2566_v50 }
  0x48   :  { %v2510_v1 = vld [vmem:[#allocation1 + $0x1c2] ss:$8 sm:$0xf0]   ;;  %3215 = vrot.lane.b32.xlu1 %v3214_v14, %s3280_s0  ;;  %v2639_v40 = vld [vmem:[#allocation1 + $0x181] ss:$8 sm:$0xf]   ;;  %v2632_v4 = vsel %vm2051_vm0, %v2630_v39, %v2628_v38 }
  0x49   :  { %v2497_v5 = vld [vmem:[#allocation1 + $0xc2] ss:$8 sm:$0xf]   ;;  %v2512_v16 = vsel %vm2051_vm0, %v2510_v1, %v2508_v0  ;;  %v2641_v41 = vld [vmem:[#allocation1 + $0x181] ss:$8 sm:$0xf0]  }
  0x4a   :  { %v2499_v6 = vld [vmem:[#allocation1 + $0xc2] ss:$8 sm:$0xf0]   ;;  %v2049_v31 = vld [vmem:[#allocation1] ss:$8 sm:$0xf]  }
  0x4b   :  { %v2475_v7 = vld [vmem:[#allocation1 + $0x282] ss:$8 sm:$0xf]   ;;  %v2501_v15 = vsel %vm2051_vm0, %v2499_v6, %v2497_v5  ;;  %v2606_v45 = vld [vmem:[#allocation1 + $0x241] ss:$8 sm:$0xf]   ;;  %v2643_v5 = vsel %vm2051_vm0, %v2641_v41, %v2639_v40 }
  0x4c   :  { %v2477_v8 = vld [vmem:[#allocation1 + $0x282] ss:$8 sm:$0xf0]   ;;  %v3229_v25 = vpack.i.bf16 %v2512_v16, %v2501_v15  ;;  %v2608_v46 = vld [vmem:[#allocation1 + $0x241] ss:$8 sm:$0xf0]  }
  0x4d   :  { %v2532_v17 = vld [vmem:[#allocation1 + $0x3c2] ss:$8 sm:$0xf0]   ;;  %v2479_v19 = vsel %vm2051_vm0, %v2477_v8, %v2475_v7  ;;  %v2617_v47 = vld [vmem:[#allocation1 + $0x341] ss:$8 sm:$0xf]   ;;  %v2610_v15 = vsel %vm2051_vm0, %v2608_v46, %v2606_v45 }
  0x4e   :  { %v2530_v21 = vld [vmem:[#allocation1 + $0x3c2] ss:$8 sm:$0xf]   ;;  %v3224_v2 = vpack.i.bf16 %v2490_v13, %v2479_v19  ;;  %3230 = vrot.lane.b32.xlu0 %v3229_v25, %s3280_s0  ;;  %v2619_v48 = vld [vmem:[#allocation1 + $0x341] ss:$8 sm:$0xf0]  }
  0x4f   :  { %v2519_v23 = vld [vmem:[#allocation1 + $0x2c2] ss:$8 sm:$0xf]   ;;  %v2534_v33 = vsel %vm2051_vm0, %v2532_v17, %v2530_v21  ;;  %v2050_v49 = vld [vmem:[#allocation1] ss:$8 sm:$0xf0]   ;;  %v2621_v16 = vsel %vm2051_vm0, %v2619_v48, %v2617_v47 }
  0x50   :  { %v2521_v24 = vld [vmem:[#allocation1 + $0x2c2] ss:$8 sm:$0xf0]   ;;  %3225 = vrot.lane.b32.xlu1 %v3224_v2, %s3280_s0  ;;  %v2052_v52 = vsel %vm2051_vm0, %v2050_v49, %v2049_v31  ;;  %v2083_v53 = vld [vmem:[#allocation1 + $0x100] ss:$8 sm:$0xf]   ;;  %v3254_v26 = vpack.i.bf16 %v2621_v16, %v2610_v15 }
  0x51   :  { %v2523_v32 = vsel %vm2051_vm0, %v2521_v24, %v2519_v23  ;;  %v2085_v54 = vld [vmem:[#allocation1 + $0x100] ss:$8 sm:$0xf0]   ;;  %2054 = vst.msk [vmem:[#allocation0] sm:$0xff] %vm2053_vm1, %v2052_v52   ;;  %v3259_v23 = vpack.i.bf16 %v2643_v5, %v2632_v4 }
  0x52   :  { %v3234_v42 = vpack.i.bf16 %v2534_v33, %v2523_v32  ;;  %v2087_v55 = vsel %vm2051_vm0, %v2085_v54, %v2083_v53  ;;  %v2056_v56 = vld [vmem:[#allocation1 + $0x40] ss:$8 sm:$0xf]   ;;  %3240 = vrot.lane.b32.xlu0 %v3239_v37, %s3281_s23  ;;  %v2672_v59 = vld [vmem:[#allocation1 + $0xc1] ss:$8 sm:$0xf]  }
  0x53   :  { %v2058_v57 = vld [vmem:[#allocation1 + $0x40] ss:$8 sm:$0xf0]   ;;  %v2674_v60 = vld [vmem:[#allocation1 + $0xc1] ss:$8 sm:$0xf0]  }
  0x54   :  { %v2683_v61 = vld [vmem:[#allocation1 + $0x1c1] ss:$8 sm:$0xf]   ;;  %2090 = vst.msk [vmem:[#allocation0 + $0x20] sm:$0xff] %vm2053_vm1, %v2087_v55   ;;  %v2060_v63 = vsel %vm2051_vm0, %v2058_v57, %v2056_v56  ;;  %3235 = vrot.lane.b32.xlu1 %v3234_v42, %s3280_s0  ;;  %v2676_v20 = vsel %vm2051_vm0, %v2674_v60, %v2672_v59 }
  0x55   :  { %v2685_v62 = vld [vmem:[#allocation1 + $0x1c1] ss:$8 sm:$0xf0]   ;;  %v2092_v0 = vld [vmem:[#allocation1 + $0x140] ss:$8 sm:$0xf]  }
  0x56   :  { %v2094_v1 = vld [vmem:[#allocation1 + $0x140] ss:$8 sm:$0xf0]   ;;  %v2650_v6 = vld [vmem:[#allocation1 + $0x281] ss:$8 sm:$0xf]   ;;  %3250 = vrot.lane.b32.xlu0 %v3249_v58, %s3281_s23  ;;  %v2687_v27 = vsel %vm2051_vm0, %v2685_v62, %v2683_v61 }
  0x57   :  { %v2652_v7 = vld [vmem:[#allocation1 + $0x281] ss:$8 sm:$0xf0]   ;;  %2063 = vst.msk [vmem:[#allocation0 + $0x8] sm:$0xff] %vm2053_vm1, %v2060_v63   ;;  %v2096_v10 = vsel %vm2051_vm0, %v2094_v1, %v2092_v0  ;;  %v3269_v42 = vpack.i.bf16 %v2687_v27, %v2676_v20 }
  0x58   :  { %v2661_v8 = vld [vmem:[#allocation1 + $0x381] ss:$8 sm:$0xf]   ;;  %v2119_v12 = vld [vmem:[#allocation1 + $0x200] ss:$8 sm:$0xf]   ;;  %3245 = vrot.lane.b32.xlu1 %v3244_v3, %s3281_s23  ;;  %v2654_v35 = vsel %vm2051_vm0, %v2652_v7, %v2650_v6 }
  0x59   :  { %v2663_v9 = vld [vmem:[#allocation1 + $0x381] ss:$8 sm:$0xf0]   ;;  %v2121_v14 = vld [vmem:[#allocation1 + $0x200] ss:$8 sm:$0xf0]  }
  0x5a   :  { %2099 = vst.msk [vmem:[#allocation0 + $0x28] sm:$0xff] %vm2053_vm1, %v2096_v10   ;;  %v2123_v17 = vsel %vm2051_vm0, %v2121_v14, %v2119_v12  ;;  %v2155_v18 = vld [vmem:[#allocation1 + $0x300] ss:$8 sm:$0xf]   ;;  %v2665_v36 = vsel %vm2051_vm0, %v2663_v9, %v2661_v8  ;;  %3260 = vrot.lane.b32.xlu0 %v3259_v23, %s3281_s23 }
  0x5b   :  { %v2157_v19 = vld [vmem:[#allocation1 + $0x300] ss:$8 sm:$0xf0]   ;;  %2126 = vst.msk [vmem:[#allocation0 + $0x40] sm:$0xff] %vm2053_vm1, %v2123_v17   ;;  %v3264_v46 = vpack.i.bf16 %v2665_v36, %v2654_v35 }
  0x5c   :  { %v2159_v13 = vsel %vm2051_vm0, %v2157_v19, %v2155_v18  ;;  %v2128_v21 = vld [vmem:[#allocation1 + $0x240] ss:$8 sm:$0xf]   ;;  %v2694_v28 = vld [vmem:[#allocation1 + $0x2c1] ss:$8 sm:$0xf]   ;;  %3255 = vrot.lane.b32.xlu1 %v3254_v26, %s3281_s23 }
  0x5d   :  { %v2130_v22 = vld [vmem:[#allocation1 + $0x240] ss:$8 sm:$0xf0]   ;;  %2162 = vst.msk [vmem:[#allocation0 + $0x60] sm:$0xff] %vm2053_vm1, %v2159_v13  }
  0x5e   :  { %v2132_v24 = vsel %vm2051_vm0, %v2130_v22, %v2128_v21  ;;  %v2164_v25 = vld [vmem:[#allocation1 + $0x340] ss:$8 sm:$0xf]   ;;  %v2696_v29 = vld [vmem:[#allocation1 + $0x2c1] ss:$8 sm:$0xf0]   ;;  %3270 = vrot.lane.b32.xlu0 %v3269_v42, %s3281_s23 }
  0x5f   :  { %v2166_v2 = vld [vmem:[#allocation1 + $0x340] ss:$8 sm:$0xf0]   ;;  %v2705_v30 = vld [vmem:[#allocation1 + $0x3c1] ss:$8 sm:$0xf]   ;;  %v2698_v50 = vsel %vm2051_vm0, %v2696_v29, %v2694_v28 }
  0x60   :  { %v2707_v32 = vld [vmem:[#allocation1 + $0x3c1] ss:$8 sm:$0xf0]   ;;  %2135 = vst.msk [vmem:[#allocation0 + $0x48] sm:$0xff] %vm2053_vm1, %v2132_v24   ;;  %v2168_v33 = vsel %vm2051_vm0, %v2166_v2, %v2164_v25  ;;  %3265 = vrot.lane.b32.xlu1 %v3264_v46, %s3281_s23 }
  0x61   :  { %v2065_v11 = vld [vmem:[#allocation1 + $0x80] ss:$8 sm:$0xf]   ;;  %2171 = vst.msk [vmem:[#allocation0 + $0x68] sm:$0xff] %vm2053_vm1, %v2168_v33   ;;  %v2709_v51 = vsel %vm2051_vm0, %v2707_v32, %v2705_v30 }
  0x62   :  { %v2067_v34 = vld [vmem:[#allocation1 + $0x80] ss:$8 sm:$0xf0]   ;;  %v3274_v61 = vpack.i.bf16 %v2709_v51, %v2698_v50 }
  0x63   :  { %v2069_v37 = vsel %vm2051_vm0, %v2067_v34, %v2065_v11  ;;  %v2101_v38 = vld [vmem:[#allocation1 + $0x180] ss:$8 sm:$0xf]  }
  0x64   :  { %v2103_v39 = vld [vmem:[#allocation1 + $0x180] ss:$8 sm:$0xf0]   ;;  %2072 = vst.msk [vmem:[#allocation0 + $0x10] sm:$0xff] %vm2053_vm1, %v2069_v37   ;;  %3275 = vrot.lane.b32.xlu1 %v3274_v61, %s3281_s23 }
  0x65   :  { %v2105_v40 = vsel %vm2051_vm0, %v2103_v39, %v2101_v38  ;;  %v2137_v41 = vld [vmem:[#allocation1 + $0x280] ss:$8 sm:$0xf]  }
  0x66   :  { %v2139_v31 = vld [vmem:[#allocation1 + $0x280] ss:$8 sm:$0xf0]   ;;  %2108 = vst.msk [vmem:[#allocation0 + $0x30] sm:$0xff] %vm2053_vm1, %v2105_v40  }
  0x67   :  { %v2141_v43 = vsel %vm2051_vm0, %v2139_v31, %v2137_v41  ;;  %v2173_v44 = vld [vmem:[#allocation1 + $0x380] ss:$8 sm:$0xf]  }
  0x68   :  { %v2175_v45 = vld [vmem:[#allocation1 + $0x380] ss:$8 sm:$0xf0]   ;;  %2144 = vst.msk [vmem:[#allocation0 + $0x50] sm:$0xff] %vm2053_vm1, %v2141_v43  }
  0x69   :  { %v2177_v47 = vsel %vm2051_vm0, %v2175_v45, %v2173_v44  ;;  %v2074_v48 = vld [vmem:[#allocation1 + $0xc0] ss:$8 sm:$0xf]  }
  0x6a   :  { %v2076_v49 = vld [vmem:[#allocation1 + $0xc0] ss:$8 sm:$0xf0]   ;;  %2180 = vst.msk [vmem:[#allocation0 + $0x70] sm:$0xff] %vm2053_vm1, %v2177_v47  }
  0x6b   :  { %v2078_v52 = vsel %vm2051_vm0, %v2076_v49, %v2074_v48  ;;  %v2110_v53 = vld [vmem:[#allocation1 + $0x1c0] ss:$8 sm:$0xf]  }
  0x6c   :  { %v2112_v54 = vld [vmem:[#allocation1 + $0x1c0] ss:$8 sm:$0xf0]   ;;  %2081 = vst.msk [vmem:[#allocation0 + $0x18] sm:$0xff] %vm2053_vm1, %v2078_v52  }
  0x6d   :  { %v2114_v55 = vsel %vm2051_vm0, %v2112_v54, %v2110_v53  ;;  %v2146_v56 = vld [vmem:[#allocation1 + $0x2c0] ss:$8 sm:$0xf]  }
  0x6e   :  { %v2148_v57 = vld [vmem:[#allocation1 + $0x2c0] ss:$8 sm:$0xf0]   ;;  %2117 = vst.msk [vmem:[#allocation0 + $0x38] sm:$0xff] %vm2053_vm1, %v2114_v55  }
  0x6f   :  { %v2150_v58 = vsel %vm2051_vm0, %v2148_v57, %v2146_v56  ;;  %v2182_v59 = vld [vmem:[#allocation1 + $0x3c0] ss:$8 sm:$0xf]  }
  0x70   :  { %v2184_v60 = vld [vmem:[#allocation1 + $0x3c0] ss:$8 sm:$0xf0]   ;;  %2153 = vst.msk [vmem:[#allocation0 + $0x58] sm:$0xff] %vm2053_vm1, %v2150_v58  }
  0x71   :  { %v2186_v62 = vsel %vm2051_vm0, %v2184_v60, %v2182_v59 }
  0x72   :  { %2189 = vst.msk [vmem:[#allocation0 + $0x78] sm:$0xff] %vm2053_vm1, %v2186_v62  }
  0x87   :  { %v3161_v63 = vpop.permute.xlu0 %3160 }
  0x88   :  { %v3163_v0 = vunpack.i.h.bf16 %v3161_v63  ;;  %v3162_v1 = vunpack.i.l.bf16 %v3161_v63 }
  0x8a   :  { %2199 = vst.msk [vmem:[#allocation0] sm:$0xff] %vm2198_vm2, %v3162_v1   ;;  %2210 = vst.msk [vmem:[#allocation0 + $0x20] sm:$0xff] %vm2198_vm2, %v3163_v0  }
  0x8e   :  { %v3171_v3 = vpop.permute.xlu1 %3170 }
  0x8f   :  { %v3173_v4 = vunpack.i.h.bf16 %v3171_v3  ;;  %v3172_v5 = vunpack.i.l.bf16 %v3171_v3 }
  0x91   :  { %2243 = vst.msk [vmem:[#allocation0 + $0x8] sm:$0xff] %vm2198_vm2, %v3172_v5   ;;  %2254 = vst.msk [vmem:[#allocation0 + $0x28] sm:$0xff] %vm2198_vm2, %v3173_v4  }
  0x94   :  { %v3166_v6 = vpop.permute.xlu0 %3165 }
  0x95   :  { %v3168_v7 = vunpack.i.h.bf16 %v3166_v6  ;;  %v3167_v8 = vunpack.i.l.bf16 %v3166_v6 }
  0x97   :  { %2221 = vst.msk [vmem:[#allocation0 + $0x40] sm:$0xff] %vm2198_vm2, %v3167_v8   ;;  %2232 = vst.msk [vmem:[#allocation0 + $0x60] sm:$0xff] %vm2198_vm2, %v3168_v7  }
  0x99   :  { %v3176_v9 = vpop.permute.xlu1 %3175 }
  0x9a   :  { %v3178_v10 = vunpack.i.h.bf16 %v3176_v9  ;;  %v3177_v12 = vunpack.i.l.bf16 %v3176_v9 }
  0x9c   :  { %2265 = vst.msk [vmem:[#allocation0 + $0x48] sm:$0xff] %vm2198_vm2, %v3177_v12   ;;  %2276 = vst.msk [vmem:[#allocation0 + $0x68] sm:$0xff] %vm2198_vm2, %v3178_v10  }
  0x9f   :  { %v3181_v14 = vpop.permute.xlu0 %3180 }
  0xa0   :  { %v3183_v15 = vunpack.i.h.bf16 %v3181_v14  ;;  %v3182_v16 = vunpack.i.l.bf16 %v3181_v14 }
  0xa2   :  { %2298 = vst.msk [vmem:[#allocation0 + $0x30] sm:$0xff] %vm2198_vm2, %v3183_v15   ;;  %2287 = vst.msk [vmem:[#allocation0 + $0x10] sm:$0xff] %vm2198_vm2, %v3182_v16  }
  0xa4   :  { %v3186_v17 = vpop.permute.xlu1 %3185 }
  0xa5   :  { %v3188_v18 = vunpack.i.h.bf16 %v3186_v17  ;;  %v3187_v19 = vunpack.i.l.bf16 %v3186_v17 }
  0xa7   :  { %2309 = vst.msk [vmem:[#allocation0 + $0x50] sm:$0xff] %vm2198_vm2, %v3187_v19   ;;  %2320 = vst.msk [vmem:[#allocation0 + $0x70] sm:$0xff] %vm2198_vm2, %v3188_v18  }
  0xab   :  { %v3191_v13 = vpop.permute.xlu0 %3190 }
  0xac   :  { %v3193_v21 = vunpack.i.h.bf16 %v3191_v13  ;;  %v3192_v22 = vunpack.i.l.bf16 %v3191_v13 }
  0xae   :  { %2342 = vst.msk [vmem:[#allocation0 + $0x38] sm:$0xff] %vm2198_vm2, %v3193_v21   ;;  %2331 = vst.msk [vmem:[#allocation0 + $0x18] sm:$0xff] %vm2198_vm2, %v3192_v22  }
  0xaf   :  { %v3201_v23 = vpop.permute.xlu0 %3200 }
  0xb0   :  { %v3196_v24 = vpop.permute.xlu1 %3195  ;;  %v3203_v25 = vunpack.i.h.bf16 %v3201_v23  ;;  %v3202_v2 = vunpack.i.l.bf16 %v3201_v23 }
  0xb1   :  { %v3198_v26 = vunpack.i.h.bf16 %v3196_v24  ;;  %v3197_v20 = vunpack.i.l.bf16 %v3196_v24 }
  0xb2   :  { %2385 = vst.msk [vmem:[#allocation0 + $0x20] sm:$0xff] %vm2373_vm3, %v3203_v25   ;;  %2374 = vst.msk [vmem:[#allocation0] sm:$0xff] %vm2373_vm3, %v3202_v2  }
  0xb3   :  { %2353 = vst.msk [vmem:[#allocation0 + $0x58] sm:$0xff] %vm2198_vm2, %v3197_v20   ;;  %2364 = vst.msk [vmem:[#allocation0 + $0x78] sm:$0xff] %vm2198_vm2, %v3198_v26   ;;  %v3211_v27 = vpop.permute.xlu0 %3210 }
  0xb4   :  { %v3206_v28 = vpop.permute.xlu1 %3205  ;;  %v3213_v29 = vunpack.i.h.bf16 %v3211_v27  ;;  %v3212_v30 = vunpack.i.l.bf16 %v3211_v27 }
  0xb5   :  { %v3208_v32 = vunpack.i.h.bf16 %v3206_v28  ;;  %v3207_v33 = vunpack.i.l.bf16 %v3206_v28 }
  0xb6   :  { %2429 = vst.msk [vmem:[#allocation0 + $0x28] sm:$0xff] %vm2373_vm3, %v3213_v29   ;;  %2418 = vst.msk [vmem:[#allocation0 + $0x8] sm:$0xff] %vm2373_vm3, %v3212_v30  }
  0xb7   :  { %2407 = vst.msk [vmem:[#allocation0 + $0x60] sm:$0xff] %vm2373_vm3, %v3208_v32   ;;  %2396 = vst.msk [vmem:[#allocation0 + $0x40] sm:$0xff] %vm2373_vm3, %v3207_v33  }
  0xb8   :  { %v3221_v11 = vpop.permute.xlu0 %3220 }
  0xb9   :  { %v3223_v35 = vunpack.i.h.bf16 %v3221_v11  ;;  %v3222_v36 = vunpack.i.l.bf16 %v3221_v11 }
  0xba   :  { %v3216_v34 = vpop.permute.xlu1 %3215 }
  0xbb   :  { %v3218_v37 = vunpack.i.h.bf16 %v3216_v34  ;;  %v3217_v38 = vunpack.i.l.bf16 %v3216_v34  ;;  %2462 = vst.msk [vmem:[#allocation0 + $0x10] sm:$0xff] %vm2373_vm3, %v3222_v36   ;;  %2473 = vst.msk [vmem:[#allocation0 + $0x30] sm:$0xff] %vm2373_vm3, %v3223_v35  }
  0xbd   :  { %2451 = vst.msk [vmem:[#allocation0 + $0x68] sm:$0xff] %vm2373_vm3, %v3218_v37   ;;  %2440 = vst.msk [vmem:[#allocation0 + $0x48] sm:$0xff] %vm2373_vm3, %v3217_v38  }
  0xc0   :  { %v3231_v39 = vpop.permute.xlu0 %3230 }
  0xc1   :  { %v3233_v41 = vunpack.i.h.bf16 %v3231_v39  ;;  %v3232_v31 = vunpack.i.l.bf16 %v3231_v39 }
  0xc2   :  { %v3226_v40 = vpop.permute.xlu1 %3225 }
  0xc3   :  { %v3228_v42 = vunpack.i.h.bf16 %v3226_v40  ;;  %v3227_v43 = vunpack.i.l.bf16 %v3226_v40  ;;  %2506 = vst.msk [vmem:[#allocation0 + $0x18] sm:$0xff] %vm2373_vm3, %v3232_v31   ;;  %2517 = vst.msk [vmem:[#allocation0 + $0x38] sm:$0xff] %vm2373_vm3, %v3233_v41  }
  0xc4   :  { %v3241_v44 = vpop.permute.xlu0 %3240 }
  0xc5   :  { %2495 = vst.msk [vmem:[#allocation0 + $0x70] sm:$0xff] %vm2373_vm3, %v3228_v42   ;;  %2484 = vst.msk [vmem:[#allocation0 + $0x50] sm:$0xff] %vm2373_vm3, %v3227_v43   ;;  %v3243_v46 = vunpack.i.h.bf16 %v3241_v44  ;;  %v3242_v47 = vunpack.i.l.bf16 %v3241_v44 }
  0xc6   :  { %v3236_v45 = vpop.permute.xlu1 %3235 }
  0xc7   :  { %v3238_v48 = vunpack.i.h.bf16 %v3236_v45  ;;  %v3237_v49 = vunpack.i.l.bf16 %v3236_v45  ;;  %2549 = vst.msk [vmem:[#allocation0] sm:$0xff] %vm2548_vm4, %v3242_v47   ;;  %2560 = vst.msk [vmem:[#allocation0 + $0x20] sm:$0xff] %vm2548_vm4, %v3243_v46  }
  0xc8   :  { %v3251_v50 = vpop.permute.xlu0 %3250 }
  0xc9   :  { %2528 = vst.msk [vmem:[#allocation0 + $0x58] sm:$0xff] %vm2373_vm3, %v3237_v49   ;;  %2539 = vst.msk [vmem:[#allocation0 + $0x78] sm:$0xff] %vm2373_vm3, %v3238_v48   ;;  %v3253_v52 = vunpack.i.h.bf16 %v3251_v50  ;;  %v3252_v53 = vunpack.i.l.bf16 %v3251_v50 }
  0xca   :  { %v3246_v51 = vpop.permute.xlu1 %3245 }
  0xcb   :  { %v3248_v54 = vunpack.i.h.bf16 %v3246_v51  ;;  %v3247_v55 = vunpack.i.l.bf16 %v3246_v51  ;;  %2593 = vst.msk [vmem:[#allocation0 + $0x8] sm:$0xff] %vm2548_vm4, %v3252_v53   ;;  %2604 = vst.msk [vmem:[#allocation0 + $0x28] sm:$0xff] %vm2548_vm4, %v3253_v52  }
  0xcc   :  { %v3261_v56 = vpop.permute.xlu0 %3260 }
  0xcd   :  { %2571 = vst.msk [vmem:[#allocation0 + $0x40] sm:$0xff] %vm2548_vm4, %v3247_v55   ;;  %2582 = vst.msk [vmem:[#allocation0 + $0x60] sm:$0xff] %vm2548_vm4, %v3248_v54   ;;  %v3263_v58 = vunpack.i.h.bf16 %v3261_v56  ;;  %v3262_v59 = vunpack.i.l.bf16 %v3261_v56 }
  0xce   :  { %v3256_v57 = vpop.permute.xlu1 %3255  ;;  %v2719_v63 = vld [vmem:[#allocation0] sm:$0xff] }
  0xcf   :  { %v3258_v60 = vunpack.i.h.bf16 %v3256_v57  ;;  %v3257_v61 = vunpack.i.l.bf16 %v3256_v57  ;;  %2637 = vst.msk [vmem:[#allocation0 + $0x10] sm:$0xff] %vm2548_vm4, %v3262_v59   ;;  %2648 = vst.msk [vmem:[#allocation0 + $0x30] sm:$0xff] %vm2548_vm4, %v3263_v58   ;;  %v2744_v4 = vld [vmem:[#allocation0 + $0x20] sm:$0xff] }
  0xd0   :  { %v3271_v62 = vpop.permute.xlu0 %3270 }
  0xd1   :  { %2615 = vst.msk [vmem:[#allocation0 + $0x48] sm:$0xff] %vm2548_vm4, %v3257_v61   ;;  %2626 = vst.msk [vmem:[#allocation0 + $0x68] sm:$0xff] %vm2548_vm4, %v3258_v60   ;;  %v3273_v1 = vunpack.i.h.bf16 %v3271_v62  ;;  %v3272_v3 = vunpack.i.l.bf16 %v3271_v62 }
  0xd2   :  { %v3266_v0 = vpop.permute.xlu1 %3265  ;;  %v2724_v5 = vld [vmem:[#allocation0 + $0x8] sm:$0xff] }
  0xd3   :  { %v2751_v6 = vld [vmem:[#allocation0 + $0x28] sm:$0xff]  ;;  %v3268_v7 = vunpack.i.h.bf16 %v3266_v0  ;;  %v3267_v8 = vunpack.i.l.bf16 %v3266_v0  ;;  %v3112_v9 = vpack.c.bf16 %v2724_v5, %v2719_v63  ;;  %2681 = vst.msk [vmem:[#allocation0 + $0x18] sm:$0xff] %vm2548_vm4, %v3272_v3   ;;  %2692 = vst.msk [vmem:[#allocation0 + $0x38] sm:$0xff] %vm2548_vm4, %v3273_v1  }
  0xd4   :  { %v3122_v10 = vpack.c.bf16 %v2751_v6, %v2744_v4  ;;  %v2772_v14 = vld [vmem:[#allocation0 + $0x40] sm:$0xff] }
  0xd5   :  { %2659 = vst.msk [vmem:[#allocation0 + $0x50] sm:$0xff] %vm2548_vm4, %v3267_v8   ;;  %2670 = vst.msk [vmem:[#allocation0 + $0x70] sm:$0xff] %vm2548_vm4, %v3268_v7   ;;  %v2800_v17 = vld [vmem:[#allocation0 + $0x60] sm:$0xff] }
  0xd6   :  { %3113 = vst [vmem:[%s3620_s1] sm:$0xff] %v3112_v9   ;;  %3150 = vst [vmem:[%s3620_s1 + $0x10] sm:$0xff] %v3122_v10   ;;  %v3276_v12 = vpop.permute.xlu1 %3275  ;;  %v2730_v22 = vld [vmem:[#allocation0 + $0x10] sm:$0xff] }
  0xd7   :  { %v3278_v15 = vunpack.i.h.bf16 %v3276_v12  ;;  %v3277_v16 = vunpack.i.l.bf16 %v3276_v12  ;;  %v2758_v23 = vld [vmem:[#allocation0 + $0x30] sm:$0xff] }
  0xd8   :  { %v2779_v18 = vld [vmem:[#allocation0 + $0x48] sm:$0xff] }
  0xd9   :  { %v2807_v19 = vld [vmem:[#allocation0 + $0x68] sm:$0xff]  ;;  %v3132_v13 = vpack.c.bf16 %v2779_v18, %v2772_v14  ;;  %2703 = vst.msk [vmem:[#allocation0 + $0x58] sm:$0xff] %vm2548_vm4, %v3277_v16   ;;  %2714 = vst.msk [vmem:[#allocation0 + $0x78] sm:$0xff] %vm2548_vm4, %v3278_v15  }
  0xda   :  { %v3142_v21 = vpack.c.bf16 %v2807_v19, %v2800_v17  ;;  %v2737_v24 = vld [vmem:[#allocation0 + $0x18] sm:$0xff] }
  0xdb   :  { %3152 = vst [vmem:[%s3620_s1 + $0x20] sm:$0xff] %v3132_v13   ;;  %v2765_v25 = vld [vmem:[#allocation0 + $0x38] sm:$0xff]  ;;  %v3117_v2 = vpack.c.bf16 %v2737_v24, %v2730_v22 }
  0xdc   :  { %3154 = vst [vmem:[%s3620_s1 + $0x30] sm:$0xff] %v3142_v21   ;;  %v3127_v26 = vpack.c.bf16 %v2765_v25, %v2758_v23  ;;  %v2786_v20 = vld [vmem:[#allocation0 + $0x50] sm:$0xff] }
  0xdd   :  { %3149 = vst [vmem:[%s3620_s1 + $0x8] sm:$0xff] %v3117_v2   ;;  %v2814_v27 = vld [vmem:[#allocation0 + $0x70] sm:$0xff] }
  0xde   :  { %3151 = vst [vmem:[%s3620_s1 + $0x18] sm:$0xff] %v3127_v26  }
  0xe0   :  { %v2793_v28 = vld [vmem:[#allocation0 + $0x58] sm:$0xff] }
  0xe1   :  { %v2821_v29 = vld [vmem:[#allocation0 + $0x78] sm:$0xff]  ;;  %v3137_v30 = vpack.c.bf16 %v2793_v28, %v2786_v20 }
  0xe2   :  { %v3147_v32 = vpack.c.bf16 %v2821_v29, %v2814_v27 }
  0xe3   :  { %3153 = vst [vmem:[%s3620_s1 + $0x28] sm:$0xff] %v3137_v30  }
  0xe4   :  { %3155 = vst [vmem:[%s3620_s1 + $0x38] sm:$0xff] %v3147_v32  }

// kernel: tile.23
= control target key start
LH: loop header
LB: loop body
LE: loop exit
PB: predicated region body
PF: predicated region fallthrough
CT: control target
= control target key end

     0   :  { %s22_s0 = inlined_call_operand.vmem [shape: f32[16], index: 0, kind: input, shape index: {}]   ;;  %s23_s1 = inlined_call_operand.vmem [shape: f32[8,16], index: 1, kind: output, shape index: {}]  }
   0x1   :  { %v4_v0 = vld [vmem:[%s22_s0] ss:$0 sm:$0xff] }
   0x2   :  { %5 = vst [vmem:[%s23_s1] sm:$0xff] %v4_v0 }

// kernel: tile.24
= control target key start
LH: loop header
LB: loop body
LE: loop exit
PB: predicated region body
PF: predicated region fallthrough
CT: control target
= control target key end

     0   :  { %s67_s10 = smov 112   ;;  %s68_s11 = smov 80   ;;  %vm3_vm0 = vcmask 130048   ;;  %vm9_vm1 = vcmask 1048448   ;;  %vm15_vm2 = vcmask 917248   ;;  %vm21_vm3 = vcmask 786048   ;;  %s111_s0 = inlined_call_operand.vmem [shape: f32[8,16], index: 0, kind: input, shape index: {}]   ;;  %s112_s1 = inlined_call_operand.vmem [shape: f32[1,128], index: 1, kind: output, shape index: {}]  }
   0x1   :  { %v53_v0 = vld [vmem:[%s111_s0 + $0x7] sm:$0x1]   ;;  %v55_v1 = vld [vmem:[%s111_s0 + $0x5] sm:$0x1]   ;;  %v54_v2 = vld [vmem:[%s111_s0 + $0x6] sm:$0x1]  }
   0x2   :  { %7 = vrot.lane.b32.xlu0 %v53_v0, %s67_s10  ;;  %19 = vrot.lane.b32.xlu1 %v55_v1, %s68_s11  ;;  %v56_v3 = vld [vmem:[%s111_s0 + $0x4] sm:$0x1]   ;;  %v2_v4 = vld [vmem:[%s111_s0] sm:$0x1]   ;;  %s69_s18 = smov 96   ;;  %s70_s19 = smov 64  }
   0x3   :  { %4 = vst.msk [vmem:[#allocation0] sm:$0x1] %vm3_vm0, %v2_v4   ;;  %v57_v5 = vld [vmem:[%s111_s0 + $0x3] sm:$0x1]   ;;  %v58_v6 = vld [vmem:[%s111_s0 + $0x2] sm:$0x1]  }
   0x4   :  { %s71_s24 = smov 48   ;;  %s72_s25 = smov 32   ;;  %v59_v7 = vld [vmem:[%s111_s0 + $0x1] sm:$0x1]   ;;  %vm27_vm4 = vcmask 654848   ;;  %vm33_vm5 = vcmask 523648  }
   0x5   :  { %s73_s0 = smov 16   ;;  %vm39_vm6 = vcmask 392448   ;;  %vm45_vm7 = vcmask 261248  }
   0x6   :  { %13 = vrot.lane.b32.xlu0 %v54_v2, %s69_s18  ;;  %25 = vrot.lane.b32.xlu1 %v56_v3, %s70_s19 }
   0xa   :  { %31 = vrot.lane.b32.xlu0 %v57_v5, %s71_s24  ;;  %37 = vrot.lane.b32.xlu1 %v58_v6, %s72_s25 }
   0xe   :  { %43 = vrot.lane.b32.xlu0 %v59_v7, %s73_s0 }
  0x74   :  { %v8_v8 = vpop.permute.xlu0 %7   ;;  %v20_v9 = vpop.permute.xlu1 %19  }
  0x75   :  { %10 = vst.msk [vmem:[#allocation0] sm:$0x1] %vm9_vm1, %v8_v8  }
  0x78   :  { %v14_v10 = vpop.permute.xlu0 %13   ;;  %v26_v11 = vpop.permute.xlu1 %25  }
  0x79   :  { %16 = vst.msk [vmem:[#allocation0] sm:$0x1] %vm15_vm2, %v14_v10  }
  0x7a   :  { %22 = vst.msk [vmem:[#allocation0] sm:$0x1] %vm21_vm3, %v20_v9  }
  0x7b   :  { %28 = vst.msk [vmem:[#allocation0] sm:$0x1] %vm27_vm4, %v26_v11  }
  0x7c   :  { %v32_v12 = vpop.permute.xlu0 %31   ;;  %v38_v13 = vpop.permute.xlu1 %37  }
  0x7d   :  { %34 = vst.msk [vmem:[#allocation0] sm:$0x1] %vm33_vm5, %v32_v12  }
  0x7e   :  { %40 = vst.msk [vmem:[#allocation0] sm:$0x1] %vm39_vm6, %v38_v13  }
  0x80   :  { %v44_v14 = vpop.permute.xlu0 %43  }
  0x81   :  { %46 = vst.msk [vmem:[#allocation0] sm:$0x1] %vm45_vm7, %v44_v14  }
  0x88   :  { %v50_v15 = vld [vmem:[#allocation0] sm:$0x1] }
  0x89   :  { %52 = vst [vmem:[%s112_s1] sm:$0x1] %v50_v15 }

// kernel: tile.28
= control target key start
LH: loop header
LB: loop body
LE: loop exit
PB: predicated region body
PF: predicated region fallthrough
CT: control target
= control target key end

     0   :  { %s22_s0 = inlined_call_operand.vmem [shape: f32[32], index: 0, kind: input, shape index: {}]   ;;  %s23_s1 = inlined_call_operand.vmem [shape: f32[4,32], index: 1, kind: output, shape index: {}]  }
   0x1   :  { %v4_v0 = vld [vmem:[%s22_s0] ss:$0 sm:$0xff] }
   0x2   :  { %5 = vst [vmem:[%s23_s1] sm:$0xf] %v4_v0 }

// kernel: tile.29
= control target key start
LH: loop header
LB: loop body
LE: loop exit
PB: predicated region body
PF: predicated region fallthrough
CT: control target
= control target key end

     0   :  { %vm7_vm0 = vcmask 261120   ;;  %s37_s8 = smov 32   ;;  %s38_s9 = smov 64   ;;  %vm13_vm1 = vcmask 1048320   ;;  %vm19_vm2 = vcmask 785920   ;;  %vm25_vm3 = vcmask 523520   ;;  %s55_s0 = inlined_call_operand.vmem [shape: f32[4,32], index: 0, kind: input, shape index: {}]   ;;  %s56_s1 = inlined_call_operand.vmem [shape: f32[1,128], index: 1, kind: output, shape index: {}]  }
   0x1   :  { %v4_v0 = vld [vmem:[%s55_s0] sm:$0xf]  ;;  %s36_s0 = smov 96  }
   0x2   :  { %5 = vst [vmem:[#allocation1] sm:$0xf] %v4_v0 }
   0x9   :  { %v10_v1 = vld [vmem:[#allocation1 + $0x3] sm:$0x1]   ;;  %v22_v2 = vld [vmem:[#allocation1 + $0x1] sm:$0x1]   ;;  %v6_v3 = vld [vmem:[#allocation1] sm:$0x1]  }
   0xa   :  { %11 = vrot.lane.b32.xlu0 %v10_v1, %s36_s0  ;;  %23 = vrot.lane.b32.xlu1 %v22_v2, %s37_s8  ;;  %v16_v4 = vld [vmem:[#allocation1 + $0x2] sm:$0x1]   ;;  %8 = vst.msk [vmem:[#allocation0] sm:$0x1] %vm7_vm0, %v6_v3  }
   0xe   :  { %17 = vrot.lane.b32.xlu0 %v16_v4, %s38_s9 }
  0x7c   :  { %v12_v5 = vpop.permute.xlu0 %11   ;;  %v24_v6 = vpop.permute.xlu1 %23  }
  0x7d   :  { %14 = vst.msk [vmem:[#allocation0] sm:$0x1] %vm13_vm1, %v12_v5  }
  0x80   :  { %v18_v7 = vpop.permute.xlu0 %17  }
  0x81   :  { %20 = vst.msk [vmem:[#allocation0] sm:$0x1] %vm19_vm2, %v18_v7  }
  0x82   :  { %26 = vst.msk [vmem:[#allocation0] sm:$0x1] %vm25_vm3, %v24_v6  }
  0x89   :  { %v30_v8 = vld [vmem:[#allocation0] sm:$0x1] }
  0x8a   :  { %32 = vst [vmem:[%s56_s1] sm:$0x1] %v30_v8 }

// kernel: squeeze.2
= control target key start
LH: loop header
LB: loop body
LE: loop exit
PB: predicated region body
PF: predicated region fallthrough
CT: control target
= control target key end

     0   :  { %vm2051_vm0 = vcmask 1047556   ;;  %s2847_s7 = smov 64   ;;  %vm2053_vm1 = vcmask 523264   ;;  %vm2198_vm2 = vcmask 1048064   ;;  %s3338_s0 = inlined_call_operand.vmem [shape: bf16[1,4,32,2,64], index: 0, kind: input, shape index: {}]   ;;  %s3339_s1 = inlined_call_operand.vmem [shape: bf16[128,128], index: 1, kind: output, shape index: {}]  }
   0x1   :  { %v2705_v0 = vld [vmem:[%s3338_s0 + $0x27] sm:$0x1]  ;;  %v2706_v1 = vld [vmem:[%s3338_s0 + $0x26] sm:$0x1]  ;;  %v2707_v2 = vld [vmem:[%s3338_s0 + $0x25] sm:$0x1] }
   0x2   :  { %v1425_v3 = vunpack.c.l.bf16 %v2705_v0  ;;  %v1441_v4 = vunpack.c.l.bf16 %v2706_v1  ;;  %v1457_v5 = vunpack.c.l.bf16 %v2707_v2  ;;  %v2708_v6 = vld [vmem:[%s3338_s0 + $0x24] sm:$0x1]  ;;  %v2709_v7 = vld [vmem:[%s3338_s0 + $0x23] sm:$0x1]  ;;  %v2710_v8 = vld [vmem:[%s3338_s0 + $0x22] sm:$0x1] }
   0x3   :  { %v1473_v9 = vunpack.c.l.bf16 %v2708_v6  ;;  %v1489_v10 = vunpack.c.l.bf16 %v2709_v7  ;;  %v1505_v11 = vunpack.c.l.bf16 %v2710_v8  ;;  %v2711_v12 = vld [vmem:[%s3338_s0 + $0x21] sm:$0x1]  ;;  %v2712_v13 = vld [vmem:[%s3338_s0 + $0x20] sm:$0x1]  ;;  %v2737_v14 = vld [vmem:[%s3338_s0 + $0x7] sm:$0x1] }
   0x4   :  { %1428 = vst [vmem:[#allocation1 + $0x138] sm:$0x3] %v1425_v3  ;;  %1444 = vst [vmem:[#allocation1 + $0x130] sm:$0x3] %v1441_v4  ;;  %v1521_v15 = vunpack.c.l.bf16 %v2711_v12  ;;  %v1537_v16 = vunpack.c.l.bf16 %v2712_v13  ;;  %v1937_v17 = vunpack.c.l.bf16 %v2737_v14  ;;  %v2738_v18 = vld [vmem:[%s3338_s0 + $0x6] sm:$0x1] }
   0x5   :  { %1460 = vst [vmem:[#allocation1 + $0x128] sm:$0x3] %v1457_v5  ;;  %v2739_v19 = vld [vmem:[%s3338_s0 + $0x5] sm:$0x1]  ;;  %v2740_v20 = vld [vmem:[%s3338_s0 + $0x4] sm:$0x1]  ;;  %v1953_v21 = vunpack.c.l.bf16 %v2738_v18 }
   0x6   :  { %1476 = vst [vmem:[#allocation1 + $0x120] sm:$0x3] %v1473_v9  ;;  %1492 = vst [vmem:[#allocation1 + $0x118] sm:$0x3] %v1489_v10  ;;  %v1969_v22 = vunpack.c.l.bf16 %v2739_v19  ;;  %v1985_v23 = vunpack.c.l.bf16 %v2740_v20  ;;  %v2741_v24 = vld [vmem:[%s3338_s0 + $0x3] sm:$0x1] }
   0x7   :  { %1508 = vst [vmem:[#allocation1 + $0x110] sm:$0x3] %v1505_v11  ;;  %v2742_v25 = vld [vmem:[%s3338_s0 + $0x2] sm:$0x1]  ;;  %v2743_v26 = vld [vmem:[%s3338_s0 + $0x1] sm:$0x1]  ;;  %v2001_v27 = vunpack.c.l.bf16 %v2741_v24 }
   0x8   :  { %1524 = vst [vmem:[#allocation1 + $0x108] sm:$0x3] %v1521_v15  ;;  %1540 = vst [vmem:[#allocation1 + $0x100] sm:$0x3] %v1537_v16  ;;  %v2017_v28 = vunpack.c.l.bf16 %v2742_v25  ;;  %v2032_v29 = vunpack.c.l.bf16 %v2743_v26  ;;  %v2045_v30 = vld [vmem:[%s3338_s0] sm:$0x1] }
   0x9   :  { %1940 = vst [vmem:[#allocation1 + $0x38] sm:$0x3] %v1937_v17  ;;  %v2697_v31 = vld [vmem:[%s3338_s0 + $0x2f] sm:$0x1]  ;;  %1956 = vst [vmem:[#allocation1 + $0x30] sm:$0x3] %v1953_v21  ;;  %v2046_v32 = vunpack.c.l.bf16 %v2045_v30 }
   0xa   :  { %1972 = vst [vmem:[#allocation1 + $0x28] sm:$0x3] %v1969_v22  ;;  %1988 = vst [vmem:[#allocation1 + $0x20] sm:$0x3] %v1985_v23  ;;  %v1297_v33 = vunpack.c.l.bf16 %v2697_v31  ;;  %v2698_v34 = vld [vmem:[%s3338_s0 + $0x2e] sm:$0x1] }
   0xb   :  { %v2699_v35 = vld [vmem:[%s3338_s0 + $0x2d] sm:$0x1]  ;;  %v2700_v36 = vld [vmem:[%s3338_s0 + $0x2c] sm:$0x1]  ;;  %2004 = vst [vmem:[#allocation1 + $0x18] sm:$0x3] %v2001_v27  ;;  %v1313_v37 = vunpack.c.l.bf16 %v2698_v34 }
   0xc   :  { %2020 = vst [vmem:[#allocation1 + $0x10] sm:$0x3] %v2017_v28  ;;  %2035 = vst [vmem:[#allocation1 + $0x8] sm:$0x3] %v2032_v29  ;;  %v1329_v38 = vunpack.c.l.bf16 %v2699_v35  ;;  %v1345_v39 = vunpack.c.l.bf16 %v2700_v36  ;;  %v2701_v40 = vld [vmem:[%s3338_s0 + $0x2b] sm:$0x1] }
   0xd   :  { %v2702_v41 = vld [vmem:[%s3338_s0 + $0x2a] sm:$0x1]  ;;  %v2703_v42 = vld [vmem:[%s3338_s0 + $0x29] sm:$0x1]  ;;  %2048 = vst [vmem:[#allocation1] sm:$0x3] %v2046_v32  ;;  %v1361_v43 = vunpack.c.l.bf16 %v2701_v40 }
   0xe   :  { %1300 = vst [vmem:[#allocation1 + $0x178] sm:$0x3] %v1297_v33  ;;  %v1377_v44 = vunpack.c.l.bf16 %v2702_v41  ;;  %v1393_v45 = vunpack.c.l.bf16 %v2703_v42  ;;  %v2704_v46 = vld [vmem:[%s3338_s0 + $0x28] sm:$0x1]  ;;  %v2729_v47 = vld [vmem:[%s3338_s0 + $0xf] sm:$0x1] }
   0xf   :  { %v2730_v48 = vld [vmem:[%s3338_s0 + $0xe] sm:$0x1]  ;;  %1316 = vst [vmem:[#allocation1 + $0x170] sm:$0x3] %v1313_v37  ;;  %1332 = vst [vmem:[#allocation1 + $0x168] sm:$0x3] %v1329_v38  ;;  %v1409_v49 = vunpack.c.l.bf16 %v2704_v46  ;;  %v1809_v50 = vunpack.c.l.bf16 %v2729_v47 }
  0x10   :  { %1348 = vst [vmem:[#allocation1 + $0x160] sm:$0x3] %v1345_v39  ;;  %v1825_v51 = vunpack.c.l.bf16 %v2730_v48  ;;  %v2731_v52 = vld [vmem:[%s3338_s0 + $0xd] sm:$0x1]  ;;  %v2732_v53 = vld [vmem:[%s3338_s0 + $0xc] sm:$0x1] }
  0x11   :  { %v2733_v54 = vld [vmem:[%s3338_s0 + $0xb] sm:$0x1]  ;;  %1364 = vst [vmem:[#allocation1 + $0x158] sm:$0x3] %v1361_v43  ;;  %1380 = vst [vmem:[#allocation1 + $0x150] sm:$0x3] %v1377_v44  ;;  %v1841_v55 = vunpack.c.l.bf16 %v2731_v52  ;;  %v1857_v56 = vunpack.c.l.bf16 %v2732_v53 }
  0x12   :  { %1396 = vst [vmem:[#allocation1 + $0x148] sm:$0x3] %v1393_v45  ;;  %v1873_v57 = vunpack.c.l.bf16 %v2733_v54  ;;  %v2734_v58 = vld [vmem:[%s3338_s0 + $0xa] sm:$0x1]  ;;  %v2735_v59 = vld [vmem:[%s3338_s0 + $0x9] sm:$0x1] }
  0x13   :  { %v2736_v60 = vld [vmem:[%s3338_s0 + $0x8] sm:$0x1]  ;;  %v2203_v61 = vld [vmem:[#allocation1 + $0x101] ss:$8 sm:$0xf0]   ;;  %v1889_v62 = vunpack.c.l.bf16 %v2734_v58  ;;  %v1905_v63 = vunpack.c.l.bf16 %v2735_v59 }
  0x14   :  { %1412 = vst [vmem:[#allocation1 + $0x140] sm:$0x3] %v1409_v49  ;;  %1812 = vst [vmem:[#allocation1 + $0x78] sm:$0x3] %v1809_v50  ;;  %v1921_v0 = vunpack.c.l.bf16 %v2736_v60  ;;  %v2641_v1 = vld [vmem:[%s3338_s0 + $0x67] sm:$0x1] }
  0x15   :  { %1828 = vst [vmem:[#allocation1 + $0x70] sm:$0x3] %v1825_v51  ;;  %v2201_v2 = vld [vmem:[#allocation1 + $0x101] ss:$8 sm:$0xf]   ;;  %v401_v3 = vunpack.c.l.bf16 %v2641_v1 }
  0x16   :  { %1844 = vst [vmem:[#allocation1 + $0x68] sm:$0x3] %v1841_v55  ;;  %1860 = vst [vmem:[#allocation1 + $0x60] sm:$0x3] %v1857_v56  ;;  %v2642_v4 = vld [vmem:[%s3338_s0 + $0x66] sm:$0x1]  ;;  %v2205_v8 = vsel %vm2051_vm0, %v2203_v61, %v2201_v2 }
  0x17   :  { %1876 = vst [vmem:[#allocation1 + $0x58] sm:$0x3] %v1873_v57  ;;  %v2193_v5 = vld [vmem:[#allocation1 + $0x1] ss:$8 sm:$0xf0]   ;;  %v417_v6 = vunpack.c.l.bf16 %v2642_v4 }
  0x18   :  { %1892 = vst [vmem:[#allocation1 + $0x50] sm:$0x3] %v1889_v62  ;;  %1908 = vst [vmem:[#allocation1 + $0x48] sm:$0x3] %v1905_v63  ;;  %v2643_v7 = vld [vmem:[%s3338_s0 + $0x65] sm:$0x1] }
  0x19   :  { %1924 = vst [vmem:[#allocation1 + $0x40] sm:$0x3] %v1921_v0  ;;  %404 = vst [vmem:[#allocation1 + $0x338] sm:$0x3] %v401_v3  ;;  %v433_v9 = vunpack.c.l.bf16 %v2643_v7  ;;  %v2644_v10 = vld [vmem:[%s3338_s0 + $0x64] sm:$0x1] }
  0x1a   :  { %v2645_v11 = vld [vmem:[%s3338_s0 + $0x63] sm:$0x1]  ;;  %v2646_v12 = vld [vmem:[%s3338_s0 + $0x62] sm:$0x1]  ;;  %420 = vst [vmem:[#allocation1 + $0x330] sm:$0x3] %v417_v6  ;;  %v449_v14 = vunpack.c.l.bf16 %v2644_v10 }
  0x1b   :  { %v2191_v13 = vld [vmem:[#allocation1 + $0x1] ss:$8 sm:$0xf]   ;;  %v465_v15 = vunpack.c.l.bf16 %v2645_v11  ;;  %v481_v16 = vunpack.c.l.bf16 %v2646_v12  ;;  %436 = vst [vmem:[#allocation1 + $0x328] sm:$0x3] %v433_v9 }
  0x1c   :  { %v2647_v17 = vld [vmem:[%s3338_s0 + $0x61] sm:$0x1]  ;;  %v2195_v18 = vsel %vm2051_vm0, %v2193_v5, %v2191_v13  ;;  %v2648_v21 = vld [vmem:[%s3338_s0 + $0x60] sm:$0x1]  ;;  %452 = vst [vmem:[#allocation1 + $0x320] sm:$0x3] %v449_v14 }
  0x1d   :  { %v2247_v19 = vld [vmem:[#allocation1 + $0x141] ss:$8 sm:$0xf0]   ;;  %v497_v20 = vunpack.c.l.bf16 %v2647_v17  ;;  %v2807_v22 = vpack.i.bf16 %v2205_v8, %v2195_v18  ;;  %468 = vst [vmem:[#allocation1 + $0x318] sm:$0x3] %v465_v15  ;;  %v513_v23 = vunpack.c.l.bf16 %v2648_v21 }
  0x1e   :  { %484 = vst [vmem:[#allocation1 + $0x310] sm:$0x3] %v481_v16  ;;  %v2673_v24 = vld [vmem:[%s3338_s0 + $0x47] sm:$0x1]  ;;  %v2674_v25 = vld [vmem:[%s3338_s0 + $0x46] sm:$0x1] }
  0x1f   :  { %v2675_v26 = vld [vmem:[%s3338_s0 + $0x45] sm:$0x1]  ;;  %v2245_v27 = vld [vmem:[#allocation1 + $0x141] ss:$8 sm:$0xf]   ;;  %v913_v28 = vunpack.c.l.bf16 %v2673_v24  ;;  %v929_v29 = vunpack.c.l.bf16 %v2674_v25  ;;  %2808 = vrot.lane.b32.xlu0 %v2807_v22, %s2847_s7 }
  0x20   :  { %500 = vst [vmem:[#allocation1 + $0x308] sm:$0x3] %v497_v20  ;;  %v945_v30 = vunpack.c.l.bf16 %v2675_v26  ;;  %v2676_v31 = vld [vmem:[%s3338_s0 + $0x44] sm:$0x1]  ;;  %v2249_v33 = vsel %vm2051_vm0, %v2247_v19, %v2245_v27  ;;  %516 = vst [vmem:[#allocation1 + $0x300] sm:$0x3] %v513_v23 }
  0x21   :  { %v2236_v32 = vld [vmem:[#allocation1 + $0x41] ss:$8 sm:$0xf0]   ;;  %v961_v34 = vunpack.c.l.bf16 %v2676_v31  ;;  %v2677_v35 = vld [vmem:[%s3338_s0 + $0x43] sm:$0x1] }
  0x22   :  { %v2234_v36 = vld [vmem:[#allocation1 + $0x41] ss:$8 sm:$0xf]   ;;  %916 = vst [vmem:[#allocation1 + $0x238] sm:$0x3] %v913_v28  ;;  %v977_v37 = vunpack.c.l.bf16 %v2677_v35 }
  0x23   :  { %932 = vst [vmem:[#allocation1 + $0x230] sm:$0x3] %v929_v29  ;;  %948 = vst [vmem:[#allocation1 + $0x228] sm:$0x3] %v945_v30  ;;  %v2678_v38 = vld [vmem:[%s3338_s0 + $0x42] sm:$0x1]  ;;  %v2238_v39 = vsel %vm2051_vm0, %v2236_v32, %v2234_v36 }
  0x24   :  { %964 = vst [vmem:[#allocation1 + $0x220] sm:$0x3] %v961_v34  ;;  %v993_v40 = vunpack.c.l.bf16 %v2678_v38  ;;  %v2679_v41 = vld [vmem:[%s3338_s0 + $0x41] sm:$0x1]  ;;  %v2680_v42 = vld [vmem:[%s3338_s0 + $0x40] sm:$0x1]  ;;  %v2817_v44 = vpack.i.bf16 %v2249_v33, %v2238_v39 }
  0x25   :  { %v2633_v43 = vld [vmem:[%s3338_s0 + $0x6f] sm:$0x1]  ;;  %980 = vst [vmem:[#allocation1 + $0x218] sm:$0x3] %v977_v37  ;;  %v1009_v45 = vunpack.c.l.bf16 %v2679_v41  ;;  %v1025_v46 = vunpack.c.l.bf16 %v2680_v42  ;;  %v2634_v48 = vld [vmem:[%s3338_s0 + $0x6e] sm:$0x1] }
  0x26   :  { %v273_v47 = vunpack.c.l.bf16 %v2633_v43  ;;  %v2635_v49 = vld [vmem:[%s3338_s0 + $0x6d] sm:$0x1]  ;;  %v2636_v50 = vld [vmem:[%s3338_s0 + $0x6c] sm:$0x1]  ;;  %996 = vst [vmem:[#allocation1 + $0x210] sm:$0x3] %v993_v40  ;;  %v289_v51 = vunpack.c.l.bf16 %v2634_v48  ;;  %2818 = vrot.lane.b32.xlu1 %v2817_v44, %s2847_s7 }
  0x27   :  { %v305_v52 = vunpack.c.l.bf16 %v2635_v49  ;;  %v321_v53 = vunpack.c.l.bf16 %v2636_v50  ;;  %v2637_v54 = vld [vmem:[%s3338_s0 + $0x6b] sm:$0x1]  ;;  %v2638_v55 = vld [vmem:[%s3338_s0 + $0x6a] sm:$0x1]  ;;  %v2639_v56 = vld [vmem:[%s3338_s0 + $0x69] sm:$0x1] }
  0x28   :  { %1012 = vst [vmem:[#allocation1 + $0x208] sm:$0x3] %v1009_v45  ;;  %1028 = vst [vmem:[#allocation1 + $0x200] sm:$0x3] %v1025_v46  ;;  %v337_v57 = vunpack.c.l.bf16 %v2637_v54  ;;  %v353_v58 = vunpack.c.l.bf16 %v2638_v55  ;;  %v369_v59 = vunpack.c.l.bf16 %v2639_v56  ;;  %v2640_v60 = vld [vmem:[%s3338_s0 + $0x68] sm:$0x1] }
  0x29   :  { %276 = vst [vmem:[#allocation1 + $0x378] sm:$0x3] %v273_v47  ;;  %v2225_v61 = vld [vmem:[#allocation1 + $0x301] ss:$8 sm:$0xf0]   ;;  %v385_v62 = vunpack.c.l.bf16 %v2640_v60 }
  0x2a   :  { %292 = vst [vmem:[#allocation1 + $0x370] sm:$0x3] %v289_v51  ;;  %308 = vst [vmem:[#allocation1 + $0x368] sm:$0x3] %v305_v52  ;;  %v2665_v63 = vld [vmem:[%s3338_s0 + $0x4f] sm:$0x1] }
  0x2b   :  { %324 = vst [vmem:[#allocation1 + $0x360] sm:$0x3] %v321_v53  ;;  %v2666_v0 = vld [vmem:[%s3338_s0 + $0x4e] sm:$0x1]  ;;  %v2667_v1 = vld [vmem:[%s3338_s0 + $0x4d] sm:$0x1]  ;;  %v785_v3 = vunpack.c.l.bf16 %v2665_v63 }
  0x2c   :  { %v2223_v2 = vld [vmem:[#allocation1 + $0x301] ss:$8 sm:$0xf]   ;;  %340 = vst [vmem:[#allocation1 + $0x358] sm:$0x3] %v337_v57  ;;  %v801_v4 = vunpack.c.l.bf16 %v2666_v0  ;;  %v817_v5 = vunpack.c.l.bf16 %v2667_v1 }
  0x2d   :  { %356 = vst [vmem:[#allocation1 + $0x350] sm:$0x3] %v353_v58  ;;  %372 = vst [vmem:[#allocation1 + $0x348] sm:$0x3] %v369_v59  ;;  %v2668_v6 = vld [vmem:[%s3338_s0 + $0x4c] sm:$0x1]  ;;  %v2227_v20 = vsel %vm2051_vm0, %v2225_v61, %v2223_v2 }
  0x2e   :  { %388 = vst [vmem:[#allocation1 + $0x340] sm:$0x3] %v385_v62  ;;  %v833_v7 = vunpack.c.l.bf16 %v2668_v6  ;;  %v2669_v8 = vld [vmem:[%s3338_s0 + $0x4b] sm:$0x1]  ;;  %v2670_v9 = vld [vmem:[%s3338_s0 + $0x4a] sm:$0x1] }
  0x2f   :  { %v2671_v10 = vld [vmem:[%s3338_s0 + $0x49] sm:$0x1]  ;;  %788 = vst [vmem:[#allocation1 + $0x278] sm:$0x3] %v785_v3  ;;  %804 = vst [vmem:[#allocation1 + $0x270] sm:$0x3] %v801_v4  ;;  %v849_v12 = vunpack.c.l.bf16 %v2669_v8  ;;  %v865_v13 = vunpack.c.l.bf16 %v2670_v9 }
  0x30   :  { %v2214_v11 = vld [vmem:[#allocation1 + $0x201] ss:$8 sm:$0xf0]   ;;  %820 = vst [vmem:[#allocation1 + $0x268] sm:$0x3] %v817_v5  ;;  %v881_v14 = vunpack.c.l.bf16 %v2671_v10 }
  0x31   :  { %v2672_v15 = vld [vmem:[%s3338_s0 + $0x48] sm:$0x1]  ;;  %836 = vst [vmem:[#allocation1 + $0x260] sm:$0x3] %v833_v7  ;;  %v2689_v17 = vld [vmem:[%s3338_s0 + $0x37] sm:$0x1] }
  0x32   :  { %v897_v16 = vunpack.c.l.bf16 %v2672_v15  ;;  %v2690_v18 = vld [vmem:[%s3338_s0 + $0x36] sm:$0x1]  ;;  %v2691_v19 = vld [vmem:[%s3338_s0 + $0x35] sm:$0x1]  ;;  %852 = vst [vmem:[#allocation1 + $0x258] sm:$0x3] %v849_v12  ;;  %v1169_v21 = vunpack.c.l.bf16 %v2689_v17 }
  0x33   :  { %868 = vst [vmem:[#allocation1 + $0x250] sm:$0x3] %v865_v13  ;;  %884 = vst [vmem:[#allocation1 + $0x248] sm:$0x3] %v881_v14  ;;  %v1185_v22 = vunpack.c.l.bf16 %v2690_v18  ;;  %v1201_v23 = vunpack.c.l.bf16 %v2691_v19  ;;  %v2692_v24 = vld [vmem:[%s3338_s0 + $0x34] sm:$0x1] }
  0x34   :  { %v2693_v25 = vld [vmem:[%s3338_s0 + $0x33] sm:$0x1]  ;;  %v2694_v26 = vld [vmem:[%s3338_s0 + $0x32] sm:$0x1]  ;;  %900 = vst [vmem:[#allocation1 + $0x240] sm:$0x3] %v897_v16  ;;  %v1217_v28 = vunpack.c.l.bf16 %v2692_v24 }
  0x35   :  { %v2212_v27 = vld [vmem:[#allocation1 + $0x201] ss:$8 sm:$0xf]   ;;  %v1233_v29 = vunpack.c.l.bf16 %v2693_v25  ;;  %v1249_v30 = vunpack.c.l.bf16 %v2694_v26  ;;  %1172 = vst [vmem:[#allocation1 + $0x1b8] sm:$0x3] %v1169_v21 }
  0x36   :  { %v2695_v31 = vld [vmem:[%s3338_s0 + $0x31] sm:$0x1]  ;;  %v2216_v32 = vsel %vm2051_vm0, %v2214_v11, %v2212_v27  ;;  %1188 = vst [vmem:[#allocation1 + $0x1b0] sm:$0x3] %v1185_v22  ;;  %1204 = vst [vmem:[#allocation1 + $0x1a8] sm:$0x3] %v1201_v23 }
  0x37   :  { %v2269_v33 = vld [vmem:[#allocation1 + $0x341] ss:$8 sm:$0xf0]   ;;  %v1265_v34 = vunpack.c.l.bf16 %v2695_v31  ;;  %v2696_v35 = vld [vmem:[%s3338_s0 + $0x30] sm:$0x1]  ;;  %v2812_v36 = vpack.i.bf16 %v2227_v20, %v2216_v32 }
  0x38   :  { %1220 = vst [vmem:[#allocation1 + $0x1a0] sm:$0x3] %v1217_v28  ;;  %1236 = vst [vmem:[#allocation1 + $0x198] sm:$0x3] %v1233_v29  ;;  %v1281_v37 = vunpack.c.l.bf16 %v2696_v35  ;;  %v2721_v38 = vld [vmem:[%s3338_s0 + $0x17] sm:$0x1] }
  0x39   :  { %1252 = vst [vmem:[#allocation1 + $0x190] sm:$0x3] %v1249_v30  ;;  %v2722_v39 = vld [vmem:[%s3338_s0 + $0x16] sm:$0x1]  ;;  %v2723_v40 = vld [vmem:[%s3338_s0 + $0x15] sm:$0x1]  ;;  %v1681_v42 = vunpack.c.l.bf16 %v2721_v38  ;;  %2813 = vrot.lane.b32.xlu0 %v2812_v36, %s2847_s7 }
  0x3a   :  { %v2267_v41 = vld [vmem:[#allocation1 + $0x341] ss:$8 sm:$0xf]   ;;  %1268 = vst [vmem:[#allocation1 + $0x188] sm:$0x3] %v1265_v34  ;;  %v1697_v43 = vunpack.c.l.bf16 %v2722_v39  ;;  %v1713_v44 = vunpack.c.l.bf16 %v2723_v40 }
  0x3b   :  { %v2724_v45 = vld [vmem:[%s3338_s0 + $0x14] sm:$0x1]  ;;  %1284 = vst [vmem:[#allocation1 + $0x180] sm:$0x3] %v1281_v37  ;;  %v2725_v47 = vld [vmem:[%s3338_s0 + $0x13] sm:$0x1]  ;;  %v2271_v55 = vsel %vm2051_vm0, %v2269_v33, %v2267_v41 }
  0x3c   :  { %v1729_v46 = vunpack.c.l.bf16 %v2724_v45  ;;  %v2726_v48 = vld [vmem:[%s3338_s0 + $0x12] sm:$0x1]  ;;  %v2727_v49 = vld [vmem:[%s3338_s0 + $0x11] sm:$0x1]  ;;  %1684 = vst [vmem:[#allocation1 + $0xb8] sm:$0x3] %v1681_v42  ;;  %v1745_v51 = vunpack.c.l.bf16 %v2725_v47 }
  0x3d   :  { %v2258_v50 = vld [vmem:[#allocation1 + $0x241] ss:$8 sm:$0xf0]   ;;  %1700 = vst [vmem:[#allocation1 + $0xb0] sm:$0x3] %v1697_v43  ;;  %v1761_v52 = vunpack.c.l.bf16 %v2726_v48  ;;  %v1777_v53 = vunpack.c.l.bf16 %v2727_v49 }
  0x3e   :  { %1716 = vst [vmem:[#allocation1 + $0xa8] sm:$0x3] %v1713_v44  ;;  %v2728_v54 = vld [vmem:[%s3338_s0 + $0x10] sm:$0x1]  ;;  %1732 = vst [vmem:[#allocation1 + $0xa0] sm:$0x3] %v1729_v46 }
  0x3f   :  { %v1793_v56 = vunpack.c.l.bf16 %v2728_v54  ;;  %v2625_v57 = vld [vmem:[%s3338_s0 + $0x77] sm:$0x1]  ;;  %v2626_v58 = vld [vmem:[%s3338_s0 + $0x76] sm:$0x1]  ;;  %v2627_v59 = vld [vmem:[%s3338_s0 + $0x75] sm:$0x1] }
  0x40   :  { %v2256_v60 = vld [vmem:[#allocation1 + $0x241] ss:$8 sm:$0xf]   ;;  %1748 = vst [vmem:[#allocation1 + $0x98] sm:$0x3] %v1745_v51  ;;  %v145_v61 = vunpack.c.l.bf16 %v2625_v57  ;;  %v161_v62 = vunpack.c.l.bf16 %v2626_v58  ;;  %v177_v63 = vunpack.c.l.bf16 %v2627_v59 }
  0x41   :  { %1764 = vst [vmem:[#allocation1 + $0x90] sm:$0x3] %v1761_v52  ;;  %1780 = vst [vmem:[#allocation1 + $0x88] sm:$0x3] %v1777_v53  ;;  %v2628_v0 = vld [vmem:[%s3338_s0 + $0x74] sm:$0x1]  ;;  %v2260_v1 = vsel %vm2051_vm0, %v2258_v50, %v2256_v60 }
  0x42   :  { %1796 = vst [vmem:[#allocation1 + $0x80] sm:$0x3] %v1793_v56  ;;  %v193_v2 = vunpack.c.l.bf16 %v2628_v0  ;;  %v2629_v3 = vld [vmem:[%s3338_s0 + $0x73] sm:$0x1]  ;;  %v2630_v4 = vld [vmem:[%s3338_s0 + $0x72] sm:$0x1]  ;;  %v2822_v6 = vpack.i.bf16 %v2271_v55, %v2260_v1 }
  0x43   :  { %v2631_v5 = vld [vmem:[%s3338_s0 + $0x71] sm:$0x1]  ;;  %148 = vst [vmem:[#allocation1 + $0x3b8] sm:$0x3] %v145_v61  ;;  %164 = vst [vmem:[#allocation1 + $0x3b0] sm:$0x3] %v161_v62  ;;  %v209_v8 = vunpack.c.l.bf16 %v2629_v3  ;;  %v225_v9 = vunpack.c.l.bf16 %v2630_v4 }
  0x44   :  { %v2291_v7 = vld [vmem:[#allocation1 + $0x181] ss:$8 sm:$0xf0]   ;;  %180 = vst [vmem:[#allocation1 + $0x3a8] sm:$0x3] %v177_v63  ;;  %v241_v10 = vunpack.c.l.bf16 %v2631_v5  ;;  %2823 = vrot.lane.b32.xlu1 %v2822_v6, %s2847_s7 }
  0x45   :  { %v2632_v11 = vld [vmem:[%s3338_s0 + $0x70] sm:$0x1]  ;;  %196 = vst [vmem:[#allocation1 + $0x3a0] sm:$0x3] %v193_v2  ;;  %v2657_v13 = vld [vmem:[%s3338_s0 + $0x57] sm:$0x1] }
  0x46   :  { %v257_v12 = vunpack.c.l.bf16 %v2632_v11  ;;  %v2658_v14 = vld [vmem:[%s3338_s0 + $0x56] sm:$0x1]  ;;  %v2659_v15 = vld [vmem:[%s3338_s0 + $0x55] sm:$0x1]  ;;  %212 = vst [vmem:[#allocation1 + $0x398] sm:$0x3] %v209_v8  ;;  %v657_v17 = vunpack.c.l.bf16 %v2657_v13 }
  0x47   :  { %v2289_v16 = vld [vmem:[#allocation1 + $0x181] ss:$8 sm:$0xf]   ;;  %228 = vst [vmem:[#allocation1 + $0x390] sm:$0x3] %v225_v9  ;;  %v673_v18 = vunpack.c.l.bf16 %v2658_v14  ;;  %v689_v19 = vunpack.c.l.bf16 %v2659_v15 }
  0x48   :  { %244 = vst [vmem:[#allocation1 + $0x388] sm:$0x3] %v241_v10  ;;  %v2660_v20 = vld [vmem:[%s3338_s0 + $0x54] sm:$0x1]  ;;  %260 = vst [vmem:[#allocation1 + $0x380] sm:$0x3] %v257_v12  ;;  %v2293_v30 = vsel %vm2051_vm0, %v2291_v7, %v2289_v16 }
  0x49   :  { %v705_v21 = vunpack.c.l.bf16 %v2660_v20  ;;  %v2661_v22 = vld [vmem:[%s3338_s0 + $0x53] sm:$0x1]  ;;  %v2662_v23 = vld [vmem:[%s3338_s0 + $0x52] sm:$0x1]  ;;  %v2663_v24 = vld [vmem:[%s3338_s0 + $0x51] sm:$0x1] }
  0x4a   :  { %v2280_v25 = vld [vmem:[#allocation1 + $0x81] ss:$8 sm:$0xf0]   ;;  %660 = vst [vmem:[#allocation1 + $0x2b8] sm:$0x3] %v657_v17  ;;  %v721_v26 = vunpack.c.l.bf16 %v2661_v22  ;;  %v737_v27 = vunpack.c.l.bf16 %v2662_v23  ;;  %v753_v28 = vunpack.c.l.bf16 %v2663_v24 }
  0x4b   :  { %676 = vst [vmem:[#allocation1 + $0x2b0] sm:$0x3] %v673_v18  ;;  %692 = vst [vmem:[#allocation1 + $0x2a8] sm:$0x3] %v689_v19  ;;  %v2664_v29 = vld [vmem:[%s3338_s0 + $0x50] sm:$0x1] }
  0x4c   :  { %708 = vst [vmem:[#allocation1 + $0x2a0] sm:$0x3] %v705_v21  ;;  %v769_v31 = vunpack.c.l.bf16 %v2664_v29  ;;  %v2681_v32 = vld [vmem:[%s3338_s0 + $0x3f] sm:$0x1]  ;;  %v2682_v33 = vld [vmem:[%s3338_s0 + $0x3e] sm:$0x1] }
  0x4d   :  { %v2683_v34 = vld [vmem:[%s3338_s0 + $0x3d] sm:$0x1]  ;;  %v2278_v35 = vld [vmem:[#allocation1 + $0x81] ss:$8 sm:$0xf]   ;;  %v1041_v36 = vunpack.c.l.bf16 %v2681_v32  ;;  %v1057_v37 = vunpack.c.l.bf16 %v2682_v33 }
  0x4e   :  { %724 = vst [vmem:[#allocation1 + $0x298] sm:$0x3] %v721_v26  ;;  %740 = vst [vmem:[#allocation1 + $0x290] sm:$0x3] %v737_v27  ;;  %v1073_v38 = vunpack.c.l.bf16 %v2683_v34  ;;  %v2684_v39 = vld [vmem:[%s3338_s0 + $0x3c] sm:$0x1]  ;;  %v2282_v40 = vsel %vm2051_vm0, %v2280_v25, %v2278_v35 }
  0x4f   :  { %756 = vst [vmem:[#allocation1 + $0x288] sm:$0x3] %v753_v28  ;;  %772 = vst [vmem:[#allocation1 + $0x280] sm:$0x3] %v769_v31  ;;  %v1089_v41 = vunpack.c.l.bf16 %v2684_v39  ;;  %v2685_v42 = vld [vmem:[%s3338_s0 + $0x3b] sm:$0x1]  ;;  %v2827_v45 = vpack.i.bf16 %v2293_v30, %v2282_v40 }
  0x50   :  { %v2686_v43 = vld [vmem:[%s3338_s0 + $0x3a] sm:$0x1]  ;;  %v2687_v44 = vld [vmem:[%s3338_s0 + $0x39] sm:$0x1]  ;;  %1044 = vst [vmem:[#allocation1 + $0x1f8] sm:$0x3] %v1041_v36  ;;  %v1105_v47 = vunpack.c.l.bf16 %v2685_v42 }
  0x51   :  { %v2313_v46 = vld [vmem:[#allocation1 + $0x381] ss:$8 sm:$0xf0]   ;;  %1060 = vst [vmem:[#allocation1 + $0x1f0] sm:$0x3] %v1057_v37  ;;  %v1121_v48 = vunpack.c.l.bf16 %v2686_v43  ;;  %v1137_v49 = vunpack.c.l.bf16 %v2687_v44  ;;  %2828 = vrot.lane.b32.xlu0 %v2827_v45, %s2847_s7 }
  0x52   :  { %1076 = vst [vmem:[#allocation1 + $0x1e8] sm:$0x3] %v1073_v38  ;;  %v2688_v50 = vld [vmem:[%s3338_s0 + $0x38] sm:$0x1]  ;;  %1092 = vst [vmem:[#allocation1 + $0x1e0] sm:$0x3] %v1089_v41 }
  0x53   :  { %v1153_v51 = vunpack.c.l.bf16 %v2688_v50  ;;  %v2713_v52 = vld [vmem:[%s3338_s0 + $0x1f] sm:$0x1]  ;;  %v2714_v53 = vld [vmem:[%s3338_s0 + $0x1e] sm:$0x1]  ;;  %v2715_v54 = vld [vmem:[%s3338_s0 + $0x1d] sm:$0x1] }
  0x54   :  { %v2311_v55 = vld [vmem:[#allocation1 + $0x381] ss:$8 sm:$0xf]   ;;  %1108 = vst [vmem:[#allocation1 + $0x1d8] sm:$0x3] %v1105_v47  ;;  %v1553_v56 = vunpack.c.l.bf16 %v2713_v52  ;;  %v1569_v57 = vunpack.c.l.bf16 %v2714_v53  ;;  %v1585_v58 = vunpack.c.l.bf16 %v2715_v54 }
  0x55   :  { %1124 = vst [vmem:[#allocation1 + $0x1d0] sm:$0x3] %v1121_v48  ;;  %1140 = vst [vmem:[#allocation1 + $0x1c8] sm:$0x3] %v1137_v49  ;;  %v2716_v59 = vld [vmem:[%s3338_s0 + $0x1c] sm:$0x1]  ;;  %v2315_v5 = vsel %vm2051_vm0, %v2313_v46, %v2311_v55 }
  0x56   :  { %1156 = vst [vmem:[#allocation1 + $0x1c0] sm:$0x3] %v1153_v51  ;;  %v1601_v60 = vunpack.c.l.bf16 %v2716_v59  ;;  %v2717_v61 = vld [vmem:[%s3338_s0 + $0x1b] sm:$0x1]  ;;  %v2718_v62 = vld [vmem:[%s3338_s0 + $0x1a] sm:$0x1] }
  0x57   :  { %v2719_v63 = vld [vmem:[%s3338_s0 + $0x19] sm:$0x1]  ;;  %1556 = vst [vmem:[#allocation1 + $0xf8] sm:$0x3] %v1553_v56  ;;  %1572 = vst [vmem:[#allocation1 + $0xf0] sm:$0x3] %v1569_v57  ;;  %v1617_v1 = vunpack.c.l.bf16 %v2717_v61  ;;  %v1633_v2 = vunpack.c.l.bf16 %v2718_v62 }
  0x58   :  { %v2302_v0 = vld [vmem:[#allocation1 + $0x281] ss:$8 sm:$0xf0]   ;;  %1588 = vst [vmem:[#allocation1 + $0xe8] sm:$0x3] %v1585_v58  ;;  %v1649_v3 = vunpack.c.l.bf16 %v2719_v63 }
  0x59   :  { %v2720_v4 = vld [vmem:[%s3338_s0 + $0x18] sm:$0x1]  ;;  %1604 = vst [vmem:[#allocation1 + $0xe0] sm:$0x3] %v1601_v60  ;;  %v2617_v7 = vld [vmem:[%s3338_s0 + $0x7f] sm:$0x1] }
  0x5a   :  { %v1665_v6 = vunpack.c.l.bf16 %v2720_v4  ;;  %v2618_v8 = vld [vmem:[%s3338_s0 + $0x7e] sm:$0x1]  ;;  %v2619_v9 = vld [vmem:[%s3338_s0 + $0x7d] sm:$0x1]  ;;  %1620 = vst [vmem:[#allocation1 + $0xd8] sm:$0x3] %v1617_v1  ;;  %v17_v11 = vunpack.c.l.bf16 %v2617_v7 }
  0x5b   :  { %v2300_v10 = vld [vmem:[#allocation1 + $0x281] ss:$8 sm:$0xf]   ;;  %1636 = vst [vmem:[#allocation1 + $0xd0] sm:$0x3] %v1633_v2  ;;  %v33_v12 = vunpack.c.l.bf16 %v2618_v8  ;;  %v49_v13 = vunpack.c.l.bf16 %v2619_v9 }
  0x5c   :  { %1652 = vst [vmem:[#allocation1 + $0xc8] sm:$0x3] %v1649_v3  ;;  %v2620_v14 = vld [vmem:[%s3338_s0 + $0x7c] sm:$0x1]  ;;  %v2304_v15 = vsel %vm2051_vm0, %v2302_v0, %v2300_v10  ;;  %1668 = vst [vmem:[#allocation1 + $0xc0] sm:$0x3] %v1665_v6 }
  0x5d   :  { %v65_v16 = vunpack.c.l.bf16 %v2620_v14  ;;  %v2621_v17 = vld [vmem:[%s3338_s0 + $0x7b] sm:$0x1]  ;;  %v2622_v18 = vld [vmem:[%s3338_s0 + $0x7a] sm:$0x1]  ;;  %v2623_v19 = vld [vmem:[%s3338_s0 + $0x79] sm:$0x1]  ;;  %v2832_v20 = vpack.i.bf16 %v2315_v5, %v2304_v15 }
  0x5e   :  { %v2335_v21 = vld [vmem:[#allocation1 + $0x1c1] ss:$8 sm:$0xf0]   ;;  %20 = vst [vmem:[#allocation1 + $0x3f8] sm:$0x3] %v17_v11  ;;  %v81_v22 = vunpack.c.l.bf16 %v2621_v17  ;;  %v97_v23 = vunpack.c.l.bf16 %v2622_v18  ;;  %v113_v24 = vunpack.c.l.bf16 %v2623_v19 }
  0x5f   :  { %36 = vst [vmem:[#allocation1 + $0x3f0] sm:$0x3] %v33_v12  ;;  %52 = vst [vmem:[#allocation1 + $0x3e8] sm:$0x3] %v49_v13  ;;  %v2624_v25 = vld [vmem:[%s3338_s0 + $0x78] sm:$0x1]  ;;  %2833 = vrot.lane.b32.xlu1 %v2832_v20, %s2847_s7 }
  0x60   :  { %68 = vst [vmem:[#allocation1 + $0x3e0] sm:$0x3] %v65_v16  ;;  %v129_v26 = vunpack.c.l.bf16 %v2624_v25  ;;  %v2649_v27 = vld [vmem:[%s3338_s0 + $0x5f] sm:$0x1]  ;;  %v2650_v28 = vld [vmem:[%s3338_s0 + $0x5e] sm:$0x1] }
  0x61   :  { %v2651_v29 = vld [vmem:[%s3338_s0 + $0x5d] sm:$0x1]  ;;  %v2333_v30 = vld [vmem:[#allocation1 + $0x1c1] ss:$8 sm:$0xf]   ;;  %v529_v31 = vunpack.c.l.bf16 %v2649_v27  ;;  %v545_v32 = vunpack.c.l.bf16 %v2650_v28 }
  0x62   :  { %84 = vst [vmem:[#allocation1 + $0x3d8] sm:$0x3] %v81_v22  ;;  %100 = vst [vmem:[#allocation1 + $0x3d0] sm:$0x3] %v97_v23  ;;  %v561_v33 = vunpack.c.l.bf16 %v2651_v29  ;;  %v2652_v34 = vld [vmem:[%s3338_s0 + $0x5c] sm:$0x1]  ;;  %v2337_v44 = vsel %vm2051_vm0, %v2335_v21, %v2333_v30 }
  0x63   :  { %116 = vst [vmem:[#allocation1 + $0x3c8] sm:$0x3] %v113_v24  ;;  %132 = vst [vmem:[#allocation1 + $0x3c0] sm:$0x3] %v129_v26  ;;  %v577_v35 = vunpack.c.l.bf16 %v2652_v34  ;;  %v2653_v36 = vld [vmem:[%s3338_s0 + $0x5b] sm:$0x1] }
  0x64   :  { %v2654_v37 = vld [vmem:[%s3338_s0 + $0x5a] sm:$0x1]  ;;  %v2655_v38 = vld [vmem:[%s3338_s0 + $0x59] sm:$0x1]  ;;  %532 = vst [vmem:[#allocation1 + $0x2f8] sm:$0x3] %v529_v31  ;;  %v593_v40 = vunpack.c.l.bf16 %v2653_v36 }
  0x65   :  { %v2324_v39 = vld [vmem:[#allocation1 + $0xc1] ss:$8 sm:$0xf0]   ;;  %548 = vst [vmem:[#allocation1 + $0x2f0] sm:$0x3] %v545_v32  ;;  %v609_v41 = vunpack.c.l.bf16 %v2654_v37  ;;  %v625_v42 = vunpack.c.l.bf16 %v2655_v38 }
  0x66   :  { %564 = vst [vmem:[#allocation1 + $0x2e8] sm:$0x3] %v561_v33  ;;  %v2656_v43 = vld [vmem:[%s3338_s0 + $0x58] sm:$0x1]  ;;  %580 = vst [vmem:[#allocation1 + $0x2e0] sm:$0x3] %v577_v35 }
  0x67   :  { %v641_v45 = vunpack.c.l.bf16 %v2656_v43  ;;  %v2049_v46 = vld [vmem:[#allocation1] ss:$8 sm:$0xf]   ;;  %v2322_v48 = vld [vmem:[#allocation1 + $0xc1] ss:$8 sm:$0xf]  }
  0x68   :  { %v2050_v47 = vld [vmem:[#allocation1] ss:$8 sm:$0xf0]   ;;  %596 = vst [vmem:[#allocation1 + $0x2d8] sm:$0x3] %v593_v40  ;;  %v2326_v51 = vsel %vm2051_vm0, %v2324_v39, %v2322_v48 }
  0x69   :  { %612 = vst [vmem:[#allocation1 + $0x2d0] sm:$0x3] %v609_v41  ;;  %628 = vst [vmem:[#allocation1 + $0x2c8] sm:$0x3] %v625_v42  ;;  %v2052_v49 = vsel %vm2051_vm0, %v2050_v47, %v2049_v46  ;;  %v2837_v54 = vpack.i.bf16 %v2337_v44, %v2326_v51 }
  0x6a   :  { %v2083_v50 = vld [vmem:[#allocation1 + $0x100] ss:$8 sm:$0xf]   ;;  %644 = vst [vmem:[#allocation1 + $0x2c0] sm:$0x3] %v641_v45  ;;  %2054 = vst.msk [vmem:[#allocation0] sm:$0xff] %vm2053_vm1, %v2052_v49  }
  0x6b   :  { %v2085_v52 = vld [vmem:[#allocation1 + $0x100] ss:$8 sm:$0xf0]   ;;  %v2357_v55 = vld [vmem:[#allocation1 + $0x3c1] ss:$8 sm:$0xf0]   ;;  %2838 = vrot.lane.b32.xlu0 %v2837_v54, %s2847_s7 }
  0x6c   :  { %v2056_v53 = vld [vmem:[#allocation1 + $0x40] ss:$8 sm:$0xf]   ;;  %v2087_v56 = vsel %vm2051_vm0, %v2085_v52, %v2083_v50  ;;  %v2355_v61 = vld [vmem:[#allocation1 + $0x3c1] ss:$8 sm:$0xf]  }
  0x6d   :  { %v2058_v57 = vld [vmem:[#allocation1 + $0x40] ss:$8 sm:$0xf0]   ;;  %2090 = vst.msk [vmem:[#allocation0 + $0x20] sm:$0xff] %vm2053_vm1, %v2087_v56   ;;  %v2359_v5 = vsel %vm2051_vm0, %v2357_v55, %v2355_v61 }
  0x6e   :  { %v2060_v58 = vsel %vm2051_vm0, %v2058_v57, %v2056_v53  ;;  %v2092_v59 = vld [vmem:[#allocation1 + $0x140] ss:$8 sm:$0xf]   ;;  %v2346_v2 = vld [vmem:[#allocation1 + $0x2c1] ss:$8 sm:$0xf0]  }
  0x6f   :  { %v2094_v60 = vld [vmem:[#allocation1 + $0x140] ss:$8 sm:$0xf0]   ;;  %2063 = vst.msk [vmem:[#allocation0 + $0x8] sm:$0xff] %vm2053_vm1, %v2060_v58  }
  0x70   :  { %v2096_v62 = vsel %vm2051_vm0, %v2094_v60, %v2092_v59  ;;  %v2119_v63 = vld [vmem:[#allocation1 + $0x200] ss:$8 sm:$0xf]  }
  0x71   :  { %2099 = vst.msk [vmem:[#allocation0 + $0x28] sm:$0xff] %vm2053_vm1, %v2096_v62   ;;  %v2121_v0 = vld [vmem:[#allocation1 + $0x200] ss:$8 sm:$0xf0]  }
  0x72   :  { %v2155_v1 = vld [vmem:[#allocation1 + $0x300] ss:$8 sm:$0xf]   ;;  %v2123_v3 = vsel %vm2051_vm0, %v2121_v0, %v2119_v63  ;;  %v2344_v9 = vld [vmem:[#allocation1 + $0x2c1] ss:$8 sm:$0xf]  }
  0x73   :  { %v2157_v4 = vld [vmem:[#allocation1 + $0x300] ss:$8 sm:$0xf0]   ;;  %2126 = vst.msk [vmem:[#allocation0 + $0x40] sm:$0xff] %vm2053_vm1, %v2123_v3   ;;  %v2348_v12 = vsel %vm2051_vm0, %v2346_v2, %v2344_v9 }
  0x74   :  { %v2159_v6 = vsel %vm2051_vm0, %v2157_v4, %v2155_v1  ;;  %v2128_v7 = vld [vmem:[#allocation1 + $0x240] ss:$8 sm:$0xf]   ;;  %v2842_v15 = vpack.i.bf16 %v2359_v5, %v2348_v12 }
  0x75   :  { %v2130_v8 = vld [vmem:[#allocation1 + $0x240] ss:$8 sm:$0xf0]   ;;  %2162 = vst.msk [vmem:[#allocation0 + $0x60] sm:$0xff] %vm2053_vm1, %v2159_v6  }
  0x76   :  { %v2132_v10 = vsel %vm2051_vm0, %v2130_v8, %v2128_v7  ;;  %v2164_v11 = vld [vmem:[#allocation1 + $0x340] ss:$8 sm:$0xf]   ;;  %2843 = vrot.lane.b32.xlu1 %v2842_v15, %s2847_s7 }
  0x77   :  { %2135 = vst.msk [vmem:[#allocation0 + $0x48] sm:$0xff] %vm2053_vm1, %v2132_v10   ;;  %v2166_v13 = vld [vmem:[#allocation1 + $0x340] ss:$8 sm:$0xf0]  }
  0x78   :  { %v2065_v14 = vld [vmem:[#allocation1 + $0x80] ss:$8 sm:$0xf]   ;;  %v2168_v16 = vsel %vm2051_vm0, %v2166_v13, %v2164_v11 }
  0x79   :  { %v2067_v17 = vld [vmem:[#allocation1 + $0x80] ss:$8 sm:$0xf0]   ;;  %2171 = vst.msk [vmem:[#allocation0 + $0x68] sm:$0xff] %vm2053_vm1, %v2168_v16  }
  0x7a   :  { %v2101_v18 = vld [vmem:[#allocation1 + $0x180] ss:$8 sm:$0xf]   ;;  %v2069_v19 = vsel %vm2051_vm0, %v2067_v17, %v2065_v14 }
  0x7b   :  { %v2103_v20 = vld [vmem:[#allocation1 + $0x180] ss:$8 sm:$0xf0]   ;;  %2072 = vst.msk [vmem:[#allocation0 + $0x10] sm:$0xff] %vm2053_vm1, %v2069_v19  }
  0x7c   :  { %v2137_v21 = vld [vmem:[#allocation1 + $0x280] ss:$8 sm:$0xf]   ;;  %v2105_v22 = vsel %vm2051_vm0, %v2103_v20, %v2101_v18 }
  0x7d   :  { %v2139_v23 = vld [vmem:[#allocation1 + $0x280] ss:$8 sm:$0xf0]   ;;  %2108 = vst.msk [vmem:[#allocation0 + $0x30] sm:$0xff] %vm2053_vm1, %v2105_v22  }
  0x7e   :  { %v2173_v24 = vld [vmem:[#allocation1 + $0x380] ss:$8 sm:$0xf]   ;;  %v2141_v25 = vsel %vm2051_vm0, %v2139_v23, %v2137_v21 }
  0x7f   :  { %v2175_v26 = vld [vmem:[#allocation1 + $0x380] ss:$8 sm:$0xf0]   ;;  %2144 = vst.msk [vmem:[#allocation0 + $0x50] sm:$0xff] %vm2053_vm1, %v2141_v25  }
  0x80   :  { %v2074_v27 = vld [vmem:[#allocation1 + $0xc0] ss:$8 sm:$0xf]   ;;  %v2177_v28 = vsel %vm2051_vm0, %v2175_v26, %v2173_v24 }
  0x81   :  { %v2076_v29 = vld [vmem:[#allocation1 + $0xc0] ss:$8 sm:$0xf0]   ;;  %2180 = vst.msk [vmem:[#allocation0 + $0x70] sm:$0xff] %vm2053_vm1, %v2177_v28  }
  0x82   :  { %v2110_v30 = vld [vmem:[#allocation1 + $0x1c0] ss:$8 sm:$0xf]   ;;  %v2078_v31 = vsel %vm2051_vm0, %v2076_v29, %v2074_v27 }
  0x83   :  { %v2112_v32 = vld [vmem:[#allocation1 + $0x1c0] ss:$8 sm:$0xf0]   ;;  %2081 = vst.msk [vmem:[#allocation0 + $0x18] sm:$0xff] %vm2053_vm1, %v2078_v31  }
  0x84   :  { %v2146_v33 = vld [vmem:[#allocation1 + $0x2c0] ss:$8 sm:$0xf]   ;;  %v2114_v34 = vsel %vm2051_vm0, %v2112_v32, %v2110_v30 }
  0x85   :  { %v2148_v35 = vld [vmem:[#allocation1 + $0x2c0] ss:$8 sm:$0xf0]   ;;  %2117 = vst.msk [vmem:[#allocation0 + $0x38] sm:$0xff] %vm2053_vm1, %v2114_v34  }
  0x86   :  { %v2182_v36 = vld [vmem:[#allocation1 + $0x3c0] ss:$8 sm:$0xf]   ;;  %v2150_v37 = vsel %vm2051_vm0, %v2148_v35, %v2146_v33 }
  0x87   :  { %v2184_v38 = vld [vmem:[#allocation1 + $0x3c0] ss:$8 sm:$0xf0]   ;;  %2153 = vst.msk [vmem:[#allocation0 + $0x58] sm:$0xff] %vm2053_vm1, %v2150_v37  }
  0x88   :  { %v2186_v39 = vsel %vm2051_vm0, %v2184_v38, %v2182_v36 }
  0x89   :  { %2189 = vst.msk [vmem:[#allocation0 + $0x78] sm:$0xff] %vm2053_vm1, %v2186_v39  }
  0x91   :  { %v2809_v40 = vpop.permute.xlu0 %2808 }
  0x92   :  { %v2811_v41 = vunpack.i.h.bf16 %v2809_v40  ;;  %v2810_v42 = vunpack.i.l.bf16 %v2809_v40 }
  0x94   :  { %2199 = vst.msk [vmem:[#allocation0] sm:$0xff] %vm2198_vm2, %v2810_v42   ;;  %2210 = vst.msk [vmem:[#allocation0 + $0x20] sm:$0xff] %vm2198_vm2, %v2811_v41  }
  0x98   :  { %v2819_v43 = vpop.permute.xlu1 %2818 }
  0x99   :  { %v2821_v44 = vunpack.i.h.bf16 %v2819_v43  ;;  %v2820_v45 = vunpack.i.l.bf16 %v2819_v43 }
  0x9b   :  { %2243 = vst.msk [vmem:[#allocation0 + $0x8] sm:$0xff] %vm2198_vm2, %v2820_v45   ;;  %2254 = vst.msk [vmem:[#allocation0 + $0x28] sm:$0xff] %vm2198_vm2, %v2821_v44   ;;  %v2369_v46 = vld [vmem:[#allocation0] sm:$0xff] }
  0x9c   :  { %v2394_v47 = vld [vmem:[#allocation0 + $0x20] sm:$0xff] }
  0xa2   :  { %v2374_v48 = vld [vmem:[#allocation0 + $0x8] sm:$0xff] }
  0xa3   :  { %v2401_v49 = vld [vmem:[#allocation0 + $0x28] sm:$0xff]  ;;  %v2762_v50 = vpack.c.bf16 %v2374_v48, %v2369_v46 }
  0xa4   :  { %v2772_v51 = vpack.c.bf16 %v2401_v49, %v2394_v47 }
  0xa5   :  { %2763 = vst [vmem:[%s3339_s1] sm:$0xff] %v2762_v50  }
  0xa6   :  { %2800 = vst [vmem:[%s3339_s1 + $0x10] sm:$0xff] %v2772_v51  }
  0xab   :  { %v2814_v52 = vpop.permute.xlu0 %2813 }
  0xac   :  { %v2816_v53 = vunpack.i.h.bf16 %v2814_v52  ;;  %v2815_v54 = vunpack.i.l.bf16 %v2814_v52 }
  0xae   :  { %2221 = vst.msk [vmem:[#allocation0 + $0x40] sm:$0xff] %vm2198_vm2, %v2815_v54   ;;  %2232 = vst.msk [vmem:[#allocation0 + $0x60] sm:$0xff] %vm2198_vm2, %v2816_v53  }
  0xb5   :  { %v2422_v58 = vld [vmem:[#allocation0 + $0x40] sm:$0xff] }
  0xb6   :  { %v2824_v55 = vpop.permute.xlu1 %2823  ;;  %v2450_v59 = vld [vmem:[#allocation0 + $0x60] sm:$0xff] }
  0xb7   :  { %v2826_v56 = vunpack.i.h.bf16 %v2824_v55  ;;  %v2825_v57 = vunpack.i.l.bf16 %v2824_v55 }
  0xb9   :  { %2265 = vst.msk [vmem:[#allocation0 + $0x48] sm:$0xff] %vm2198_vm2, %v2825_v57   ;;  %2276 = vst.msk [vmem:[#allocation0 + $0x68] sm:$0xff] %vm2198_vm2, %v2826_v56  }
  0xc0   :  { %v2429_v63 = vld [vmem:[#allocation0 + $0x48] sm:$0xff] }
  0xc1   :  { %v2457_v0 = vld [vmem:[#allocation0 + $0x68] sm:$0xff]  ;;  %v2782_v1 = vpack.c.bf16 %v2429_v63, %v2422_v58 }
  0xc2   :  { %v2792_v2 = vpack.c.bf16 %v2457_v0, %v2450_v59 }
  0xc3   :  { %v2829_v60 = vpop.permute.xlu0 %2828  ;;  %2802 = vst [vmem:[%s3339_s1 + $0x20] sm:$0xff] %v2782_v1  }
  0xc4   :  { %v2831_v61 = vunpack.i.h.bf16 %v2829_v60  ;;  %v2830_v62 = vunpack.i.l.bf16 %v2829_v60  ;;  %2804 = vst [vmem:[%s3339_s1 + $0x30] sm:$0xff] %v2792_v2  }
  0xc6   :  { %2298 = vst.msk [vmem:[#allocation0 + $0x30] sm:$0xff] %vm2198_vm2, %v2831_v61   ;;  %2287 = vst.msk [vmem:[#allocation0 + $0x10] sm:$0xff] %vm2198_vm2, %v2830_v62  }
  0xcd   :  { %v2408_v10 = vld [vmem:[#allocation0 + $0x30] sm:$0xff] }
  0xce   :  { %v2380_v13 = vld [vmem:[#allocation0 + $0x10] sm:$0xff] }
  0xd1   :  { %v2834_v3 = vpop.permute.xlu1 %2833 }
  0xd2   :  { %v2836_v4 = vunpack.i.h.bf16 %v2834_v3  ;;  %v2835_v5 = vunpack.i.l.bf16 %v2834_v3 }
  0xd4   :  { %2309 = vst.msk [vmem:[#allocation0 + $0x50] sm:$0xff] %vm2198_vm2, %v2835_v5   ;;  %2320 = vst.msk [vmem:[#allocation0 + $0x70] sm:$0xff] %vm2198_vm2, %v2836_v4  }
  0xdb   :  { %v2436_v18 = vld [vmem:[#allocation0 + $0x50] sm:$0xff] }
  0xdc   :  { %v2464_v19 = vld [vmem:[#allocation0 + $0x70] sm:$0xff] }
  0xdd   :  { %v2839_v6 = vpop.permute.xlu0 %2838 }
  0xde   :  { %v2841_v7 = vunpack.i.h.bf16 %v2839_v6  ;;  %v2840_v8 = vunpack.i.l.bf16 %v2839_v6 }
  0xe0   :  { %2342 = vst.msk [vmem:[#allocation0 + $0x38] sm:$0xff] %vm2198_vm2, %v2841_v7   ;;  %2331 = vst.msk [vmem:[#allocation0 + $0x18] sm:$0xff] %vm2198_vm2, %v2840_v8  }
  0xe7   :  { %v2415_v14 = vld [vmem:[#allocation0 + $0x38] sm:$0xff] }
  0xe8   :  { %v2844_v9 = vpop.permute.xlu1 %2843  ;;  %v2387_v15 = vld [vmem:[#allocation0 + $0x18] sm:$0xff]  ;;  %v2777_v17 = vpack.c.bf16 %v2415_v14, %v2408_v10 }
  0xe9   :  { %v2846_v11 = vunpack.i.h.bf16 %v2844_v9  ;;  %v2845_v12 = vunpack.i.l.bf16 %v2844_v9  ;;  %v2767_v16 = vpack.c.bf16 %v2387_v15, %v2380_v13 }
  0xea   :  { %2801 = vst [vmem:[%s3339_s1 + $0x18] sm:$0xff] %v2777_v17  }
  0xeb   :  { %2353 = vst.msk [vmem:[#allocation0 + $0x58] sm:$0xff] %vm2198_vm2, %v2845_v12   ;;  %2364 = vst.msk [vmem:[#allocation0 + $0x78] sm:$0xff] %vm2198_vm2, %v2846_v11  }
  0xec   :  { %2799 = vst [vmem:[%s3339_s1 + $0x8] sm:$0xff] %v2767_v16  }
  0xf2   :  { %v2443_v20 = vld [vmem:[#allocation0 + $0x58] sm:$0xff] }
  0xf3   :  { %v2471_v21 = vld [vmem:[#allocation0 + $0x78] sm:$0xff]  ;;  %v2787_v22 = vpack.c.bf16 %v2443_v20, %v2436_v18 }
  0xf4   :  { %v2797_v23 = vpack.c.bf16 %v2471_v21, %v2464_v19 }
  0xf5   :  { %2803 = vst [vmem:[%s3339_s1 + $0x28] sm:$0xff] %v2787_v22  }
  0xf6   :  { %2805 = vst [vmem:[%s3339_s1 + $0x38] sm:$0xff] %v2797_v23  }

// kernel: tile.33
= control target key start
LH: loop header
LB: loop body
LE: loop exit
PB: predicated region body
PF: predicated region fallthrough
CT: control target
= control target key end

     0   :  { %s22_s0 = inlined_call_operand.vmem [shape: f32[64], index: 0, kind: input, shape index: {}]   ;;  %s23_s1 = inlined_call_operand.vmem [shape: f32[2,64], index: 1, kind: output, shape index: {}]  }
   0x1   :  { %v4_v0 = vld [vmem:[%s22_s0] ss:$0 sm:$0xff] }
   0x2   :  { %5 = vst [vmem:[%s23_s1] sm:$0x3] %v4_v0 }

// kernel: tile.34
= control target key start
LH: loop header
LB: loop body
LE: loop exit
PB: predicated region body
PF: predicated region fallthrough
CT: control target
= control target key end

     0   :  { %vm7_vm0 = vcmask 523264   ;;  %vm13_vm1 = vcmask 1048064   ;;  %s39_s0 = inlined_call_operand.vmem [shape: f32[2,64], index: 0, kind: input, shape index: {}]   ;;  %s40_s1 = inlined_call_operand.vmem [shape: f32[1,128], index: 1, kind: output, shape index: {}]  }
   0x1   :  { %v4_v0 = vld [vmem:[%s39_s0] sm:$0x3]  ;;  %s22_s0 = smov 64  }
   0x2   :  { %5 = vst [vmem:[#allocation1] sm:$0x3] %v4_v0 }
   0x9   :  { %v10_v1 = vld [vmem:[#allocation1 + $0x1] sm:$0x1]   ;;  %v6_v2 = vld [vmem:[#allocation1] sm:$0x1]  }
   0xa   :  { %11 = vrot.lane.b32.xlu0 %v10_v1, %s22_s0  ;;  %8 = vst.msk [vmem:[#allocation0] sm:$0x1] %vm7_vm0, %v6_v2  }
  0x7c   :  { %v12_v3 = vpop.permute.xlu0 %11  }
  0x7d   :  { %14 = vst.msk [vmem:[#allocation0] sm:$0x1] %vm13_vm1, %v12_v3  }
  0x84   :  { %v18_v4 = vld [vmem:[#allocation0] sm:$0x1] }
  0x85   :  { %20 = vst [vmem:[%s40_s1] sm:$0x1] %v18_v4 }

// kernel: tile.38
= control target key start
LH: loop header
LB: loop body
LE: loop exit
PB: predicated region body
PF: predicated region fallthrough
CT: control target
= control target key end

     0   :  { %s22_s0 = inlined_call_operand.vmem [shape: f32[96], index: 0, kind: input, shape index: {}]   ;;  %s23_s1 = inlined_call_operand.vmem [shape: f32[2,96], index: 1, kind: output, shape index: {}]  }
   0x1   :  { %v4_v0 = vld [vmem:[%s22_s0] ss:$0 sm:$0xff] }
   0x2   :  { %5 = vst [vmem:[%s23_s1] sm:$0x3] %v4_v0 }

// kernel: tile.39
= control target key start
LH: loop header
LB: loop body
LE: loop exit
PB: predicated region body
PF: predicated region fallthrough
CT: control target
= control target key end

     0   :  { %vm13_vm0 = vcmask 261120   ;;  %vm7_vm1 = vcmask 785408   ;;  %vm17_vm2 = vcmask 523264   ;;  %vm20_vm3 = vcmask 1048320   ;;  %s55_s0 = inlined_call_operand.vmem [shape: f32[2,96], index: 0, kind: input, shape index: {}]   ;;  %s56_s1 = inlined_call_operand.vmem [shape: f32[1,192], index: 1, kind: output, shape index: {}]  }
   0x1   :  { %v4_v0 = vld [vmem:[%s55_s0] sm:$0x3]  ;;  %s35_s0 = smov 96  }
   0x2   :  { %5 = vst [vmem:[#allocation1] sm:$0x3] %v4_v0 }
   0x9   :  { %v10_v1 = vld [vmem:[#allocation1 + $0x1] sm:$0x1]   ;;  %v6_v3 = vld [vmem:[#allocation1] sm:$0x1]  }
   0xa   :  { %v12_v2 = vld [vmem:[#allocation1 + $0x1] sm:$0x1]   ;;  %8 = vst.msk [vmem:[#allocation0] sm:$0x1] %vm7_vm1, %v6_v3  }
   0xb   :  { %v14_v4 = vsel %vm13_vm0, %v12_v2, %v10_v1 }
   0xc   :  { %15 = vrot.lane.b32.xlu0 %v14_v4, %s35_s0 }
  0x7e   :  { %v16_v5 = vpop.permute.xlu0 %15  }
  0x7f   :  { %19 = vst.msk [vmem:[#allocation0 + $0x8] sm:$0x1] %vm17_vm2, %v16_v5  }
  0x80   :  { %21 = vst.msk [vmem:[#allocation0] sm:$0x1] %vm20_vm3, %v16_v5  }
  0x86   :  { %v29_v7 = vld [vmem:[#allocation0 + $0x8] sm:$0x1] }
  0x87   :  { %v25_v6 = vld [vmem:[#allocation0] sm:$0x1]  ;;  %33 = vst [vmem:[%s56_s1 + $0x1] sm:$0x1] %v29_v7 }
  0x88   :  { %27 = vst [vmem:[%s56_s1] sm:$0x1] %v25_v6 }

// kernel: _forward_impl.1
= control target key start
LH: loop header
LB: loop body
LE: loop exit
PB: predicated region body
PF: predicated region fallthrough
CT: control target
= control target key end

     0   :  { %s1881_s30 = smov 0   ;;  %s2224_s0 = inlined_call_operand.vmem [shape: f32[2,16,128], index: 0, kind: input, shape index: {}]   ;;  %s2225_s1 = inlined_call_operand.vmem [shape: bf16[384,128], index: 1, kind: input, shape index: {}]   ;;  %s2226_s2 = inlined_call_operand.vmem [shape: f32[1,128], index: 2, kind: input, shape index: {}]   ;;  %s2227_s3 = inlined_call_operand.vmem [shape: bf16[384,128], index: 3, kind: input, shape index: {}]   ;;  %s2228_s4 = inlined_call_operand.vmem [shape: f32[1,128], index: 4, kind: input, shape index: {}]   ;;  %s2229_s5 = inlined_call_operand.vmem [shape: bf16[384,128], index: 5, kind: input, shape index: {}]   ;;  %s2230_s6 = inlined_call_operand.vmem [shape: f32[1,128], index: 6, kind: input, shape index: {}]   ;;  %s2231_s7 = inlined_call_operand.vmem [shape: bf16[128,192], index: 7, kind: input, shape index: {}]   ;;  %s2232_s8 = inlined_call_operand.vmem [shape: f32[1,192], index: 8, kind: input, shape index: {}]   ;;  %s2233_s9 = inlined_call_operand.vmem [shape: bf16[2,2,192], index: 9, kind: output, shape index: {}]  }
   0x1 LB: > { %s1438_s10 = sadd.s32 4294967295, %s1825_s30   ;;  %p1442_p0 = scmp.ge.s32.totalorder %s1825_s30, 1  ;;  %s1825_s30 = sphi %s1881_s30, %s19_s30  }
   0x2   : > { %p287_p1 = scmp.lt.s32.totalorder %s1825_s30, 3 }
   0x4   : > { %p288_p2 = pnand %p1442_p0, %p287_p1 }
   0x5   : > { %v1723_v0 = vld [vmem:[%s2225_s1 + $0x40] sm:$0xff] (!%p288_p2)   ;;  %v1827_v2 = vmov (!%p288_p2), 0.0   ;;  %v1726_v4 = vld [vmem:[%s2225_s1 + $0x48] sm:$0xff] (!%p288_p2)   ;;  %v1729_v7 = vld [vmem:[%s2225_s1 + $0x50] sm:$0xff] (!%p288_p2)   ;;  %p322_p3 = scmp.lt.s32.totalorder (!%p288_p2), %s1438_s10, 1  ;;  %vm1828_vm0 = vmmov (!%p288_p2), 0  }
   0x6   : > { %291 = sbr.rel (%p288_p2) target bundleno = 961 (0x3c1), region = 56  ;;  %v1724_v1 = vld [vmem:[%s2225_s1] sm:$0xff] (!%p288_p2)   ;;  %1651 = vmatprep.subr.bf16.mxu1 (!%p288_p2), %v1827_v2  ;;  %1558 = vmatprep.subr.bf16.mxu0 (!%p288_p2), %v1723_v0  ;;  %v1727_v5 = vld [vmem:[%s2225_s1 + $0x8] sm:$0xff] (!%p288_p2)   ;;  %v1730_v8 = vld [vmem:[%s2225_s1 + $0x10] sm:$0xff] (!%p288_p2)   ;;  %vm337_vm1 = vcmask (!%p288_p2), 1040384   ;;  %vm1382_vm4 = vcmask (!%p288_p2), 517121  }
   0x7   : > { %v1725_v3 = vld [vmem:[%s2225_s1 + $0x80] sm:$0xff] (!%p288_p2)   ;;  %1559 = vmatpush3.bf16.msra.mxu0 (!%p288_p2), %v1724_v1  ;;  %v1728_v6 = vld [vmem:[%s2225_s1 + $0x88] sm:$0xff] (!%p288_p2)   ;;  %v1731_v9 = vld [vmem:[%s2225_s1 + $0x90] sm:$0xff] (!%p288_p2)   ;;  %1667 = vmatprep.mubr.msk.bf16.mxu1 (!%p288_p2), %vm1828_vm0, %v1827_v2 }
   0x8   : > { %1652 = vmatpush3.bf16.msra.mxu1 (!%p288_p2), %v1725_v3  ;;  %1560 = vmatprep.subr.bf16.mxu0 (!%p288_p2), %v1726_v4  ;;  %v1732_v10 = vld [vmem:[%s2225_s1 + $0x58] sm:$0xff] (!%p288_p2)   ;;  %v1735_v13 = vld [vmem:[%s2225_s1 + $0x60] sm:$0xff] (!%p288_p2)   ;;  %v1738_v16 = vld [vmem:[%s2225_s1 + $0x68] sm:$0xff] (!%p288_p2)  }
   0x9   : > { %1653 = vmatprep.subr.bf16.mxu1 (!%p288_p2), %v1827_v2  ;;  %v1733_v11 = vld [vmem:[%s2225_s1 + $0x18] sm:$0xff] (!%p288_p2)   ;;  %v1736_v14 = vld [vmem:[%s2225_s1 + $0x20] sm:$0xff] (!%p288_p2)   ;;  %v1739_v17 = vld [vmem:[%s2225_s1 + $0x28] sm:$0xff] (!%p288_p2)  }
   0xa   : > { %v1734_v12 = vld [vmem:[%s2225_s1 + $0x98] sm:$0xff] (!%p288_p2)   ;;  %v1737_v15 = vld [vmem:[%s2225_s1 + $0xa0] sm:$0xff] (!%p288_p2)   ;;  %v1740_v18 = vld [vmem:[%s2225_s1 + $0xa8] sm:$0xff] (!%p288_p2)  }
   0xb   : > { %1561 = vmatpush3.bf16.msra.mxu0 (!%p288_p2), %v1727_v5  ;;  %v1741_v19 = vld [vmem:[%s2225_s1 + $0x70] sm:$0xff] (!%p288_p2)   ;;  %v1744_v24 = vld [vmem:[%s2225_s1 + $0x78] sm:$0xff] (!%p288_p2)   ;;  %vm1473_vm2 = vmneg (!%p288_p2), %vm337_vm1 }
   0xc   : > { %1654 = vmatpush3.bf16.msra.mxu1 (!%p288_p2), %v1728_v6  ;;  %1562 = vmatprep.subr.bf16.mxu0 (!%p288_p2), %v1729_v7  ;;  %v1742_v20 = vld [vmem:[%s2225_s1 + $0x30] sm:$0xff] (!%p288_p2)   ;;  %v1745_v26 = vld [vmem:[%s2225_s1 + $0x38] sm:$0xff] (!%p288_p2)   ;;  %v1748_v30 = vld [vmem:[%s2227_s3 + $0x40] sm:$0xff] (!%p288_p2)  }
   0xd   : > { %1655 = vmatprep.subr.bf16.mxu1 %v1827_v2  ;;  %s2237_s10 = smov (!%p322_p3, %s1438_s10), 1  ;;  %v1743_v21 = vld [vmem:[%s2225_s1 + $0xb0] sm:$0xff]   ;;  %v1746_v28 = vld [vmem:[%s2225_s1 + $0xb8] sm:$0xff]   ;;  %vm1985_vm3 = vmpackc.low %vm1473_vm2, %vm1473_vm2 }
   0xe   : > { %s1557_s24 = sshll.u32 %s2237_s10, 4  ;;  %v1747_v33 = vld [vmem:[%s2227_s3 + $0x80] sm:$0xff]   ;;  %v1751_v36 = vld [vmem:[%s2227_s3 + $0x48] sm:$0xff]   ;;  %v1754_v39 = vld [vmem:[%s2227_s3 + $0x50] sm:$0xff]   ;;  %s1445_s28 = sshll.u32 %s2237_s10, 1 }
   0xf   : > { %1563 = vmatpush3.bf16.msra.mxu0 %v1730_v8  ;;  %s326_s14 = scalar_lea.vmem %s2224_s0, %s1557_s24  ;;  %v1749_v35 = vld [vmem:[%s2227_s3] sm:$0xff]   ;;  %v1752_v37 = vld [vmem:[%s2227_s3 + $0x8] sm:$0xff]   ;;  %v1755_v40 = vld [vmem:[%s2227_s3 + $0x10] sm:$0xff]   ;;  %s330_s12 = scalar_lea.vmem %s2233_s9, %s1445_s28 }
  0x10   : > { %1656 = vmatpush3.bf16.msra.mxu1 %v1731_v9  ;;  %1564 = vmatprep.subr.bf16.mxu0 %v1732_v10  ;;  %v1446_v22 = vld [vmem:[%s326_s14 + $0x1] ss:$2 sm:$0x7f]  ;;  %v339_v23 = vld [vmem:[%s326_s14] ss:$2 sm:$0xff]  ;;  %v1753_v41 = vld [vmem:[%s2227_s3 + $0x90] sm:$0xff]  }
  0x11   : > { %1657 = vmatprep.subr.bf16.mxu1 %v1827_v2  ;;  %v342_v25 = vpack.c.bf16 %v339_v23, %v339_v23  ;;  %v335_v27 = vrot.slane %v1446_v22, 7  ;;  %v1447_v29 = vld [vmem:[%s326_s14 + $0x1] ss:$2 sm:$0xff]  ;;  %v1756_v42 = vld [vmem:[%s2227_s3 + $0x98] sm:$0xff]   ;;  %v1765_v51 = vld [vmem:[%s2227_s3 + $0xb0] sm:$0xff]  }
  0x12   : > { %v343_v34 = vpack.c.bf16 %v1447_v29, %v1447_v29  ;;  %v1750_v38 = vld [vmem:[%s2227_s3 + $0x88] sm:$0xff]   ;;  %v1757_v43 = vld [vmem:[%s2227_s3 + $0x58] sm:$0xff]   ;;  %v1759_v45 = vld [vmem:[%s2227_s3 + $0xa0] sm:$0xff]  }
  0x13   : > { %1565 = vmatpush3.bf16.msra.mxu0 %v1733_v11  ;;  %575 = vmatprep.mubr.bf16.mxu0 %v342_v25  ;;  %v1476_v32 = vpack.c.bf16 %v335_v27, %v335_v27  ;;  %v1758_v44 = vld [vmem:[%s2227_s3 + $0x18] sm:$0xff]   ;;  %v1760_v46 = vld [vmem:[%s2227_s3 + $0x60] sm:$0xff]   ;;  %v1762_v48 = vld [vmem:[%s2227_s3 + $0xa8] sm:$0xff]  }
  0x14   : > { %1658 = vmatpush3.bf16.msra.mxu1 %v1734_v12  ;;  %1566 = vmatprep.subr.bf16.mxu0 %v1735_v13  ;;  %v1761_v47 = vld [vmem:[%s2227_s3 + $0x20] sm:$0xff]   ;;  %v1763_v49 = vld [vmem:[%s2227_s3 + $0x68] sm:$0xff]   ;;  %v1766_v52 = vld [vmem:[%s2227_s3 + $0x70] sm:$0xff]  }
  0x15   : > { %1659 = vmatprep.subr.bf16.mxu1 %v1827_v2  ;;  %v1764_v50 = vld [vmem:[%s2227_s3 + $0x28] sm:$0xff]   ;;  %v1767_v53 = vld [vmem:[%s2227_s3 + $0x30] sm:$0xff]   ;;  %v1769_v54 = vld [vmem:[%s2227_s3 + $0x78] sm:$0xff]  }
  0x16   : > { %v1768_v55 = vld [vmem:[%s2227_s3 + $0xb8] sm:$0xff]   ;;  %v1772_v57 = vld [vmem:[%s2229_s5 + $0x40] sm:$0xff]   ;;  %v1779_v22 = vld [vmem:[%s2229_s5 + $0x10] sm:$0xff]  }
  0x17   : > { %1567 = vmatpush3.bf16.msra.mxu0 %v1736_v14  ;;  %v1770_v56 = vld [vmem:[%s2227_s3 + $0x38] sm:$0xff]   ;;  %v1448_v60 = vld [vmem:[%s2226_s2] ss:$0 sm:$0xff]  ;;  %v1786_v29 = vld [vmem:[%s2229_s5 + $0xa8] sm:$0xff]  }
  0x18   : > { %1660 = vmatpush3.bf16.msra.mxu1 %v1737_v15  ;;  %1568 = vmatprep.subr.bf16.mxu0 %v1738_v16  ;;  %v1771_v8 = vld [vmem:[%s2229_s5 + $0x80] sm:$0xff]   ;;  %v1780_v23 = vld [vmem:[%s2229_s5 + $0x98] sm:$0xff]   ;;  %vm1383_vm5 = vmor %vm1382_vm4, %vm337_vm1 }
  0x19   : > { %1661 = vmatprep.subr.bf16.mxu1 %v1827_v2  ;;  %v1773_v15 = vld [vmem:[%s2229_s5] sm:$0xff]   ;;  %v1782_v25 = vld [vmem:[%s2229_s5 + $0x18] sm:$0xff]  }
  0x1a   : > { %v1784_v27 = vld [vmem:[%s2229_s5 + $0x60] sm:$0xff]   ;;  %v1806_v31 = vld [vmem:[%s2231_s7 + $0x34] ss:$8 sps:$4 sm:$0xff]  }
  0x1b   : > { %1569 = vmatpush3.bf16.msra.mxu0 %v1739_v17  ;;  %v1774_v17 = vld [vmem:[%s2229_s5 + $0x88] sm:$0xff]  }
  0x1c   : > { %1662 = vmatpush3.bf16.msra.mxu1 %v1740_v18  ;;  %1570 = vmatprep.subr.bf16.mxu0 %v1741_v19  ;;  %v1775_v18 = vld [vmem:[%s2229_s5 + $0x48] sm:$0xff]  }
  0x1d   : > { %1663 = vmatprep.subr.bf16.mxu1 %v1827_v2  ;;  %v1776_v19 = vld [vmem:[%s2229_s5 + $0x8] sm:$0xff]  }
  0x1f   : > { %1571 = vmatpush3.bf16.msra.mxu0 %v1742_v20  ;;  %v1777_v20 = vld [vmem:[%s2229_s5 + $0x90] sm:$0xff]  }
  0x20   : > { %1664 = vmatpush3.bf16.msra.mxu1 %v1743_v21  ;;  %1572 = vmatprep.subr.bf16.mxu0 %v1744_v24  ;;  %v1778_v21 = vld [vmem:[%s2229_s5 + $0x50] sm:$0xff]   ;;  %v1781_v24 = vld [vmem:[%s2229_s5 + $0x58] sm:$0xff]  }
  0x21   : > { %1665 = vmatprep.subr.bf16.mxu1 %v1827_v2 }
  0x23   : > { %1573 = vmatpush3.bf16.msra.mxu0 %v1745_v26  ;;  %v1783_v26 = vld [vmem:[%s2229_s5 + $0xa0] sm:$0xff]  }
  0x24   : > { %1666 = vmatpush3.bf16.msra.mxu1 %v1746_v28  ;;  %1589 = vmatprep.subr.bf16.mxu0 %v1748_v30  ;;  %v1785_v28 = vld [vmem:[%s2229_s5 + $0x20] sm:$0xff]   ;;  %v1787_v30 = vld [vmem:[%s2229_s5 + $0x68] sm:$0xff]  }
  0x25   : > { %1671 = vmatprep.subr.bf16.mxu1 %v1827_v2 }
  0x26   : > { %1477 = vmatmul.mubr.msk.bf16.vlgmr.msra.gmra.mrb[0].mxu0 %vm1985_vm3, %v1476_v32  ;;  %v1788_v32 = vld [vmem:[%s2229_s5 + $0x28] sm:$0xff]  }
  0x27   : > { %1668 = vmatmul.mubr.bf16.vlgmr.msra.gmra.mrb[0].mxu1 %v343_v34  ;;  %1590 = vmatpush3.bf16.msra.mxu0 %v1749_v35  ;;  %v1790_v34 = vld [vmem:[%s2229_s5 + $0x70] sm:$0xff]  }
  0x28   : > { %1672 = vmatpush3.bf16.msra.mxu1 %v1747_v33  ;;  %1591 = vmatprep.subr.bf16.mxu0 %v1751_v36  ;;  %v1789_v33 = vld [vmem:[%s2229_s5 + $0xb0] sm:$0xff]   ;;  %v1793_v36 = vld [vmem:[%s2229_s5 + $0x78] sm:$0xff]  }
  0x29   : > { %1673 = vmatprep.subr.bf16.mxu1 %v1827_v2  ;;  %1687 = vmatprep.mubr.msk.bf16.mxu1 %vm1828_vm0, %v1827_v2  ;;  %v1791_v35 = vld [vmem:[%s2229_s5 + $0x30] sm:$0xff]  }
  0x2b   : > { %1592 = vmatpush3.bf16.msra.mxu0 %v1752_v37  ;;  %v1792_v37 = vld [vmem:[%s2229_s5 + $0xb8] sm:$0xff]  }
  0x2c   : > { %1674 = vmatpush3.bf16.msra.mxu1 %v1750_v38  ;;  %1593 = vmatprep.subr.bf16.mxu0 %v1754_v39  ;;  %v1794_v38 = vld [vmem:[%s2229_s5 + $0x38] sm:$0xff]   ;;  %v1797_v39 = vld [vmem:[%s2231_s7 + $0x4] ss:$8 sps:$4 sm:$0xff]  }
  0x2d   : > { %1675 = vmatprep.subr.bf16.mxu1 %v1827_v2 }
  0x2f   : > { %1594 = vmatpush3.bf16.msra.mxu0 %v1755_v40 }
  0x30   : > { %1676 = vmatpush3.bf16.msra.mxu1 %v1753_v41  ;;  %1595 = vmatprep.subr.bf16.mxu0 %v1757_v43 }
  0x31   : > { %1677 = vmatprep.subr.bf16.mxu1 %v1827_v2 }
  0x33   : > { %1596 = vmatpush3.bf16.msra.mxu0 %v1758_v44 }
  0x34   : > { %1678 = vmatpush3.bf16.msra.mxu1 %v1756_v42  ;;  %1597 = vmatprep.subr.bf16.mxu0 %v1760_v46 }
  0x35   : > { %1679 = vmatprep.subr.bf16.mxu1 %v1827_v2 }
  0x37   : > { %1598 = vmatpush3.bf16.msra.mxu0 %v1761_v47 }
  0x38   : > { %1680 = vmatpush3.bf16.msra.mxu1 %v1759_v45  ;;  %1599 = vmatprep.subr.bf16.mxu0 %v1763_v49 }
  0x39   : > { %1681 = vmatprep.subr.bf16.mxu1 %v1827_v2 }
  0x3b   : > { %1600 = vmatpush3.bf16.msra.mxu0 %v1764_v50 }
  0x3c   : > { %1682 = vmatpush3.bf16.msra.mxu1 %v1762_v48  ;;  %1601 = vmatprep.subr.bf16.mxu0 %v1766_v52 }
  0x3d   : > { %1683 = vmatprep.subr.bf16.mxu1 %v1827_v2 }
  0x3f   : > { %1602 = vmatpush3.bf16.msra.mxu0 %v1767_v53 }
  0x40   : > { %1684 = vmatpush3.bf16.msra.mxu1 %v1765_v51  ;;  %1603 = vmatprep.subr.bf16.mxu0 %v1769_v54 }
  0x41   : > { %1685 = vmatprep.subr.bf16.mxu1 %v1827_v2 }
  0x43   : > { %1604 = vmatpush3.bf16.msra.mxu0 %v1770_v56 }
  0x44   : > { %1686 = vmatpush3.bf16.msra.mxu1 %v1768_v55  ;;  %1620 = vmatprep.subr.bf16.mxu0 %v1772_v57 }
  0x45   : > { %1691 = vmatprep.subr.bf16.mxu1 %v1827_v2 }
  0xf9   : > { %v1574_v58 = vpop.f32.mrb[0].mxu0 }
  0xfa   : > { %v1575_v59 = vpop.f32.mrb[1].mxu0  ;;  %v617_v61 = vpop.f32.mrb[0].mxu1 }
  0xfb   : > { %v1576_v62 = vadd.f32 %v1575_v59, %v1574_v58  ;;  %v1577_v63 = vpop.f32.mrb[2].mxu0  ;;  %v1669_v0 = vpop.f32.mrb[1].mxu1  ;;  %v1795_v58 = vld [vmem:[%s2231_s7] ss:$8 sps:$4 sm:$0xff]  }
  0xfc   : > { %v1578_v1 = vpop.f32.mrb[3].mxu0  ;;  %v620_v3 = vpop.f32.mrb[2].mxu1  ;;  %v1801_v63 = vld [vmem:[%s2231_s7 + $0x20] ss:$8 sps:$4 sm:$0xff]   ;;  %v1804_v0 = vld [vmem:[%s2231_s7 + $0x30] ss:$8 sps:$4 sm:$0xff]  }
  0xfd   : > { %v578_v4 = vadd.f32 %v1576_v62, %v1448_v60  ;;  %v1670_v5 = vpop.f32.mrb[3].mxu1  ;;  %v1800_v60 = vld [vmem:[%s2231_s7 + $0x14] ss:$8 sps:$4 sm:$0xff]   ;;  %v1803_v62 = vld [vmem:[%s2231_s7 + $0x24] ss:$8 sps:$4 sm:$0xff]  }
  0xfe   : > { %v1809_v1 = vld [vmem:[%s2231_s7 + $0x44] ss:$8 sps:$4 sm:$0xff]   ;;  %v1807_v3 = vld [vmem:[%s2231_s7 + $0x40] ss:$8 sps:$4 sm:$0xff]   ;;  %v1810_v5 = vld [vmem:[%s2231_s7 + $0x50] ss:$8 sps:$4 sm:$0xff]  }
  0xff   : > { %v618_v6 = vadd.f32 %v617_v61, %v578_v4  ;;  %v1798_v61 = vld [vmem:[%s2231_s7 + $0x10] ss:$8 sps:$4 sm:$0xff]   ;;  %v1812_v4 = vld [vmem:[%s2231_s7 + $0x54] ss:$8 sps:$4 sm:$0xff]  }
 0x101   : > { %v623_v7 = vmax.f32 %v618_v6, 0.0  ;;  %v1813_v6 = vld [vmem:[%s2231_s7 + $0x60] ss:$8 sps:$4 sm:$0xff]  }
 0x103   : > { %624 = vst [vmem:[#allocation2] sm:$0xff] %v623_v7  ;;  %v1815_v7 = vld [vmem:[%s2231_s7 + $0x64] ss:$8 sps:$4 sm:$0xff]  }
 0x10a   : > { %v631_v9 = vld [vmem:[#allocation2] ss:$2 sm:$0xf]  ;;  %v632_v10 = vld [vmem:[#allocation2 + $0x1] ss:$2 sm:$0xf] }
 0x10b   : > { %v634_v11 = vpack.c.bf16 %v631_v9, %v631_v9  ;;  %v635_v12 = vpack.c.bf16 %v632_v10, %v632_v10  ;;  %v626_v13 = vld [vmem:[#allocation2 + $0x1] ss:$2 sm:$0x7]  ;;  %v1829_v9 = vmov 0   ;;  %v1816_v10 = vld [vmem:[%s2231_s7 + $0x70] ss:$8 sps:$4 sm:$0xff]  }
 0x10c   : > { %v628_v14 = vrot.slane %v626_v13, 7 }
 0x10d   : > { %867 = vmatprep.mubr.bf16.mxu0 %v634_v11  ;;  %1688 = vmatmul.mubr.bf16.vlgmr.msra.gmra.mrb[4].mxu1 %v635_v12 }
 0x10e   : > { %v1506_v16 = vpack.c.bf16 %v628_v14, %v628_v14  ;;  %1692 = vmatpush3.bf16.msra.mxu1 %v1771_v8  ;;  %1707 = vmatprep.mubr.msk.bf16.mxu1 %vm1828_vm0, %v1827_v2  ;;  %v1818_v8 = vld [vmem:[%s2231_s7 + $0x74] ss:$8 sps:$4 sm:$0xff]  }
 0x10f   : > { %1693 = vmatprep.subr.bf16.mxu1 %v1827_v2 }
 0x110   : > { %1507 = vmatmul.mubr.msk.bf16.vlgmr.msra.gmra.mrb[4].mxu0 %vm1985_vm3, %v1506_v16  ;;  %v1508_v16 = vld [vmem:[%s2230_s6] ss:$0 sm:$0xff] }
 0x111   : > { %1621 = vmatpush3.bf16.msra.mxu0 %v1773_v15 }
 0x112   : > { %1694 = vmatpush3.bf16.msra.mxu1 %v1774_v17  ;;  %1622 = vmatprep.subr.bf16.mxu0 %v1775_v18 }
 0x113   : > { %1695 = vmatprep.subr.bf16.mxu1 %v1827_v2 }
 0x115   : > { %1623 = vmatpush3.bf16.msra.mxu0 %v1776_v19 }
 0x116   : > { %1696 = vmatpush3.bf16.msra.mxu1 %v1777_v20  ;;  %1624 = vmatprep.subr.bf16.mxu0 %v1778_v21 }
 0x117   : > { %1697 = vmatprep.subr.bf16.mxu1 %v1827_v2 }
 0x119   : > { %1625 = vmatpush3.bf16.msra.mxu0 %v1779_v22 }
 0x11a   : > { %1698 = vmatpush3.bf16.msra.mxu1 %v1780_v23  ;;  %1626 = vmatprep.subr.bf16.mxu0 %v1781_v24 }
 0x11b   : > { %1699 = vmatprep.subr.bf16.mxu1 %v1827_v2 }
 0x11d   : > { %1627 = vmatpush3.bf16.msra.mxu0 %v1782_v25 }
 0x11e   : > { %1700 = vmatpush3.bf16.msra.mxu1 %v1783_v26  ;;  %1628 = vmatprep.subr.bf16.mxu0 %v1784_v27  ;;  %v1229_v26 = vlaneseq }
 0x11f   : > { %1701 = vmatprep.subr.bf16.mxu1 %v1827_v2 }
 0x120   : > { %v1230_v27 = vshrl.u32 %v1229_v26, 7 }
 0x121   : > { %1629 = vmatpush3.bf16.msra.mxu0 %v1785_v28 }
 0x122   : > { %1702 = vmatpush3.bf16.msra.mxu1 %v1786_v29  ;;  %1630 = vmatprep.subr.bf16.mxu0 %v1787_v30  ;;  %v1231_v28 = vsub.s32 0, %v1230_v27  ;;  %v1227_v29 = vld [vmem:[%s2232_s8] sm:$0x3]  ;;  %v1235_v30 = vsub.s32 1, %v1230_v27 }
 0x123   : > { %1703 = vmatprep.subr.bf16.mxu1 %v1827_v2 }
 0x125   : > { %1631 = vmatpush3.bf16.msra.mxu0 %v1788_v32  ;;  %v1830_v32 = vmov 1966171168  }
 0x126   : > { %1632 = vmatprep.subr.bf16.mxu0 %v1790_v34  ;;  %1704 = vmatpush3.bf16.msra.mxu1 %v1789_v33  ;;  %v1368_v33 = vunpack.c.l.s4 %v1830_v32  ;;  %v1232_v34 = vrot.slane %v1227_v29, %v1231_v28 }
 0x127   : > { %1705 = vmatprep.subr.bf16.mxu1 %v1827_v2  ;;  %v1478_v2 = vld [vmem:[%s2228_s4] ss:$0 sm:$0xff] }
 0x129   : > { %1633 = vmatpush3.bf16.msra.mxu0 %v1791_v35  ;;  %v1236_v35 = vrot.slane %v1227_v29, %v1235_v30 }
 0x12a   : > { %1634 = vmatprep.subr.bf16.mxu0 %v1793_v36  ;;  %1706 = vmatpush3.bf16.msra.mxu1 %v1792_v37  ;;  %v1369_v37 = vunpack.c.0.s8 %v1368_v33 }
 0x12d   : > { %1635 = vmatpush3.bf16.msra.mxu0 %v1794_v38 }
 0x12e   : > { %1319 = vmatprep.subr.bf16.mxu0 %v1797_v39 }
 0x1e0   : > { %v909_v40 = vpop.f32.mrb[4].mxu1 }
 0x1e1   : > { %v1689_v41 = vpop.f32.mrb[5].mxu1 }
 0x1e2   : > { %v912_v42 = vpop.f32.mrb[6].mxu1 }
 0x1e3   : > { %v1605_v43 = vpop.f32.mrb[4].mxu0  ;;  %v1690_v44 = vpop.f32.mrb[7].mxu1 }
 0x1e4   : > { %v1606_v45 = vpop.f32.mrb[5].mxu0 }
 0x1e5   : > { %v1607_v46 = vadd.f32 %v1606_v45, %v1605_v43  ;;  %v1608_v47 = vpop.f32.mrb[6].mxu0 }
 0x1e6   : > { %v1609_v48 = vpop.f32.mrb[7].mxu0 }
 0x1e7   : > { %v870_v49 = vadd.f32 %v1607_v46, %v1478_v2  ;;  %v1372_v2 = vsub.s32 %v1369_v37, %v1230_v27 }
 0x1e9   : > { %v910_v50 = vadd.f32 %v909_v40, %v870_v49 }
 0x1eb   : > { %v915_v51 = vmax.f32 %v910_v50, 0.0 }
 0x1ed   : > { %916 = vst [vmem:[#allocation3] sm:$0xf] %v915_v51 }
 0x1f4   : > { %v923_v52 = vld [vmem:[#allocation3] ss:$2 sm:$0x3]  ;;  %v924_v53 = vld [vmem:[#allocation3 + $0x1] ss:$2 sm:$0x3] }
 0x1f5   : > { %v926_v54 = vpack.c.bf16 %v923_v52, %v923_v52  ;;  %v927_v55 = vpack.c.bf16 %v924_v53, %v924_v53  ;;  %v918_v56 = vld [vmem:[#allocation3 + $0x1] ss:$2 sm:$0x1] }
 0x1f6   : > { %v920_v57 = vrot.slane %v918_v56, 7 }
 0x1f7   : > { %1159 = vmatprep.mubr.bf16.mxu0 %v926_v54  ;;  %1708 = vmatmul.mubr.bf16.vlgmr.msra.gmra.mrb[8].mxu1 %v927_v55 }
 0x1f8   : > { %v1536_v59 = vpack.c.bf16 %v920_v57, %v920_v57 }
 0x1fa   : > { %1537 = vmatmul.mubr.msk.bf16.vlgmr.msra.gmra.mrb[8].mxu0 %vm1985_vm3, %v1536_v59 }
 0x1fb   : > { %1320 = vmatpush1.bf16.msra.mxu0 %v1795_v58  ;;  %1351 = vmatprep.mubr.bf16.mxu0 %v1829_v9 }
 0x1fc   : > { %1321 = vmatprep.subr.bf16.mxu0 %v1800_v60 }
 0x1ff   : > { %1322 = vmatpush1.bf16.msra.mxu0 %v1798_v61 }
 0x200   : > { %1323 = vmatprep.subr.bf16.mxu0 %v1803_v62 }
 0x203   : > { %1324 = vmatpush1.bf16.msra.mxu0 %v1801_v63 }
 0x204   : > { %1325 = vmatprep.subr.bf16.mxu0 %v1806_v31 }
 0x207   : > { %1326 = vmatpush1.bf16.msra.mxu0 %v1804_v0 }
 0x208   : > { %1327 = vmatprep.subr.bf16.mxu0 %v1809_v1 }
 0x20b   : > { %1328 = vmatpush1.bf16.msra.mxu0 %v1807_v3 }
 0x20c   : > { %1329 = vmatprep.subr.bf16.mxu0 %v1812_v4 }
 0x20f   : > { %1330 = vmatpush1.bf16.msra.mxu0 %v1810_v5 }
 0x210   : > { %1331 = vmatprep.subr.bf16.mxu0 %v1815_v7 }
 0x213   : > { %1332 = vmatpush1.bf16.msra.mxu0 %v1813_v6 }
 0x214   : > { %1333 = vmatprep.subr.bf16.mxu0 %v1818_v8 }
 0x217   : > { %1334 = vmatpush1.bf16.msra.mxu0 %v1816_v10 }
 0x2ca   : > { %v1201_v11 = vpop.f32.mrb[8].mxu1 }
 0x2cb   : > { %v1709_v12 = vpop.f32.mrb[9].mxu1 }
 0x2cc   : > { %v1204_v13 = vpop.f32.mrb[10].mxu1 }
 0x2cd   : > { %v1636_v14 = vpop.f32.mrb[8].mxu0  ;;  %v1710_v15 = vpop.f32.mrb[11].mxu1 }
 0x2ce   : > { %v1637_v17 = vpop.f32.mrb[9].mxu0 }
 0x2cf   : > { %v1638_v18 = vadd.f32 %v1637_v17, %v1636_v14  ;;  %v1639_v19 = vpop.f32.mrb[10].mxu0 }
 0x2d0   : > { %v1640_v20 = vpop.f32.mrb[11].mxu0 }
 0x2d1   : > { %v1162_v21 = vadd.f32 %v1638_v18, %v1508_v16 }
 0x2d3   : > { %v1202_v22 = vadd.f32 %v1201_v11, %v1162_v21 }
 0x2d5   : > { %v1207_v23 = vmax.f32 %v1202_v22, 0.0 }
 0x2d7   : > { %1208 = vst [vmem:[#allocation4] sm:$0x3] %v1207_v23 }
 0x2de   : > { %v1209_v24 = vld [vmem:[#allocation4] sm:$0x3] }
 0x2df   : > { %v1210_v25 = vpack.c.bf16 %v1209_v24, %v1209_v24 }
 0x2e1   : > { %1352 = vmatmul.mubr.bf16.vlgmr.msra.gmra.mrb[12].mxu0 %v1210_v25 }
 0x3b4   : > { %v1353_v36 = vpop.f32.mrb[12].mxu0 }
 0x3b5   : > { %v1354_v38 = vadd.f32 %v1353_v36, %v1232_v34  ;;  %v1355_v39 = vpop.f32.mrb[13].mxu0 }
 0x3b6   : > { %v1356_v40 = vadd.f32 %v1355_v39, %v1236_v35  ;;  %v1357_v41 = vpop.f32.mrb[14].mxu0 }
 0x3b7   : > { %v1360_v42 = vmax.f32 %v1354_v38, 0.0  ;;  %v1358_v43 = vpop.f32.mrb[15].mxu0 }
 0x3b8   : > { %v1361_v44 = vmax.f32 %v1356_v40, 0.0 }
 0x3ba   : > { %v1554_v45 = vpack.c.bf16 %v1361_v44, %v1360_v42 }
 0x3bc   : > { %v1373_v46 = vrot.slane %v1554_v45, %v1372_v2 }
 0x3be   : > { %v1380_v47 = vrot.slane %v1373_v46, %v1372_v2 }
 0x3c0   : > { %1384 = vst.msk [vmem:[%s330_s12] sm:$0x3] %vm1383_vm5, %v1380_v47 }
 0x3c1 PF: > { %s19_s30 = sadd.s32 1, %s1825_s30  }
 0x3c2   : > { %p16_p4 = scmp.ge.s32.totalorder %s19_s30, 4  }
 0x3c4   :  { %18 = sbr.rel (!%p16_p4) target bundleno = 1 (0x1), region = 89 }

</bundles_post_ra>
